<compile_context>
chip_gen: v5e
topology: v5e:2x2
jax: 0.10.0
libtpu: 0.0.40
codegen_flags: <defaults>
</compile_context>

<pallas_src>
import functools
import math

import numpy as np
import jax
import jax.numpy as jnp
from jax.experimental import pallas as pl
from jax.experimental.pallas import tpu as pltpu


def _round_up(x, m):
    return (x + m - 1) // m * m


# ----------------------------------------------------------------------------
# Fused FeedForward kernel: (x @ W1 + b1) -> ReLU -> (@ W2 + b2)
# Hidden dim is consumed in dff_chunk-wide slabs to avoid materializing the
# full (tm, d_ff) f32 intermediate.
# ----------------------------------------------------------------------------
def _ff_fused_kernel(x_ref, w1_ref, b1_ref, w2_ref, b2_ref, o_ref, *, dff_chunk):
    # x:  (tm, size_p)   bf16
    # w1: (size_p, d_ff) bf16     b1: (1, d_ff)   f32
    # w2: (d_ff, size_p) bf16     b2: (1, size_p) f32
    # o:  (tm, size_p)   bf16
    x = x_ref[...]
    tm = x.shape[0]
    d_ff = w1_ref.shape[1]
    size_p = w2_ref.shape[1]

    acc = jnp.zeros((tm, size_p), jnp.float32)
    # Static (unrolled) loop over hidden-dim slabs; slab boundaries are
    # multiples of 128 lanes / 8 sublanes, so the ref slices are aligned.
    for c in range(0, d_ff, dff_chunk):
        hi = min(c + dff_chunk, d_ff)
        h = jnp.dot(x, w1_ref[:, c:hi], preferred_element_type=jnp.float32)
        h = jnp.maximum(h + b1_ref[:, c:hi], 0.0)
        # dropout: identity in eval mode
        acc = acc + jnp.dot(h.astype(w2_ref.dtype), w2_ref[c:hi, :],
                            preferred_element_type=jnp.float32)
    o_ref[...] = (acc + b2_ref[...]).astype(o_ref.dtype)


def _resident_spec(shape):
    """BlockSpec for a grid-invariant operand; single-buffered if supported."""
    index_map = lambda i: (0, 0)
    try:
        return pl.BlockSpec(shape, index_map, pipeline_mode=pl.Buffered(1))
    except (TypeError, AttributeError):     # older jax without pipeline_mode
        return pl.BlockSpec(shape, index_map)


# ----------------------------------------------------------------------------
# jit-compiled wrapper: pads feature dim to a multiple of 128, balances row
# blocks, runs one fused pallas_call, slices the pad back off.
# ----------------------------------------------------------------------------
@functools.partial(jax.jit, static_argnames=("size", "tile_m", "dff_chunk"))
def _feed_forward_impl(x, w1, b1, w2, b2, *, size, tile_m, dff_chunk):
    size_p, d_ff = w1.shape                     # padded feature dim, hidden dim
    lead = x.shape[:-1]
    M = int(np.prod(lead)) if lead else 1

    x2 = x.reshape(M, x.shape[-1]).astype(jnp.bfloat16)
    if size_p != x.shape[-1]:
        x2 = jnp.pad(x2, ((0, 0), (0, size_p - x.shape[-1])))

    # Balanced row blocks: < 8 rows of padding per block.
    n_blocks = pl.cdiv(M, tile_m)
    tm = _round_up(pl.cdiv(M, n_blocks), 8)
    Mp = n_blocks * tm
    if Mp != M:
        x2 = jnp.pad(x2, ((0, Mp - M), (0, 0)))

    flops = 2 * Mp * size_p * d_ff + 2 * Mp * d_ff * size_p
    bytes_accessed = (2 * Mp * size_p * 2                      # x in + out (bf16)
                      + (size_p * d_ff + d_ff * size_p) * 2    # W1 + W2 (bf16)
                      + (d_ff + size_p) * 4)                   # biases (f32)

    out = pl.pallas_call(
        functools.partial(_ff_fused_kernel, dff_chunk=dff_chunk),
        out_shape=jax.ShapeDtypeStruct((Mp, size_p), jnp.bfloat16),
        grid=(n_blocks,),
        in_specs=[
            pl.BlockSpec((tm, size_p), lambda i: (i, 0)),
            _resident_spec((size_p, d_ff)),
            _resident_spec((1, d_ff)),
            _resident_spec((d_ff, size_p)),
            _resident_spec((1, size_p)),
        ],
        out_specs=pl.BlockSpec((tm, size_p), lambda i: (i, 0)),
        compiler_params=pltpu.CompilerParams(
            dimension_semantics=("parallel",),
            vmem_limit_bytes=32 * 1024 * 1024),
        cost_estimate=pl.CostEstimate(
            flops=flops, transcendentals=0, bytes_accessed=bytes_accessed),
    )(x2, w1, b1, w2, b2)

    # Un-pad; cast back to the caller's dtype (fuses with the slice under jit).
    return out[:M, :size].astype(x.dtype).reshape(*lead, size)


def feed_forward(params, x, *, tile_m=512, dff_chunk=512):
    return _feed_forward_impl(
        x, params["w1"], params["b1"], params["w2"], params["b2"],
        size=params["size"], tile_m=tile_m, dff_chunk=dff_chunk)


# ----------------------------------------------------------------------------
# Deterministic parameter construction (nn.Linear-style uniform init)
# ----------------------------------------------------------------------------
def init_ff_params(key, flag, d_ff=2048):
    size = 4096 if flag == "e" else 300
    size_p = _round_up(size, 128)               # lane-dense padding (300 -> 384)

    k1, k2, k3, k4 = jax.random.split(key, 4)
    bound1 = 1.0 / math.sqrt(size)
    bound2 = 1.0 / math.sqrt(d_ff)
    w1 = jax.random.uniform(k1, (size, d_ff), jnp.float32, -bound1, bound1)
    b1 = jax.random.uniform(k2, (d_ff,), jnp.float32, -bound1, bound1)
    w2 = jax.random.uniform(k3, (d_ff, size), jnp.float32, -bound2, bound2)
    b2 = jax.random.uniform(k4, (size,), jnp.float32, -bound2, bound2)

    # matmul-ready storage: zero-padded to lane-dense width, weights in bf16
    w1_p = jnp.pad(w1, ((0, size_p - size), (0, 0))).astype(jnp.bfloat16)
    w2_p = jnp.pad(w2, ((0, 0), (0, size_p - size))).astype(jnp.bfloat16)
    b2_p = jnp.pad(b2, (0, size_p - size))

    return dict(
        w1=w1_p, b1=b1.reshape(1, d_ff),
        w2=w2_p, b2=b2_p.reshape(1, size_p),
        size=size,
        _ref=(w1, b1, w2, b2),                  # f32 originals for the check
    )


# ----------------------------------------------------------------------------
if __name__ == "__main__":
    B, T = 2, 8
    FLAG = "d"                                  # decoder-side FF: size = 300

    key = jax.random.PRNGKey(0)
    k_param, k_x = jax.random.split(key)

    params = init_ff_params(k_param, FLAG)
    x = jax.random.normal(k_x, (B, T, params["size"]), jnp.float32)

    out = feed_forward(params, x)
    jax.block_until_ready(out)
    assert out.shape == (B, T, params["size"])
    assert out.dtype == x.dtype

    # pure-JAX f32 reference; tolerance covers bf16 matmul operands, the bf16
    # cast of the ReLU intermediate, and the bf16 output writeback.
    w1, b1, w2, b2 = params["_ref"]
    ref = jnp.maximum(x @ w1 + b1, 0.0) @ w2 + b2
    err = float(jnp.max(jnp.abs(out - ref)))
    assert err < 7.5e-2, f"max abs error too large: {err}"

    print("KERNEL_OK")
</pallas_src>

<mosaic_0001>
module attributes {stable_mosaic.version = 11 : i64} {
  func.func @_ff_fused_kernel(%arg0: i32, %arg1: memref<16x384xbf16, #tpu.memory_space<vmem>>, %arg2: memref<384x2048xbf16, #tpu.memory_space<vmem>>, %arg3: memref<1x2048xf32, #tpu.memory_space<vmem>>, %arg4: memref<2048x384xbf16, #tpu.memory_space<vmem>>, %arg5: memref<1x384xf32, #tpu.memory_space<vmem>>, %arg6: memref<16x384xbf16, #tpu.memory_space<vmem>>) attributes {dimension_semantics = [#tpu.dimension_semantics<parallel>], iteration_bounds = array<i64: 1>, scalar_prefetch = 0 : i64, scratch_operands = 0 : i64, tpu.core_type = #tpu.core_type<tc>, window_params = [{transform_indices = @transform_0, window_bounds = array<i64: 16, 384>}, {pipeline_mode = #tpu.pipeline_mode<synchronous>, transform_indices = @transform_1, window_bounds = array<i64: 384, 2048>}, {pipeline_mode = #tpu.pipeline_mode<synchronous>, transform_indices = @transform_2, window_bounds = array<i64: 1, 2048>}, {pipeline_mode = #tpu.pipeline_mode<synchronous>, transform_indices = @transform_3, window_bounds = array<i64: 2048, 384>}, {pipeline_mode = #tpu.pipeline_mode<synchronous>, transform_indices = @transform_4, window_bounds = array<i64: 1, 384>}, {transform_indices = @transform_5, window_bounds = array<i64: 16, 384>}]} {
    %c0 = arith.constant 0 : index
    %c0_0 = arith.constant 0 : index
    %0 = vector.load %arg1[%c0, %c0_0] : memref<16x384xbf16, #tpu.memory_space<vmem>>, vector<16x384xbf16>
    %cst = arith.constant 0.000000e+00 : f32
    %1 = vector.broadcast %cst : f32 to vector<16x384xf32>
    %c0_1 = arith.constant 0 : index
    %c0_2 = arith.constant 0 : index
    %2 = vector.load %arg2[%c0_1, %c0_2] : memref<384x2048xbf16, #tpu.memory_space<vmem>>, vector<384x512xbf16>
    %cst_3 = arith.constant dense<0.000000e+00> : vector<16x512xf32>
    %3 = tpu.matmul %0, %2, %cst_3 {dimension_numbers = #tpu.dot_dimension_numbers<[1], [0], [0], [1], [0, 0, 1, 1], [], []>} : vector<16x384xbf16>, vector<384x512xbf16>, vector<16x512xf32> -> vector<16x512xf32>
    %c0_4 = arith.constant 0 : index
    %c0_5 = arith.constant 0 : index
    %4 = vector.load %arg3[%c0_4, %c0_5] : memref<1x2048xf32, #tpu.memory_space<vmem>>, vector<1x512xf32>
    %5 = vector.broadcast %4 : vector<1x512xf32> to vector<16x512xf32>
    %6 = arith.addf %3, %5 : vector<16x512xf32>
    %cst_6 = arith.constant 0.000000e+00 : f32
    %7 = vector.broadcast %cst_6 : f32 to vector<16x512xf32>
    %8 = arith.maximumf %6, %7 : vector<16x512xf32>
    %9 = arith.truncf %8 : vector<16x512xf32> to vector<16x512xbf16>
    %c0_7 = arith.constant 0 : index
    %c0_8 = arith.constant 0 : index
    %10 = vector.load %arg4[%c0_7, %c0_8] : memref<2048x384xbf16, #tpu.memory_space<vmem>>, vector<512x384xbf16>
    %cst_9 = arith.constant dense<0.000000e+00> : vector<16x384xf32>
    %11 = tpu.matmul %9, %10, %cst_9 {dimension_numbers = #tpu.dot_dimension_numbers<[1], [0], [0], [1], [0, 0, 1, 1], [], []>} : vector<16x512xbf16>, vector<512x384xbf16>, vector<16x384xf32> -> vector<16x384xf32>
    %12 = arith.addf %1, %11 : vector<16x384xf32>
    %c0_10 = arith.constant 0 : index
    %c512 = arith.constant 512 : index
    %13 = vector.load %arg2[%c0_10, %c512] : memref<384x2048xbf16, #tpu.memory_space<vmem>>, vector<384x512xbf16>
    %cst_11 = arith.constant dense<0.000000e+00> : vector<16x512xf32>
    %14 = tpu.matmul %0, %13, %cst_11 {dimension_numbers = #tpu.dot_dimension_numbers<[1], [0], [0], [1], [0, 0, 1, 1], [], []>} : vector<16x384xbf16>, vector<384x512xbf16>, vector<16x512xf32> -> vector<16x512xf32>
    %c0_12 = arith.constant 0 : index
    %c512_13 = arith.constant 512 : index
    %15 = vector.load %arg3[%c0_12, %c512_13] : memref<1x2048xf32, #tpu.memory_space<vmem>>, vector<1x512xf32>
    %16 = vector.broadcast %15 : vector<1x512xf32> to vector<16x512xf32>
    %17 = arith.addf %14, %16 : vector<16x512xf32>
    %cst_14 = arith.constant 0.000000e+00 : f32
    %18 = vector.broadcast %cst_14 : f32 to vector<16x512xf32>
    %19 = arith.maximumf %17, %18 : vector<16x512xf32>
    %20 = arith.truncf %19 : vector<16x512xf32> to vector<16x512xbf16>
    %c512_15 = arith.constant 512 : index
    %c0_16 = arith.constant 0 : index
    %21 = vector.load %arg4[%c512_15, %c0_16] : memref<2048x384xbf16, #tpu.memory_space<vmem>>, vector<512x384xbf16>
    %cst_17 = arith.constant dense<0.000000e+00> : vector<16x384xf32>
    %22 = tpu.matmul %20, %21, %cst_17 {dimension_numbers = #tpu.dot_dimension_numbers<[1], [0], [0], [1], [0, 0, 1, 1], [], []>} : vector<16x512xbf16>, vector<512x384xbf16>, vector<16x384xf32> -> vector<16x384xf32>
    %23 = arith.addf %12, %22 : vector<16x384xf32>
    %c0_18 = arith.constant 0 : index
    %c1024 = arith.constant 1024 : index
    %24 = vector.load %arg2[%c0_18, %c1024] : memref<384x2048xbf16, #tpu.memory_space<vmem>>, vector<384x512xbf16>
    %cst_19 = arith.constant dense<0.000000e+00> : vector<16x512xf32>
    %25 = tpu.matmul %0, %24, %cst_19 {dimension_numbers = #tpu.dot_dimension_numbers<[1], [0], [0], [1], [0, 0, 1, 1], [], []>} : vector<16x384xbf16>, vector<384x512xbf16>, vector<16x512xf32> -> vector<16x512xf32>
    %c0_20 = arith.constant 0 : index
    %c1024_21 = arith.constant 1024 : index
    %26 = vector.load %arg3[%c0_20, %c1024_21] : memref<1x2048xf32, #tpu.memory_space<vmem>>, vector<1x512xf32>
    %27 = vector.broadcast %26 : vector<1x512xf32> to vector<16x512xf32>
    %28 = arith.addf %25, %27 : vector<16x512xf32>
    %cst_22 = arith.constant 0.000000e+00 : f32
    %29 = vector.broadcast %cst_22 : f32 to vector<16x512xf32>
    %30 = arith.maximumf %28, %29 : vector<16x512xf32>
    %31 = arith.truncf %30 : vector<16x512xf32> to vector<16x512xbf16>
    %c1024_23 = arith.constant 1024 : index
    %c0_24 = arith.constant 0 : index
    %32 = vector.load %arg4[%c1024_23, %c0_24] : memref<2048x384xbf16, #tpu.memory_space<vmem>>, vector<512x384xbf16>
    %cst_25 = arith.constant dense<0.000000e+00> : vector<16x384xf32>
    %33 = tpu.matmul %31, %32, %cst_25 {dimension_numbers = #tpu.dot_dimension_numbers<[1], [0], [0], [1], [0, 0, 1, 1], [], []>} : vector<16x512xbf16>, vector<512x384xbf16>, vector<16x384xf32> -> vector<16x384xf32>
    %34 = arith.addf %23, %33 : vector<16x384xf32>
    %c0_26 = arith.constant 0 : index
    %c1536 = arith.constant 1536 : index
    %35 = vector.load %arg2[%c0_26, %c1536] : memref<384x2048xbf16, #tpu.memory_space<vmem>>, vector<384x512xbf16>
    %cst_27 = arith.constant dense<0.000000e+00> : vector<16x512xf32>
    %36 = tpu.matmul %0, %35, %cst_27 {dimension_numbers = #tpu.dot_dimension_numbers<[1], [0], [0], [1], [0, 0, 1, 1], [], []>} : vector<16x384xbf16>, vector<384x512xbf16>, vector<16x512xf32> -> vector<16x512xf32>
    %c0_28 = arith.constant 0 : index
    %c1536_29 = arith.constant 1536 : index
    %37 = vector.load %arg3[%c0_28, %c1536_29] : memref<1x2048xf32, #tpu.memory_space<vmem>>, vector<1x512xf32>
    %38 = vector.broadcast %37 : vector<1x512xf32> to vector<16x512xf32>
    %39 = arith.addf %36, %38 : vector<16x512xf32>
    %cst_30 = arith.constant 0.000000e+00 : f32
    %40 = vector.broadcast %cst_30 : f32 to vector<16x512xf32>
    %41 = arith.maximumf %39, %40 : vector<16x512xf32>
    %42 = arith.truncf %41 : vector<16x512xf32> to vector<16x512xbf16>
    %c1536_31 = arith.constant 1536 : index
    %c0_32 = arith.constant 0 : index
    %43 = vector.load %arg4[%c1536_31, %c0_32] : memref<2048x384xbf16, #tpu.memory_space<vmem>>, vector<512x384xbf16>
    %cst_33 = arith.constant dense<0.000000e+00> : vector<16x384xf32>
    %44 = tpu.matmul %42, %43, %cst_33 {dimension_numbers = #tpu.dot_dimension_numbers<[1], [0], [0], [1], [0, 0, 1, 1], [], []>} : vector<16x512xbf16>, vector<512x384xbf16>, vector<16x384xf32> -> vector<16x384xf32>
    %45 = arith.addf %34, %44 : vector<16x384xf32>
    %c0_34 = arith.constant 0 : index
    %c0_35 = arith.constant 0 : index
    %46 = vector.load %arg5[%c0_34, %c0_35] : memref<1x384xf32, #tpu.memory_space<vmem>>, vector<1x384xf32>
    %47 = vector.broadcast %46 : vector<1x384xf32> to vector<16x384xf32>
    %48 = arith.addf %45, %47 : vector<16x384xf32>
    %49 = arith.truncf %48 : vector<16x384xf32> to vector<16x384xbf16>
    %c0_36 = arith.constant 0 : index
    %c0_37 = arith.constant 0 : index
    %50 = vector.load %arg6[%c0_36, %c0_37] : memref<16x384xbf16, #tpu.memory_space<vmem>>, vector<16x384xbf16>
    tpu.vector_store %arg6[%c0_36, %c0_37], %49 {strides = array<i32>} : memref<16x384xbf16, #tpu.memory_space<vmem>>, vector<16x384xbf16>,
    return
  }
  func.func @transform_0(%arg0: i32) -> (i32, i32) {
    %c0_i32 = arith.constant 0 : i32
    %c0_i32_0 = arith.constant 0 : i32
    return %arg0, %c0_i32 : i32, i32
  }
  func.func @transform_1(%arg0: i32) -> (i32, i32) {
    %c0_i32 = arith.constant 0 : i32
    %c0_i32_0 = arith.constant 0 : i32
    %c0_i32_1 = arith.constant 0 : i32
    return %c0_i32, %c0_i32_0 : i32, i32
  }
  func.func @transform_2(%arg0: i32) -> (i32, i32) {
    %c0_i32 = arith.constant 0 : i32
    %c0_i32_0 = arith.constant 0 : i32
    %c0_i32_1 = arith.constant 0 : i32
    return %c0_i32, %c0_i32_0 : i32, i32
  }
  func.func @transform_3(%arg0: i32) -> (i32, i32) {
    %c0_i32 = arith.constant 0 : i32
    %c0_i32_0 = arith.constant 0 : i32
    %c0_i32_1 = arith.constant 0 : i32
    return %c0_i32, %c0_i32_0 : i32, i32
  }
  func.func @transform_4(%arg0: i32) -> (i32, i32) {
    %c0_i32 = arith.constant 0 : i32
    %c0_i32_0 = arith.constant 0 : i32
    %c0_i32_1 = arith.constant 0 : i32
    return %c0_i32, %c0_i32_0 : i32, i32
  }
  func.func @transform_5(%arg0: i32) -> (i32, i32) {
    %c0_i32 = arith.constant 0 : i32
    %c0_i32_0 = arith.constant 0 : i32
    return %arg0, %c0_i32 : i32, i32
  }
}

</mosaic_0001>

<bundles_post_ra>
// kernel: _feed_forward_impl.1
= control target key start
LH: loop header
LB: loop body
LE: loop exit
PB: predicated region body
PF: predicated region fallthrough
CT: control target
= control target key end

     0   :  { %10 = vsyncpa [#allocation3], 0  ;;  %s10860_s0 = inlined_call_operand.vmem [shape: bf16[16,384], index: 0, kind: input, shape index: {}]   ;;  %s10861_s1 = inlined_call_operand.hbm [shape: bf16[384,2048], index: 1, kind: input, shape index: {}]   ;;  %s10862_s2 = inlined_call_operand.hbm [shape: f32[1,2048], index: 2, kind: input, shape index: {}]   ;;  %s10863_s3 = inlined_call_operand.hbm [shape: bf16[2048,384], index: 3, kind: input, shape index: {}]   ;;  %s10864_s4 = inlined_call_operand.hbm [shape: f32[1,384], index: 4, kind: input, shape index: {}]   ;;  %s10865_s5 = inlined_call_operand.vmem [shape: bf16[16,384], index: 5, kind: output, shape index: {}]  }
   0x1   :  { %11 = vsyncpa [#allocation5], 0  ;;  %s33_s20 = sshll.u32 %s10862_s2, 4  ;;  %s34_s20 = int_to_ptr.hbm [resolvable:$true] %s33_s20 }
   0x2   :  { %12 = vsyncpa [#allocation8], 0  ;;  %s10401_s21 = smov [#allocation4]   ;;  %s19_s25 = sshll.u32 %s10861_s1, 4  ;;  %s20_s25 = int_to_ptr.hbm [resolvable:$true] %s19_s25 }
   0x3   :  { %s35_s22 = sshll.u32 %s10401_s21, 4  ;;  %s10402_s26 = smov [#allocation2]   ;;  %s36_s22 = int_to_ptr.vmem [resolvable:$true] %s35_s22 }
   0x4   :  { %38 = dma.hbm_to_vmem [thread:$0]  %s34_s20, 256, %s36_s22, [#allocation5]  }
   0x5   :  { %s21_s27 = sshll.u32 %s10402_s26, 4  ;;  %s10403_s28 = smov 1024   ;;  %s22_s27 = int_to_ptr.vmem [resolvable:$true] %s21_s27 }
   0x6   :  { %s10404_s29 = smov 64   ;;  %s43_s2 = sshll.u32 %s10863_s3, 4  ;;  %s44_s2 = int_to_ptr.hbm [resolvable:$true] %s43_s2 }
   0x7   :  { %27 = dma.hbm_to_vmem [thread:$0]  %s20_s25, 49152, %s22_s27, [#allocation3], %s10403_s28, %s10403_s28, %s10404_s29  }
   0x8   :  { %s10405_s7 = smov [#allocation6]   ;;  %s57_s1 = sshll.u32 %s10864_s4, 4  ;;  %s58_s1 = int_to_ptr.hbm [resolvable:$true] %s57_s1 }
   0x9   :  { %s45_s8 = sshll.u32 %s10405_s7, 4  ;;  %s10406_s11 = smov 192   ;;  %s46_s8 = int_to_ptr.vmem [resolvable:$true] %s45_s8 }
   0xa   :  { %s10407_s12 = smov 12   ;;  %s10408_s13 = smov [#allocation7]  }
   0xb   :  { %51 = dma.hbm_to_vmem [thread:$0]  %s44_s2, 49152, %s46_s8, [#allocation5], %s10406_s11, %s10406_s11, %s10407_s12  }
   0xc   :  { %s59_s14 = sshll.u32 %s10408_s13, 4  ;;  %s60_s14 = int_to_ptr.vmem [resolvable:$true] %s59_s14 }
   0xd   :  { %62 = dma.hbm_to_vmem [thread:$0]  %s58_s1, 48, %s60_s14, [#allocation8]  }
   0xe   :  { %10395 = dma.done.wait [#allocation3], 49152  }
   0xf   :  { %10396 = vsyncadd [#allocation3], 4294918144 }
  0x10   :  { %10397 = dma.done.wait [#allocation5], 49408  }
  0x11   :  { %10398 = vsyncadd [#allocation5], 4294917888 }
  0x12   :  { %10399 = dma.done.wait [#allocation8], 48  }
  0x13   :  { %10400 = vsyncadd [#allocation8], 4294967248  ;;  %v6562_v0 = vld [vmem:[#allocation2 + $0x380] sm:$0xf]  ;;  %v9551_v9 = vld [vmem:[#allocation2 + $0x384] sm:$0xf] }
  0x14   :  { %v9553_v1 = vld [vmem:[#allocation2 + $0x3bc] sm:$0xf0]  ;;  %v6564_v10 = vld [vmem:[#allocation2 + $0x3c0] sm:$0xf0] }
  0x15   :  { %v6690_v2 = vld [vmem:[#allocation2 + $0x780] sm:$0xf]  ;;  %v6563_v3 = vor.u32 %v9553_v1, %v6562_v0  ;;  %v6567_v12 = vor.u32 %v9551_v9, %v6564_v10  ;;  %v9547_v20 = vld [vmem:[#allocation2 + $0x304] sm:$0xf] }
  0x16   :  { %v9585_v4 = vld [vmem:[#allocation2 + $0x7bc] sm:$0xf0]  ;;  %v6548_v22 = vld [vmem:[#allocation2 + $0x340] sm:$0xf0] }
  0x17   :  { %v6818_v5 = vld [vmem:[#allocation2 + $0xb80] sm:$0xf]  ;;  %v6691_v7 = vor.u32 %v9585_v4, %v6690_v2  ;;  %685 = vmatpush.bf16.msra.mxu0 %v6563_v3  ;;  %727 = vmatpush.bf16.msra.mxu3 %v6567_v12  ;;  %v6551_v25 = vor.u32 %v9547_v20, %v6548_v22  ;;  %v9543_v31 = vld [vmem:[#allocation2 + $0x284] sm:$0xf] }
  0x18   :  { %v9617_v6 = vld [vmem:[#allocation2 + $0xbbc] sm:$0xf0]  ;;  %v6532_v32 = vld [vmem:[#allocation2 + $0x2c0] sm:$0xf0] }
  0x19   :  { %v6819_v8 = vor.u32 %v9617_v6, %v6818_v5  ;;  %v6546_v11 = vld [vmem:[#allocation2 + $0x300] sm:$0xf]  ;;  %699 = vmatpush.bf16.msra.mxu1 %v6691_v7  ;;  %v6535_v38 = vor.u32 %v9543_v31, %v6532_v32  ;;  %v9539_v42 = vld [vmem:[#allocation2 + $0x204] sm:$0xf] }
  0x1a   :  { %v9549_v13 = vld [vmem:[#allocation2 + $0x33c] sm:$0xf0]  ;;  %v6516_v43 = vld [vmem:[#allocation2 + $0x240] sm:$0xf0] }
  0x1b   :  { %v6674_v14 = vld [vmem:[#allocation2 + $0x700] sm:$0xf]  ;;  %713 = vmatpush.bf16.msra.mxu2 %v6819_v8  ;;  %v6547_v16 = vor.u32 %v9549_v13, %v6546_v11  ;;  %728 = vmatpush.bf16.msra.mxu3 %v6551_v25  ;;  %v6519_v50 = vor.u32 %v9539_v42, %v6516_v43  ;;  %v9535_v54 = vld [vmem:[#allocation2 + $0x184] sm:$0xf] }
  0x1c   :  { %v9581_v15 = vld [vmem:[#allocation2 + $0x73c] sm:$0xf0]  ;;  %v6500_v55 = vld [vmem:[#allocation2 + $0x1c0] sm:$0xf0] }
  0x1d   :  { %v6675_v17 = vor.u32 %v9581_v15, %v6674_v14  ;;  %v6802_v18 = vld [vmem:[#allocation2 + $0xb00] sm:$0xf]  ;;  %686 = vmatpush.bf16.msra.mxu0 %v6547_v16  ;;  %v6503_v62 = vor.u32 %v9535_v54, %v6500_v55  ;;  %v9531_v2 = vld [vmem:[#allocation2 + $0x104] sm:$0xf] }
  0x1e   :  { %v9613_v19 = vld [vmem:[#allocation2 + $0xb3c] sm:$0xf0]  ;;  %v6484_v3 = vld [vmem:[#allocation2 + $0x140] sm:$0xf0] }
  0x1f   :  { %v6803_v21 = vor.u32 %v9613_v19, %v6802_v18  ;;  %v6530_v23 = vld [vmem:[#allocation2 + $0x280] sm:$0xf]  ;;  %700 = vmatpush.bf16.msra.mxu1 %v6675_v17  ;;  %729 = vmatpush.bf16.msra.mxu3 %v6535_v38  ;;  %v6487_v10 = vor.u32 %v9531_v2, %v6484_v3  ;;  %v9527_v14 = vld [vmem:[#allocation2 + $0x84] sm:$0xf]  ;;  %v9586_v38 = vld [vmem:[#allocation2 + $0x7c4] sm:$0xf0] }
  0x20   :  { %v9545_v24 = vld [vmem:[#allocation2 + $0x2bc] sm:$0xf0]  ;;  %v6468_v15 = vld [vmem:[#allocation2 + $0xc0] sm:$0xf0]  ;;  %v6440_v2 = vld [vmem:[%s10860_s0 + $0xc] sm:$0xf0] }
  0x21   :  { %v6658_v26 = vld [vmem:[#allocation2 + $0x680] sm:$0xf]  ;;  %v6531_v29 = vor.u32 %v9545_v24, %v6530_v23  ;;  %714 = vmatpush.bf16.msra.mxu2 %v6803_v21  ;;  %v6471_v24 = vor.u32 %v9527_v14, %v6468_v15  ;;  %v6820_v32 = vld [vmem:[#allocation2 + $0xbc0] sm:$0xf0]  ;;  %v6666_v3 = vld [vmem:[#allocation2 + $0x688] sm:$0xf] }
  0x22   :  { %v9577_v27 = vld [vmem:[#allocation2 + $0x6bc] sm:$0xf0]  ;;  %v9575_v55 = vld [vmem:[#allocation2 + $0x684] sm:$0xf]  ;;  %v6522_v15 = vld [vmem:[#allocation2 + $0x208] sm:$0xf] }
  0x23   :  { %v6786_v28 = vld [vmem:[#allocation2 + $0xa80] sm:$0xf]  ;;  %v6659_v33 = vor.u32 %v9577_v27, %v6658_v26  ;;  %687 = vmatpush.bf16.msra.mxu0 %v6531_v29  ;;  %730 = vmatpush.bf16.msra.mxu3 %v6519_v50  ;;  %v9523_v26 = vld [vmem:[#allocation2 + $0x4] sm:$0xf]  ;;  %v6682_v50 = vld [vmem:[#allocation2 + $0x708] sm:$0xf] }
  0x24   :  { %v9609_v30 = vld [vmem:[#allocation2 + $0xabc] sm:$0xf0]  ;;  %v6452_v27 = vld [vmem:[#allocation2 + $0x40] sm:$0xf0] }
  0x25   :  { %v6787_v34 = vor.u32 %v9609_v30, %v6786_v28  ;;  %v6514_v35 = vld [vmem:[#allocation2 + $0x200] sm:$0xf]  ;;  %701 = vmatpush.bf16.msra.mxu1 %v6659_v33  ;;  %v9583_v28 = vld [vmem:[#allocation2 + $0x784] sm:$0xf]  ;;  %v6570_v33 = vld [vmem:[#allocation2 + $0x388] sm:$0xf] }
  0x26   :  { %v9541_v36 = vld [vmem:[#allocation2 + $0x23c] sm:$0xf0]  ;;  %v6692_v29 = vld [vmem:[#allocation2 + $0x7c0] sm:$0xf0] }
  0x27   :  { %v6642_v37 = vld [vmem:[#allocation2 + $0x600] sm:$0xf]  ;;  %v6515_v44 = vor.u32 %v9541_v36, %v6514_v35  ;;  %715 = vmatpush.bf16.msra.mxu2 %v6787_v34  ;;  %731 = vmatpush.bf16.msra.mxu3 %v6503_v62  ;;  %v9615_v30 = vld [vmem:[#allocation2 + $0xb84] sm:$0xf]  ;;  %v9554_v34 = vld [vmem:[#allocation2 + $0x3c4] sm:$0xf0] }
  0x28   :  { %v9573_v39 = vld [vmem:[#allocation2 + $0x63c] sm:$0xf0]  ;;  %v6823_v42 = vor.u32 %v9615_v30, %v6820_v32  ;;  %v6571_v43 = vor.u32 %v9554_v34, %v6570_v33  ;;  %v6538_v62 = vld [vmem:[#allocation2 + $0x288] sm:$0xf] }
  0x29   :  { %v6770_v40 = vld [vmem:[#allocation2 + $0xa00] sm:$0xf]  ;;  %v6643_v45 = vor.u32 %v9573_v39, %v6642_v37  ;;  %688 = vmatpush.bf16.msra.mxu0 %v6515_v44  ;;  %v6698_v37 = vld [vmem:[#allocation2 + $0x788] sm:$0xf]  ;;  %v6455_v39 = vor.u32 %v9523_v26, %v6452_v27  ;;  %v6676_v44 = vld [vmem:[#allocation2 + $0x740] sm:$0xf0] }
  0x2a   :  { %v9605_v41 = vld [vmem:[#allocation2 + $0xa3c] sm:$0xf0]  ;;  %v9599_v26 = vld [vmem:[#allocation2 + $0x984] sm:$0xf]  ;;  %v9538_v30 = vld [vmem:[#allocation2 + $0x1c4] sm:$0xf0] }
  0x2b   :  { %v6771_v46 = vor.u32 %v9605_v41, %v6770_v40  ;;  %v6498_v47 = vld [vmem:[#allocation2 + $0x180] sm:$0xf]  ;;  %702 = vmatpush.bf16.msra.mxu1 %v6643_v45  ;;  %732 = vmatpush.bf16.msra.mxu3 %v6487_v10  ;;  %v6695_v40 = vor.u32 %v9583_v28, %v6692_v29  ;;  %v9579_v41 = vld [vmem:[#allocation2 + $0x704] sm:$0xf]  ;;  %v6506_v29 = vld [vmem:[#allocation2 + $0x188] sm:$0xf] }
  0x2c   :  { %v9537_v48 = vld [vmem:[#allocation2 + $0x1bc] sm:$0xf0]  ;;  %v9611_v45 = vld [vmem:[#allocation2 + $0xb04] sm:$0xf]  ;;  %v6679_v54 = vor.u32 %v9579_v41, %v6676_v44  ;;  %v9570_v32 = vld [vmem:[#allocation2 + $0x5c4] sm:$0xf0] }
  0x2d   :  { %v6626_v49 = vld [vmem:[#allocation2 + $0x580] sm:$0xf]  ;;  %v6499_v56 = vor.u32 %v9537_v48, %v6498_v47  ;;  %716 = vmatpush.bf16.msra.mxu2 %v6771_v46  ;;  %v6804_v46 = vld [vmem:[#allocation2 + $0xb40] sm:$0xf0]  ;;  %v6699_v47 = vor.u32 %v9586_v38, %v6698_v37  ;;  %v6554_v48 = vld [vmem:[#allocation2 + $0x308] sm:$0xf] }
  0x2e   :  { %v9569_v51 = vld [vmem:[#allocation2 + $0x5bc] sm:$0xf0]  ;;  %v6756_v28 = vld [vmem:[#allocation2 + $0x9c0] sm:$0xf0]  ;;  %v6490_v41 = vld [vmem:[#allocation2 + $0x108] sm:$0xf] }
  0x2f   :  { %v6754_v52 = vld [vmem:[#allocation2 + $0x980] sm:$0xf]  ;;  %v6627_v57 = vor.u32 %v9569_v51, %v6626_v49  ;;  %689 = vmatpush.bf16.msra.mxu0 %v6499_v56  ;;  %733 = vmatpush.bf16.msra.mxu3 %v6471_v24  ;;  %v9550_v49 = vld [vmem:[#allocation2 + $0x344] sm:$0xf0]  ;;  %v6660_v56 = vld [vmem:[#allocation2 + $0x6c0] sm:$0xf0]  ;;  %v6759_v34 = vor.u32 %v9599_v26, %v6756_v28 }
  0x30   :  { %v9601_v53 = vld [vmem:[#allocation2 + $0x9bc] sm:$0xf0]  ;;  %v9582_v51 = vld [vmem:[#allocation2 + $0x744] sm:$0xf0]  ;;  %v9567_v24 = vld [vmem:[#allocation2 + $0x584] sm:$0xf] }
  0x31   :  { %v6755_v58 = vor.u32 %v9601_v53, %v6754_v52  ;;  %v6482_v59 = vld [vmem:[#allocation2 + $0x100] sm:$0xf]  ;;  %703 = vmatpush.bf16.msra.mxu1 %v6627_v57  ;;  %v9521_v53 = vld [vmem:[%s10860_s0 + $0x8] sm:$0xf0]  ;;  %v6612_v37 = vld [vmem:[#allocation2 + $0x540] sm:$0xf0] }
  0x32   :  { %v9533_v60 = vld [vmem:[#allocation2 + $0x13c] sm:$0xf0]  ;;  %v9595_v38 = vld [vmem:[#allocation2 + $0x904] sm:$0xf]  ;;  %v9566_v44 = vld [vmem:[#allocation2 + $0x544] sm:$0xf0] }
  0x33   :  { %v6610_v61 = vld [vmem:[#allocation2 + $0x500] sm:$0xf]  ;;  %v6483_v4 = vor.u32 %v9533_v60, %v6482_v59  ;;  %717 = vmatpush.bf16.msra.mxu2 %v6755_v58  ;;  %734 = vmatpush.bf16.msra.mxu3 %v6455_v39  ;;  %v6807_v58 = vor.u32 %v9611_v45, %v6804_v46  ;;  %v6555_v59 = vor.u32 %v9550_v49, %v6554_v48  ;;  %v9607_v60 = vld [vmem:[#allocation2 + $0xa84] sm:$0xf]  ;;  %v9580_v28 = vld [vmem:[#allocation2 + $0x70c] sm:$0xf] }
  0x34   :  { %v9565_v63 = vld [vmem:[#allocation2 + $0x53c] sm:$0xf0]  ;;  %v9559_v48 = vld [vmem:[#allocation2 + $0x484] sm:$0xf] }
  0x35   :  { %v6738_v0 = vld [vmem:[#allocation2 + $0x900] sm:$0xf]  ;;  %v6611_v5 = vor.u32 %v9565_v63, %v6610_v61  ;;  %690 = vmatpush.bf16.msra.mxu0 %v6483_v4  ;;  %v6788_v61 = vld [vmem:[#allocation2 + $0xac0] sm:$0xf0]  ;;  %v6683_v63 = vor.u32 %v9582_v51, %v6682_v50  ;;  %v9578_v4 = vld [vmem:[#allocation2 + $0x6c4] sm:$0xf0] }
  0x36   :  { %v9597_v1 = vld [vmem:[#allocation2 + $0x93c] sm:$0xf0]  ;;  %v6667_v14 = vor.u32 %v9578_v4, %v6666_v3  ;;  %v6596_v49 = vld [vmem:[#allocation2 + $0x4c0] sm:$0xf0]  ;;  %v9526_v3 = vld [vmem:[#allocation2 + $0x44] sm:$0xf0] }
  0x37   :  { %v6739_v6 = vor.u32 %v9597_v1, %v6738_v0  ;;  %v6466_v7 = vld [vmem:[#allocation2 + $0x80] sm:$0xf]  ;;  %704 = vmatpush.bf16.msra.mxu1 %v6611_v5  ;;  %783 = vmatpush.bf16.msrb.mxu3 %v6699_v47  ;;  %v9546_v0 = vld [vmem:[#allocation2 + $0x2c4] sm:$0xf0]  ;;  %v9520_v1 = vld [vmem:[%s10860_s0 + $0x4] sm:$0xf] }
  0x38   :  { %v9529_v8 = vld [vmem:[#allocation2 + $0xbc] sm:$0xf0]  ;;  %v10466_v5 = vor.u32 %v9520_v1, %v6440_v2  ;;  %v6539_v10 = vor.u32 %v9546_v0, %v6538_v62  ;;  %v9591_v50 = vld [vmem:[#allocation2 + $0x884] sm:$0xf]  ;;  %v6458_v1 = vld [vmem:[#allocation2 + $0x8] sm:$0xf] }
  0x39   :  { %v6594_v9 = vld [vmem:[#allocation2 + $0x480] sm:$0xf]  ;;  %v6467_v16 = vor.u32 %v9529_v8, %v6466_v7  ;;  %718 = vmatpush.bf16.msra.mxu2 %v6739_v6  ;;  %v6663_v6 = vor.u32 %v9575_v55, %v6660_v56  ;;  %v9571_v7 = vld [vmem:[#allocation2 + $0x604] sm:$0xf]  ;;  %v6602_v55 = vld [vmem:[#allocation2 + $0x488] sm:$0xf] }
  0x3a   :  { %v9561_v11 = vld [vmem:[#allocation2 + $0x4bc] sm:$0xf0]  ;;  %v6644_v8 = vld [vmem:[#allocation2 + $0x640] sm:$0xf0]  ;;  %v9562_v56 = vld [vmem:[#allocation2 + $0x4c4] sm:$0xf0] }
  0x3b   :  { %v6722_v12 = vld [vmem:[#allocation2 + $0x880] sm:$0xf]  ;;  %v6595_v19 = vor.u32 %v9561_v11, %v6594_v9  ;;  %691 = vmatpush.bf16.msra.mxu0 %v6467_v16  ;;  %v6791_v9 = vor.u32 %v9607_v60, %v6788_v61  ;;  %v9603_v11 = vld [vmem:[#allocation2 + $0xa04] sm:$0xf]  ;;  %784 = vmatpush.bf16.msrb.mxu3 %v6683_v63  ;;  %v9542_v16 = vld [vmem:[#allocation2 + $0x244] sm:$0xf0]  ;;  %v6603_v2 = vor.u32 %v9562_v56, %v6602_v55 }
  0x3c   :  { %v9593_v13 = vld [vmem:[#allocation2 + $0x8bc] sm:$0xf0]  ;;  %v6580_v60 = vld [vmem:[#allocation2 + $0x440] sm:$0xf0]  ;;  %v6586_v4 = vld [vmem:[#allocation2 + $0x408] sm:$0xf] }
  0x3d   :  { %v6450_v17 = vld [vmem:[#allocation2] sm:$0xf]  ;;  %v6723_v20 = vor.u32 %v9593_v13, %v6722_v12  ;;  %705 = vmatpush.bf16.msra.mxu1 %v6595_v19  ;;  %v6772_v12 = vld [vmem:[#allocation2 + $0xa40] sm:$0xf0]  ;;  %v6446_v13 = vld [vmem:[%s10860_s0 + $0x8] sm:$0xf] }
  0x3e   :  { %v9525_v18 = vld [vmem:[#allocation2 + $0x3c] sm:$0xf0]  ;;  %v9574_v19 = vld [vmem:[#allocation2 + $0x644] sm:$0xf0]  ;;  %v9587_v63 = vld [vmem:[#allocation2 + $0x804] sm:$0xf] }
  0x3f   :  { %v6578_v21 = vld [vmem:[#allocation2 + $0x400] sm:$0xf]  ;;  %v6451_v31 = vor.u32 %v9525_v18, %v6450_v17  ;;  %719 = vmatpush.bf16.msra.mxu2 %v6723_v20  ;;  %v9522_v17 = vld [vmem:[%s10860_s0 + $0x10] sm:$0xf0]  ;;  %v6650_v18 = vld [vmem:[#allocation2 + $0x608] sm:$0xf]  ;;  %785 = vmatpush.bf16.msrb.mxu3 %v6667_v14 }
  0x40   :  { %v9557_v22 = vld [vmem:[#allocation2 + $0x43c] sm:$0xf0]  ;;  %v10476_v20 = vor.u32 %v9522_v17, %v6446_v13  ;;  %v6651_v27 = vor.u32 %v9574_v19, %v6650_v18  ;;  %v6708_v0 = vld [vmem:[#allocation2 + $0x840] sm:$0xf0]  ;;  %v6700_v13 = vld [vmem:[#allocation2 + $0x7c8] sm:$0xf0] }
  0x41   :  { %v6706_v23 = vld [vmem:[#allocation2 + $0x800] sm:$0xf]  ;;  %v6579_v35 = vor.u32 %v9557_v22, %v6578_v21  ;;  %692 = vmatpush.bf16.msra.mxu0 %v6451_v31  ;;  %v6647_v21 = vor.u32 %v9571_v7, %v6644_v8  ;;  %v6775_v22 = vor.u32 %v9603_v11, %v6772_v12  ;;  %v6634_v31 = vld [vmem:[#allocation2 + $0x588] sm:$0xf]  ;;  %v6572_v11 = vld [vmem:[#allocation2 + $0x3c8] sm:$0xf0]  ;;  %v6711_v14 = vor.u32 %v9587_v63, %v6708_v0 }
  0x42   :  { %v9589_v25 = vld [vmem:[#allocation2 + $0x83c] sm:$0xf0]  ;;  %v6635_v39 = vor.u32 %v9570_v32, %v6634_v31  ;;  %v6826_v7 = vld [vmem:[#allocation2 + $0xb88] sm:$0xf]  ;;  %v9584_v12 = vld [vmem:[#allocation2 + $0x78c] sm:$0xf] }
  0x43   :  { %v6707_v36 = vor.u32 %v9589_v25, %v6706_v23  ;;  %706 = vmatpush.bf16.msra.mxu1 %v6579_v35  ;;  %v6438_v52 = vld [vmem:[%s10860_s0] sm:$0xf]  ;;  %v6523_v23 = vor.u32 %v9542_v16, %v6522_v15  ;;  %v6628_v25 = vld [vmem:[#allocation2 + $0x5c0] sm:$0xf0]  ;;  %v6507_v35 = vor.u32 %v9538_v30, %v6506_v29  ;;  %786 = vmatpush.bf16.msrb.mxu3 %v6651_v27  ;;  %v9618_v8 = vld [vmem:[#allocation2 + $0xbc4] sm:$0xf0] }
  0x44   :  { %v10457_v57 = vor.u32 %v9521_v53, %v6438_v52  ;;  %v6631_v33 = vor.u32 %v9567_v24, %v6628_v25  ;;  %v6724_v52 = vld [vmem:[#allocation2 + $0x8c0] sm:$0xf0]  ;;  %v6474_v53 = vld [vmem:[#allocation2 + $0x88] sm:$0xf]  ;;  %v6459_v15 = vor.u32 %v9526_v3, %v6458_v1  ;;  %v9616_v16 = vld [vmem:[#allocation2 + $0xb8c] sm:$0xf]  ;;  %v6827_v19 = vor.u32 %v9618_v8, %v6826_v7 }
  0x45   :  { %720 = vmatpush.bf16.msra.mxu2 %v6707_v36  ;;  %741 = vmatpush.bf16.msrb.mxu0 %v6695_v40  ;;  %v9563_v36 = vld [vmem:[#allocation2 + $0x504] sm:$0xf]  ;;  %v6727_v61 = vor.u32 %v9591_v50, %v6724_v52  ;;  %v6828_v17 = vld [vmem:[#allocation2 + $0xbc8] sm:$0xf0]  ;;  %v9614_v24 = vld [vmem:[#allocation2 + $0xb44] sm:$0xf0] }
  0x46   :  { %693 = vmatmul.bf16.vlgmr.msra.gmra.mxu0 %v10457_v57  ;;  %735 = vmatmul.bf16.vlgmr.msra.gmra.mxu3 %v10457_v57  ;;  %v6740_v40 = vld [vmem:[#allocation2 + $0x940] sm:$0xf0]  ;;  %v6615_v45 = vor.u32 %v9563_v36, %v6612_v37  ;;  %v9548_v25 = vld [vmem:[#allocation2 + $0x30c] sm:$0xf]  ;;  %v6831_v26 = vor.u32 %v9616_v16, %v6828_v17  ;;  %v9610_v36 = vld [vmem:[#allocation2 + $0xac4] sm:$0xf0] }
  0x47   :  { %755 = vmatpush.bf16.msrb.mxu1 %v6823_v42  ;;  %v9534_v42 = vld [vmem:[#allocation2 + $0x144] sm:$0xf0]  ;;  %v6743_v46 = vor.u32 %v9595_v38, %v6740_v40  ;;  %787 = vmatpush.bf16.msrb.mxu3 %v6635_v39  ;;  %v6556_v27 = vld [vmem:[#allocation2 + $0x348] sm:$0xf0] }
  0x48   :  { %707 = vmatmul.bf16.vlgmr.msra.gmra.mxu1 %v10466_v5  ;;  %721 = vmatmul.bf16.vlgmr.msra.gmra.mxu2 %v10476_v20  ;;  %v6491_v47 = vor.u32 %v9534_v42, %v6490_v41  ;;  %v6684_v29 = vld [vmem:[#allocation2 + $0x748] sm:$0xf0] }
  0x49   :  { %769 = vmatpush.bf16.msrb.mxu2 %v6571_v43  ;;  %742 = vmatpush.bf16.msrb.mxu0 %v6679_v54  ;;  %v6618_v43 = vld [vmem:[#allocation2 + $0x508] sm:$0xf]  ;;  %v9612_v30 = vld [vmem:[#allocation2 + $0xb0c] sm:$0xf] }
  0x4a   :  { %v6619_v51 = vor.u32 %v9566_v44, %v6618_v43  ;;  %v9530_v54 = vld [vmem:[#allocation2 + $0xc4] sm:$0xf0]  ;;  %v6812_v31 = vld [vmem:[#allocation2 + $0xb48] sm:$0xf0] }
  0x4b   :  { %756 = vmatpush.bf16.msrb.mxu1 %v6807_v58  ;;  %v6599_v58 = vor.u32 %v9559_v48, %v6596_v49  ;;  %v6475_v62 = vor.u32 %v9530_v54, %v6474_v53  ;;  %v9544_v37 = vld [vmem:[#allocation2 + $0x28c] sm:$0xf]  ;;  %v6815_v38 = vor.u32 %v9612_v30, %v6812_v31  ;;  %v9606_v48 = vld [vmem:[#allocation2 + $0xa44] sm:$0xf0] }
  0x4c   :  { %788 = vmatpush.bf16.msrb.mxu3 %v6619_v51  ;;  %v6540_v39 = vld [vmem:[#allocation2 + $0x2c8] sm:$0xf0] }
  0x4d   :  { %770 = vmatpush.bf16.msrb.mxu2 %v6555_v59  ;;  %743 = vmatpush.bf16.msrb.mxu0 %v6663_v6  ;;  %v9555_v59 = vld [vmem:[#allocation2 + $0x404] sm:$0xf]  ;;  %v9558_v6 = vld [vmem:[#allocation2 + $0x444] sm:$0xf0]  ;;  %v9576_v40 = vld [vmem:[#allocation2 + $0x68c] sm:$0xf] }
  0x4e   :  { %v6587_v18 = vor.u32 %v9558_v6, %v6586_v4  ;;  %v6668_v41 = vld [vmem:[#allocation2 + $0x6c8] sm:$0xf0] }
  0x4f   :  { %757 = vmatpush.bf16.msrb.mxu1 %v6791_v9  ;;  %v9552_v9 = vld [vmem:[#allocation2 + $0x38c] sm:$0xf] }
  0x50   :  { %789 = vmatpush.bf16.msrb.mxu3 %v6603_v2  ;;  %v9608_v42 = vld [vmem:[#allocation2 + $0xa8c] sm:$0xf] }
  0x51   :  { %771 = vmatpush.bf16.msrb.mxu2 %v6539_v10  ;;  %744 = vmatpush.bf16.msrb.mxu0 %v6647_v21  ;;  %v6583_v10 = vor.u32 %v9555_v59, %v6580_v60  ;;  %v6575_v21 = vor.u32 %v9552_v9, %v6572_v11  ;;  %v6796_v43 = vld [vmem:[#allocation2 + $0xac8] sm:$0xf0]  ;;  %v6762_v60 = vld [vmem:[#allocation2 + $0x988] sm:$0xf] }
  0x52   :  { %v9540_v49 = vld [vmem:[#allocation2 + $0x20c] sm:$0xf]  ;;  %v6799_v50 = vor.u32 %v9608_v42, %v6796_v43  ;;  %v6746_v9 = vld [vmem:[#allocation2 + $0x908] sm:$0xf]  ;;  %v6946_v43 = vld [vmem:[#allocation2 + $0x390] sm:$0xf] }
  0x53   :  { %758 = vmatpush.bf16.msrb.mxu1 %v6775_v22  ;;  %v6703_v22 = vor.u32 %v9584_v12, %v6700_v13  ;;  %v6524_v51 = vld [vmem:[#allocation2 + $0x248] sm:$0xf0] }
  0x54   :  { %790 = vmatpush.bf16.msrb.mxu3 %v6587_v18  ;;  %v9572_v52 = vld [vmem:[#allocation2 + $0x60c] sm:$0xf] }
  0x55   :  { %772 = vmatpush.bf16.msrb.mxu2 %v6523_v23  ;;  %745 = vmatpush.bf16.msrb.mxu0 %v6631_v33  ;;  %v6810_v23 = vld [vmem:[#allocation2 + $0xb08] sm:$0xf]  ;;  %v6559_v33 = vor.u32 %v9548_v25, %v6556_v27  ;;  %v6652_v53 = vld [vmem:[#allocation2 + $0x648] sm:$0xf0] }
  0x56   :  { %v6811_v32 = vor.u32 %v9614_v24, %v6810_v23  ;;  %v9604_v54 = vld [vmem:[#allocation2 + $0xa0c] sm:$0xf]  ;;  %v6655_v59 = vor.u32 %v9572_v52, %v6652_v53  ;;  %v9594_v23 = vld [vmem:[#allocation2 + $0x8c4] sm:$0xf0]  ;;  %v9743_v52 = vld [vmem:[#allocation2 + $0x394] sm:$0xf] }
  0x57   :  { %759 = vmatpush.bf16.msrb.mxu1 %v6759_v34  ;;  %v6687_v34 = vor.u32 %v9580_v28, %v6684_v29  ;;  %791 = vmatmul.bf16.vlgmr.msrb.gmra.mxu3 %v10466_v5  ;;  %v6780_v55 = vld [vmem:[#allocation2 + $0xa48] sm:$0xf0]  ;;  %v6948_v53 = vld [vmem:[#allocation2 + $0x3d0] sm:$0xf0] }
  0x58   :  { %839 = vmatpush.bf16.msra.mxu3 %v6831_v26  ;;  %v6783_v63 = vor.u32 %v9604_v54, %v6780_v55  ;;  %v6508_v0 = vld [vmem:[#allocation2 + $0x1c8] sm:$0xf0] }
  0x59   :  { %773 = vmatpush.bf16.msrb.mxu2 %v6507_v35  ;;  %746 = vmatpush.bf16.msrb.mxu0 %v6615_v45  ;;  %v6794_v35 = vld [vmem:[#allocation2 + $0xa88] sm:$0xf]  ;;  %v6543_v45 = vor.u32 %v9544_v37, %v6540_v39  ;;  %v9568_v1 = vld [vmem:[#allocation2 + $0x58c] sm:$0xf] }
  0x5a   :  { %v6795_v44 = vor.u32 %v9610_v36, %v6794_v35  ;;  %v6636_v2 = vld [vmem:[#allocation2 + $0x5c8] sm:$0xf0] }
  0x5b   :  { %760 = vmatpush.bf16.msrb.mxu1 %v6743_v46  ;;  %v6671_v46 = vor.u32 %v9576_v40, %v6668_v41  ;;  %v9600_v3 = vld [vmem:[#allocation2 + $0x98c] sm:$0xf]  ;;  %v6639_v8 = vor.u32 %v9568_v1, %v6636_v2  ;;  %v9805_v1 = vld [vmem:[#allocation2 + $0xb4c] sm:$0xf0]  ;;  %v9739_v2 = vld [vmem:[#allocation2 + $0x314] sm:$0xf] }
  0x5c   :  { %840 = vmatpush.bf16.msra.mxu3 %v6815_v38  ;;  %v6764_v4 = vld [vmem:[#allocation2 + $0x9c8] sm:$0xf0] }
  0x5d   :  { %774 = vmatpush.bf16.msrb.mxu2 %v6491_v47  ;;  %747 = vmatpush.bf16.msrb.mxu0 %v6599_v58  ;;  %v6778_v47 = vld [vmem:[#allocation2 + $0xa08] sm:$0xf]  ;;  %v6527_v58 = vor.u32 %v9540_v49, %v6524_v51  ;;  %v9532_v11 = vld [vmem:[#allocation2 + $0x10c] sm:$0xf]  ;;  %v6767_v12 = vor.u32 %v9600_v3, %v6764_v4  ;;  %v9809_v49 = vld [vmem:[#allocation2 + $0xbcc] sm:$0xf0] }
  0x5e   :  { %v6779_v56 = vor.u32 %v9606_v48, %v6778_v47  ;;  %v6492_v13 = vld [vmem:[#allocation2 + $0x148] sm:$0xf0]  ;;  %v9777_v47 = vld [vmem:[#allocation2 + $0x7cc] sm:$0xf0]  ;;  %v6932_v3 = vld [vmem:[#allocation2 + $0x350] sm:$0xf0] }
  0x5f   :  { %761 = vmatpush.bf16.msrb.mxu1 %v6727_v61  ;;  %v9602_v61 = vld [vmem:[#allocation2 + $0x9c4] sm:$0xf0]  ;;  %v9596_v16 = vld [vmem:[#allocation2 + $0x90c] sm:$0xf]  ;;  %v7202_v48 = vld [vmem:[#allocation2 + $0xb90] sm:$0xf] }
  0x60   :  { %841 = vmatpush.bf16.msra.mxu3 %v6799_v50  ;;  %v6763_v6 = vor.u32 %v9602_v61, %v6762_v60  ;;  %v6748_v17 = vld [vmem:[#allocation2 + $0x948] sm:$0xf0]  ;;  %v9741_v60 = vld [vmem:[#allocation2 + $0x34c] sm:$0xf0] }
  0x61   :  { %775 = vmatpush.bf16.msrb.mxu2 %v6475_v62  ;;  %748 = vmatpush.bf16.msrb.mxu0 %v6583_v10  ;;  %v9536_v62 = vld [vmem:[#allocation2 + $0x18c] sm:$0xf]  ;;  %v9598_v10 = vld [vmem:[#allocation2 + $0x944] sm:$0xf0]  ;;  %v6751_v25 = vor.u32 %v9596_v16, %v6748_v17  ;;  %v7058_v61 = vld [vmem:[#allocation2 + $0x710] sm:$0xf] }
  0x62   :  { %v6511_v7 = vor.u32 %v9536_v62, %v6508_v0  ;;  %v6747_v18 = vor.u32 %v9598_v10, %v6746_v9  ;;  %v9528_v24 = vld [vmem:[#allocation2 + $0x8c] sm:$0xf]  ;;  %v6951_v62 = vor.u32 %v9743_v52, %v6948_v53  ;;  %v7186_v0 = vld [vmem:[#allocation2 + $0xb10] sm:$0xf]  ;;  %v6916_v16 = vld [vmem:[#allocation2 + $0x2d0] sm:$0xf0] }
  0x63   :  { %762 = vmatpush.bf16.msrb.mxu1 %v6711_v14  ;;  %v9564_v14 = vld [vmem:[#allocation2 + $0x50c] sm:$0xf]  ;;  %v9737_v9 = vld [vmem:[#allocation2 + $0x2cc] sm:$0xf0]  ;;  %v9723_v52 = vld [vmem:[#allocation2 + $0x114] sm:$0xf] }
  0x64   :  { %749 = vmatmul.bf16.vlgmr.msrb.gmra.mxu0 %v10466_v5  ;;  %842 = vmatpush.bf16.msra.mxu3 %v6783_v63  ;;  %v6476_v26 = vld [vmem:[#allocation2 + $0xc8] sm:$0xf0]  ;;  %v9773_v63 = vld [vmem:[#allocation2 + $0x74c] sm:$0xf0]  ;;  %v6868_v53 = vld [vmem:[#allocation2 + $0x150] sm:$0xf0] }
  0x65   :  { %776 = vmatpush.bf16.msrb.mxu2 %v6459_v15  ;;  %797 = vmatpush.bf16.msra.mxu0 %v6827_v19  ;;  %v6620_v15 = vld [vmem:[#allocation2 + $0x548] sm:$0xf0]  ;;  %v6495_v19 = vor.u32 %v9532_v11, %v6492_v13  ;;  %v7042_v10 = vld [vmem:[#allocation2 + $0x690] sm:$0xf]  ;;  %v6935_v11 = vor.u32 %v9739_v2, %v6932_v3  ;;  %v6852_v2 = vld [vmem:[#allocation2 + $0xd0] sm:$0xf0] }
  0x66   :  { %763 = vmatmul.bf16.vlgmr.msrb.gmra.mxu1 %v10476_v20  ;;  %v9560_v27 = vld [vmem:[#allocation2 + $0x48c] sm:$0xf]  ;;  %v7170_v13 = vld [vmem:[#allocation2 + $0xa90] sm:$0xf] }
  0x67   :  { %811 = vmatpush.bf16.msra.mxu1 %v6575_v21  ;;  %v6623_v21 = vor.u32 %v9564_v14, %v6620_v15  ;;  %v6604_v28 = vld [vmem:[#allocation2 + $0x4c8] sm:$0xf0]  ;;  %v9801_v14 = vld [vmem:[#allocation2 + $0xacc] sm:$0xf0]  ;;  %v9735_v15 = vld [vmem:[#allocation2 + $0x294] sm:$0xf] }
  0x68   :  { %777 = vmatmul.bf16.vlgmr.msrb.gmra.mxu2 %v10457_v57  ;;  %843 = vmatpush.bf16.msra.mxu3 %v6767_v12  ;;  %v9592_v29 = vld [vmem:[#allocation2 + $0x88c] sm:$0xf]  ;;  %v6607_v35 = vor.u32 %v9560_v27, %v6604_v28  ;;  %v9769_v12 = vld [vmem:[#allocation2 + $0x6cc] sm:$0xf0]  ;;  %v9731_v28 = vld [vmem:[#allocation2 + $0x214] sm:$0xf] }
  0x69   :  { %825 = vmatpush.bf16.msra.mxu2 %v6703_v22  ;;  %798 = vmatpush.bf16.msra.mxu0 %v6811_v32  ;;  %v6730_v22 = vld [vmem:[#allocation2 + $0x888] sm:$0xf]  ;;  %v6732_v30 = vld [vmem:[#allocation2 + $0x8c8] sm:$0xf0]  ;;  %v9797_v27 = vld [vmem:[#allocation2 + $0xa4c] sm:$0xf0] }
  0x6a   :  { %v6731_v31 = vor.u32 %v9594_v23, %v6730_v22  ;;  %v6714_v32 = vld [vmem:[#allocation2 + $0x808] sm:$0xf]  ;;  %v9524_v36 = vld [vmem:[#allocation2 + $0xc] sm:$0xf]  ;;  %v6735_v39 = vor.u32 %v9592_v29, %v6732_v30  ;;  %v9733_v22 = vld [vmem:[#allocation2 + $0x24c] sm:$0xf0] }
  0x6b   :  { %812 = vmatpush.bf16.msra.mxu1 %v6559_v33  ;;  %v9590_v33 = vld [vmem:[#allocation2 + $0x844] sm:$0xf0]  ;;  %v6460_v37 = vld [vmem:[#allocation2 + $0x48] sm:$0xf0]  ;;  %v7026_v23 = vld [vmem:[#allocation2 + $0x610] sm:$0xf] }
  0x6c   :  { %v9556_v38 = vld [vmem:[#allocation2 + $0x40c] sm:$0xf]  ;;  %844 = vmatpush.bf16.msra.mxu3 %v6751_v25  ;;  %v6463_v50 = vor.u32 %v9524_v36, %v6460_v37  ;;  %v9765_v25 = vld [vmem:[#allocation2 + $0x64c] sm:$0xf0]  ;;  %v6900_v29 = vld [vmem:[#allocation2 + $0x250] sm:$0xf0] }
  0x6d   :  { %826 = vmatpush.bf16.msra.mxu2 %v6687_v34  ;;  %799 = vmatpush.bf16.msra.mxu0 %v6795_v44  ;;  %v6479_v34 = vor.u32 %v9528_v24, %v6476_v26  ;;  %v6588_v40 = vld [vmem:[#allocation2 + $0x448] sm:$0xf0]  ;;  %v9745_v44 = vld [vmem:[#allocation2 + $0x3cc] sm:$0xf0]  ;;  %v6919_v24 = vor.u32 %v9735_v15, %v6916_v16  ;;  %v6903_v36 = vor.u32 %v9731_v28, %v6900_v29  ;;  %v6836_v15 = vld [vmem:[#allocation2 + $0x50] sm:$0xf0] }
  0x6e   :  { %v9588_v41 = vld [vmem:[#allocation2 + $0x80c] sm:$0xf]  ;;  %v6591_v51 = vor.u32 %v9556_v38, %v6588_v40  ;;  %v6947_v55 = vor.u32 %v9745_v44, %v6946_v43  ;;  %v7154_v26 = vld [vmem:[#allocation2 + $0xa10] sm:$0xf]  ;;  %v9727_v40 = vld [vmem:[#allocation2 + $0x194] sm:$0xf] }
  0x6f   :  { %813 = vmatpush.bf16.msra.mxu1 %v6543_v45  ;;  %v6716_v42 = vld [vmem:[#allocation2 + $0x848] sm:$0xf0]  ;;  %v7074_v45 = vld [vmem:[#allocation2 + $0x790] sm:$0xf]  ;;  %v9775_v16 = vld [vmem:[#allocation2 + $0x794] sm:$0xf] }
  0x70   :  { %845 = vmatpush.bf16.msra.mxu3 %v6735_v39  ;;  %v6719_v54 = vor.u32 %v9588_v41, %v6716_v42  ;;  %v9761_v37 = vld [vmem:[#allocation2 + $0x5cc] sm:$0xf0]  ;;  %v6884_v41 = vld [vmem:[#allocation2 + $0x1d0] sm:$0xf0] }
  0x71   :  { %827 = vmatpush.bf16.msra.mxu2 %v6671_v46  ;;  %800 = vmatpush.bf16.msra.mxu0 %v6779_v56  ;;  %v6715_v46 = vor.u32 %v9590_v33, %v6714_v32  ;;  %v7075_v56 = vor.u32 %v9777_v47, %v7074_v45  ;;  %v7155_v32 = vor.u32 %v9797_v27, %v7154_v26  ;;  %v6882_v33 = vld [vmem:[#allocation2 + $0x190] sm:$0xf]  ;;  %v7082_v26 = vld [vmem:[#allocation2 + $0x798] sm:$0xf] }
  0x72   :  { %v7138_v38 = vld [vmem:[#allocation2 + $0x990] sm:$0xf]  ;;  %v9778_v27 = vld [vmem:[#allocation2 + $0x7d4] sm:$0xf0] }
  0x73   :  { %814 = vmatpush.bf16.msra.mxu1 %v6527_v58  ;;  %v7203_v58 = vor.u32 %v9809_v49, %v7202_v48  ;;  %v9793_v39 = vld [vmem:[#allocation2 + $0x9cc] sm:$0xf0]  ;;  %v6887_v48 = vor.u32 %v9727_v40, %v6884_v41  ;;  %v9774_v40 = vld [vmem:[#allocation2 + $0x754] sm:$0xf0] }
  0x74   :  { %846 = vmatpush.bf16.msra.mxu3 %v6719_v54  ;;  %v7139_v44 = vor.u32 %v9793_v39, %v7138_v38  ;;  %v6866_v45 = vld [vmem:[#allocation2 + $0x110] sm:$0xf]  ;;  %v9742_v38 = vld [vmem:[#allocation2 + $0x354] sm:$0xf0] }
  0x75   :  { %828 = vmatpush.bf16.msra.mxu2 %v6655_v59  ;;  %801 = vmatpush.bf16.msra.mxu0 %v6763_v6  ;;  %v6930_v59 = vld [vmem:[#allocation2 + $0x310] sm:$0xf]  ;;  %v7059_v6 = vor.u32 %v9773_v63, %v7058_v61  ;;  %v6871_v61 = vor.u32 %v9723_v52, %v6868_v53  ;;  %v7066_v39 = vld [vmem:[#allocation2 + $0x718] sm:$0xf] }
  0x76   :  { %v6931_v4 = vor.u32 %v9741_v60, %v6930_v59  ;;  %v6994_v47 = vld [vmem:[#allocation2 + $0x510] sm:$0xf]  ;;  %v9770_v52 = vld [vmem:[#allocation2 + $0x6d4] sm:$0xf0] }
  0x77   :  { %815 = vmatpush.bf16.msra.mxu1 %v6511_v7  ;;  %v7187_v7 = vor.u32 %v9805_v1, %v7186_v0  ;;  %847 = vmatmul.bf16.vlgmr.msra.gmra.mxu3 %v10476_v20  ;;  %v9757_v49 = vld [vmem:[#allocation2 + $0x54c] sm:$0xf0]  ;;  %v9719_v1 = vld [vmem:[#allocation2 + $0x94] sm:$0xf] }
  0x78   :  { %1621 = vmatpush.bf16.msrb.mxu3 %v6951_v62  ;;  %v9721_v59 = vld [vmem:[#allocation2 + $0xcc] sm:$0xf0] }
  0x79   :  { %829 = vmatpush.bf16.msra.mxu2 %v6639_v8  ;;  %802 = vmatpush.bf16.msra.mxu0 %v6747_v18  ;;  %v6914_v8 = vld [vmem:[#allocation2 + $0x290] sm:$0xf]  ;;  %v7043_v18 = vor.u32 %v9769_v12, %v7042_v10  ;;  %v6855_v12 = vor.u32 %v9719_v1, %v6852_v2  ;;  %v9766_v1 = vld [vmem:[#allocation2 + $0x654] sm:$0xf0] }
  0x7a   :  { %v6915_v17 = vor.u32 %v9737_v9, %v6914_v8  ;;  %v6978_v60 = vld [vmem:[#allocation2 + $0x490] sm:$0xf] }
  0x7b   :  { %816 = vmatpush.bf16.msra.mxu1 %v6495_v19  ;;  %v7171_v19 = vor.u32 %v9801_v14, %v7170_v13  ;;  %v9753_v62 = vld [vmem:[#allocation2 + $0x4cc] sm:$0xf0]  ;;  %v9715_v14 = vld [vmem:[#allocation2 + $0x14] sm:$0xf] }
  0x7c   :  { %1622 = vmatpush.bf16.msrb.mxu3 %v6935_v11  ;;  %v7106_v63 = vld [vmem:[#allocation2 + $0x890] sm:$0xf]  ;;  %v6839_v28 = vor.u32 %v9715_v14, %v6836_v15  ;;  %v9762_v14 = vld [vmem:[#allocation2 + $0x5d4] sm:$0xf0] }
  0x7d   :  { %830 = vmatpush.bf16.msra.mxu2 %v6623_v21  ;;  %803 = vmatpush.bf16.msra.mxu0 %v6731_v31  ;;  %v6898_v21 = vld [vmem:[#allocation2 + $0x210] sm:$0xf]  ;;  %v7027_v31 = vor.u32 %v9765_v25, %v7026_v23  ;;  %v9746_v23 = vld [vmem:[#allocation2 + $0x3d4] sm:$0xf0] }
  0x7e   :  { %v6899_v30 = vor.u32 %v9733_v22, %v6898_v21  ;;  %v9785_v0 = vld [vmem:[#allocation2 + $0x8cc] sm:$0xf0]  ;;  %v7204_v21 = vld [vmem:[#allocation2 + $0xbd0] sm:$0xf0]  ;;  %v6954_v22 = vld [vmem:[#allocation2 + $0x398] sm:$0xf] }
  0x7f   :  { %817 = vmatpush.bf16.msra.mxu1 %v6479_v34  ;;  %v9729_v34 = vld [vmem:[#allocation2 + $0x1cc] sm:$0xf0]  ;;  %v7107_v8 = vor.u32 %v9785_v0, %v7106_v63  ;;  %v9734_v63 = vld [vmem:[#allocation2 + $0x254] sm:$0xf0] }
  0x80   :  { %1623 = vmatpush.bf16.msrb.mxu3 %v6919_v24  ;;  %v6883_v42 = vor.u32 %v9729_v34, %v6882_v33  ;;  %v6962_v9 = vld [vmem:[#allocation2 + $0x410] sm:$0xf]  ;;  %v7060_v33 = vld [vmem:[#allocation2 + $0x750] sm:$0xf0]  ;;  %v7034_v0 = vld [vmem:[#allocation2 + $0x618] sm:$0xf] }
  0x81   :  { %831 = vmatpush.bf16.msra.mxu2 %v6607_v35  ;;  %804 = vmatpush.bf16.msra.mxu0 %v6715_v46  ;;  %v7010_v35 = vld [vmem:[#allocation2 + $0x590] sm:$0xf]  ;;  %v9803_v34 = vld [vmem:[#allocation2 + $0xb14] sm:$0xf] }
  0x82   :  { %v7011_v43 = vor.u32 %v9761_v37, %v7010_v35  ;;  %v9725_v46 = vld [vmem:[#allocation2 + $0x14c] sm:$0xf0]  ;;  %v7083_v35 = vor.u32 %v9778_v27, %v7082_v26  ;;  %v6938_v37 = vld [vmem:[#allocation2 + $0x318] sm:$0xf] }
  0x83   :  { %818 = vmatpush.bf16.msra.mxu1 %v6463_v50  ;;  %v7122_v50 = vld [vmem:[#allocation2 + $0x910] sm:$0xf]  ;;  %v6867_v54 = vor.u32 %v9725_v46, %v6866_v45  ;;  %v7044_v45 = vld [vmem:[#allocation2 + $0x6d0] sm:$0xf0]  ;;  %v7002_v26 = vld [vmem:[#allocation2 + $0x518] sm:$0xf] }
  0x84   :  { %805 = vmatmul.bf16.vlgmr.msra.gmra.mxu0 %v10476_v20  ;;  %1624 = vmatpush.bf16.msrb.mxu3 %v6903_v36  ;;  %v9749_v10 = vld [vmem:[#allocation2 + $0x44c] sm:$0xf0]  ;;  %v7188_v36 = vld [vmem:[#allocation2 + $0xb50] sm:$0xf0]  ;;  %v9758_v27 = vld [vmem:[#allocation2 + $0x554] sm:$0xf0] }
  0x85   :  { %832 = vmatpush.bf16.msra.mxu2 %v6591_v51  ;;  %1579 = vmatpush.bf16.msrb.mxu0 %v6947_v55  ;;  %v9789_v51 = vld [vmem:[#allocation2 + $0x94c] sm:$0xf0]  ;;  %v6995_v55 = vor.u32 %v9757_v49, %v6994_v47  ;;  %v6963_v24 = vor.u32 %v9749_v10, %v6962_v9  ;;  %v9799_v46 = vld [vmem:[#allocation2 + $0xa94] sm:$0xf]  ;;  %v7067_v47 = vor.u32 %v9774_v40, %v7066_v39  ;;  %v6922_v49 = vld [vmem:[#allocation2 + $0x298] sm:$0xf] }
  0x86   :  { %819 = vmatmul.bf16.vlgmr.msra.gmra.mxu1 %v10457_v57  ;;  %v7090_v11 = vld [vmem:[#allocation2 + $0x810] sm:$0xf]  ;;  %v7035_v9 = vor.u32 %v9766_v1, %v7034_v0  ;;  %v7140_v10 = vld [vmem:[#allocation2 + $0x9d0] sm:$0xf0]  ;;  %v9754_v39 = vld [vmem:[#allocation2 + $0x4d4] sm:$0xf0] }
  0x87   :  { %1593 = vmatpush.bf16.msrb.mxu1 %v7075_v56  ;;  %v7123_v56 = vor.u32 %v9789_v51, %v7122_v50  ;;  %v9781_v13 = vld [vmem:[#allocation2 + $0x84c] sm:$0xf0]  ;;  %v9738_v50 = vld [vmem:[#allocation2 + $0x2d4] sm:$0xf0] }
  0x88   :  { %833 = vmatmul.bf16.vlgmr.msra.gmra.mxu2 %v10466_v5  ;;  %1625 = vmatpush.bf16.msrb.mxu3 %v6887_v48  ;;  %v7091_v25 = vor.u32 %v9781_v13, %v7090_v11  ;;  %v7172_v48 = vld [vmem:[#allocation2 + $0xad0] sm:$0xf0]  ;;  %v7050_v51 = vld [vmem:[#allocation2 + $0x698] sm:$0xf] }
  0x89   :  { %1607 = vmatpush.bf16.msrb.mxu2 %v7203_v58  ;;  %1580 = vmatpush.bf16.msrb.mxu0 %v6931_v4  ;;  %v6850_v58 = vld [vmem:[#allocation2 + $0x90] sm:$0xf]  ;;  %v6890_v11 = vld [vmem:[#allocation2 + $0x198] sm:$0xf] }
  0x8a   :  { %v6851_v3 = vor.u32 %v9721_v59, %v6850_v58  ;;  %v6834_v4 = vld [vmem:[#allocation2 + $0x10] sm:$0xf]  ;;  %v7028_v58 = vld [vmem:[#allocation2 + $0x650] sm:$0xf0]  ;;  %v7018_v13 = vld [vmem:[#allocation2 + $0x598] sm:$0xf] }
  0x8b   :  { %1594 = vmatpush.bf16.msrb.mxu1 %v7059_v6  ;;  %v9717_v6 = vld [vmem:[#allocation2 + $0x4c] sm:$0xf0]  ;;  %v9795_v59 = vld [vmem:[#allocation2 + $0xa14] sm:$0xf] }
  0x8c   :  { %1626 = vmatpush.bf16.msrb.mxu3 %v6871_v61  ;;  %v7156_v61 = vld [vmem:[#allocation2 + $0xa50] sm:$0xf0] }
  0x8d   :  { %1608 = vmatpush.bf16.msrb.mxu2 %v7187_v7  ;;  %1581 = vmatpush.bf16.msrb.mxu0 %v6915_v17  ;;  %v6979_v7 = vor.u32 %v9753_v62, %v6978_v60  ;;  %v7076_v17 = vld [vmem:[#allocation2 + $0x7d0] sm:$0xf0]  ;;  %v7051_v60 = vor.u32 %v9770_v52, %v7050_v51  ;;  %v6906_v62 = vld [vmem:[#allocation2 + $0x218] sm:$0xf] }
  0x8e   :  { %v7079_v29 = vor.u32 %v9775_v16, %v7076_v17  ;;  %v9750_v51 = vld [vmem:[#allocation2 + $0x454] sm:$0xf0] }
  0x8f   :  { %1595 = vmatpush.bf16.msrb.mxu1 %v7043_v18  ;;  %v9807_v18 = vld [vmem:[#allocation2 + $0xb94] sm:$0xf]  ;;  %v7210_v52 = vld [vmem:[#allocation2 + $0xb98] sm:$0xf] }
  0x90   :  { %1627 = vmatpush.bf16.msrb.mxu3 %v6855_v12  ;;  %v9730_v12 = vld [vmem:[#allocation2 + $0x1d4] sm:$0xf0] }
  0x91   :  { %1609 = vmatpush.bf16.msrb.mxu2 %v7171_v19  ;;  %1582 = vmatpush.bf16.msrb.mxu0 %v6899_v30  ;;  %v6835_v19 = vor.u32 %v9717_v6, %v6834_v4  ;;  %v7207_v30 = vor.u32 %v9807_v18, %v7204_v21  ;;  %v6907_v4 = vor.u32 %v9734_v63, %v6906_v62  ;;  %v9759_v6 = vld [vmem:[#allocation2 + $0x594] sm:$0xf]  ;;  %v9808_v62 = vld [vmem:[#allocation2 + $0xb9c] sm:$0xf] }
  0x92   :  { %v6891_v17 = vor.u32 %v9730_v12, %v6890_v11  ;;  %v9755_v18 = vld [vmem:[#allocation2 + $0x514] sm:$0xf]  ;;  %v7212_v63 = vld [vmem:[#allocation2 + $0xbd8] sm:$0xf0] }
  0x93   :  { %1596 = vmatpush.bf16.msrb.mxu1 %v7027_v31  ;;  %v6955_v31 = vor.u32 %v9746_v23, %v6954_v22  ;;  %v9787_v21 = vld [vmem:[#allocation2 + $0x914] sm:$0xf]  ;;  %v7019_v22 = vor.u32 %v9762_v14, %v7018_v13  ;;  %v7068_v11 = vld [vmem:[#allocation2 + $0x758] sm:$0xf0] }
  0x94   :  { %1628 = vmatpush.bf16.msrb.mxu3 %v6839_v28  ;;  %v7124_v23 = vld [vmem:[#allocation2 + $0x950] sm:$0xf0]  ;;  %v9804_v12 = vld [vmem:[#allocation2 + $0xb1c] sm:$0xf] }
  0x95   :  { %1610 = vmatpush.bf16.msrb.mxu2 %v7155_v32  ;;  %1583 = vmatpush.bf16.msrb.mxu0 %v6883_v42  ;;  %v9771_v32 = vld [vmem:[#allocation2 + $0x714] sm:$0xf]  ;;  %v7191_v42 = vor.u32 %v9803_v34, %v7188_v36  ;;  %v7003_v34 = vor.u32 %v9758_v27, %v7002_v26  ;;  %v6858_v36 = vld [vmem:[#allocation2 + $0x98] sm:$0xf]  ;;  %v7196_v13 = vld [vmem:[#allocation2 + $0xb58] sm:$0xf0] }
  0x96   :  { %v7063_v41 = vor.u32 %v9771_v32, %v7060_v33  ;;  %v6980_v32 = vld [vmem:[#allocation2 + $0x4d0] sm:$0xf0]  ;;  %v9800_v26 = vld [vmem:[#allocation2 + $0xa9c] sm:$0xf] }
  0x97   :  { %1597 = vmatpush.bf16.msrb.mxu1 %v7011_v43  ;;  %v6939_v43 = vor.u32 %v9742_v38, %v6938_v37  ;;  %1629 = vmatmul.bf16.vlgmr.msrb.gmra.mxu3 %v10457_v57  ;;  %v9783_v33 = vld [vmem:[#allocation2 + $0x894] sm:$0xf]  ;;  %v9722_v37 = vld [vmem:[#allocation2 + $0xd4] sm:$0xf0]  ;;  %v7180_v27 = vld [vmem:[#allocation2 + $0xad8] sm:$0xf0] }
  0x98   :  { %1677 = vmatpush.bf16.msra.mxu3 %v7083_v35  ;;  %v7108_v35 = vld [vmem:[#allocation2 + $0x8d0] sm:$0xf0]  ;;  %v6986_v38 = vld [vmem:[#allocation2 + $0x498] sm:$0xf] }
  0x99   :  { %1611 = vmatpush.bf16.msrb.mxu2 %v7139_v44  ;;  %1584 = vmatpush.bf16.msrb.mxu0 %v6867_v54  ;;  %v9767_v44 = vld [vmem:[#allocation2 + $0x694] sm:$0xf]  ;;  %v7175_v54 = vor.u32 %v9799_v46, %v7172_v48  ;;  %v6987_v48 = vor.u32 %v9754_v39, %v6986_v38  ;;  %v7036_v38 = vld [vmem:[#allocation2 + $0x658] sm:$0xf0] }
  0x9a   :  { %v7047_v53 = vor.u32 %v9767_v44, %v7044_v45  ;;  %v6859_v44 = vor.u32 %v9722_v37, %v6858_v36  ;;  %v9779_v45 = vld [vmem:[#allocation2 + $0x814] sm:$0xf]  ;;  %v6908_v36 = vld [vmem:[#allocation2 + $0x258] sm:$0xf0] }
  0x9b   :  { %1598 = vmatpush.bf16.msrb.mxu1 %v6995_v55  ;;  %v6923_v55 = vor.u32 %v9738_v50, %v6922_v49  ;;  %v7092_v46 = vld [vmem:[#allocation2 + $0x850] sm:$0xf0]  ;;  %v9718_v49 = vld [vmem:[#allocation2 + $0x54] sm:$0xf0]  ;;  %v9764_v37 = vld [vmem:[#allocation2 + $0x61c] sm:$0xf] }
  0x9c   :  { %1678 = vmatpush.bf16.msra.mxu3 %v7067_v47  ;;  %v6842_v47 = vld [vmem:[#allocation2 + $0x18] sm:$0xf]  ;;  %v9796_v39 = vld [vmem:[#allocation2 + $0xa1c] sm:$0xf] }
  0x9d   :  { %1612 = vmatpush.bf16.msrb.mxu2 %v7123_v56  ;;  %1585 = vmatpush.bf16.msrb.mxu0 %v6851_v3  ;;  %v9763_v56 = vld [vmem:[#allocation2 + $0x614] sm:$0xf]  ;;  %v7159_v3 = vor.u32 %v9795_v59, %v7156_v61  ;;  %v6970_v50 = vld [vmem:[#allocation2 + $0x418] sm:$0xf]  ;;  %v7084_v59 = vld [vmem:[#allocation2 + $0x7d8] sm:$0xf0]  ;;  %v6843_v61 = vor.u32 %v9718_v49, %v6842_v47 }
  0x9e   :  { %v7031_v2 = vor.u32 %v9763_v56, %v7028_v58  ;;  %v6956_v56 = vld [vmem:[#allocation2 + $0x3d8] sm:$0xf0]  ;;  %v6971_v0 = vor.u32 %v9750_v51, %v6970_v50  ;;  %v9794_v47 = vld [vmem:[#allocation2 + $0x9d4] sm:$0xf0] }
  0x9f   :  { %1599 = vmatpush.bf16.msrb.mxu1 %v6979_v7  ;;  %v7012_v7 = vld [vmem:[#allocation2 + $0x5d0] sm:$0xf0]  ;;  %v9776_v58 = vld [vmem:[#allocation2 + $0x79c] sm:$0xf] }
  0xa0   :  { %1679 = vmatpush.bf16.msra.mxu3 %v7051_v60  ;;  %v7015_v15 = vor.u32 %v9759_v6, %v7012_v7  ;;  %v7095_v60 = vor.u32 %v9779_v45, %v7092_v46  ;;  %v9806_v6 = vld [vmem:[#allocation2 + $0xb54] sm:$0xf0]  ;;  %v9740_v7 = vld [vmem:[#allocation2 + $0x31c] sm:$0xf]  ;;  %v7039_v45 = vor.u32 %v9764_v37, %v7036_v38  ;;  %v9833_v37 = vld [vmem:[#allocation6 + $0x3b0] sm:$0xf0] }
  0xa1   :  { %1613 = vmatpush.bf16.msrb.mxu2 %v7107_v8  ;;  %1586 = vmatpush.bf16.msrb.mxu0 %v6835_v19  ;;  %v9791_v8 = vld [vmem:[#allocation2 + $0x994] sm:$0xf]  ;;  %v7146_v46 = vld [vmem:[#allocation2 + $0x998] sm:$0xf]  ;;  %v6892_v50 = vld [vmem:[#allocation2 + $0x1d8] sm:$0xf0] }
  0xa2   :  { %v7143_v16 = vor.u32 %v9791_v8, %v7140_v10  ;;  %v6996_v19 = vld [vmem:[#allocation2 + $0x550] sm:$0xf0]  ;;  %v7215_v8 = vor.u32 %v9808_v62, %v7212_v63  ;;  %v9772_v10 = vld [vmem:[#allocation2 + $0x71c] sm:$0xf]  ;;  %v9790_v62 = vld [vmem:[#allocation2 + $0x954] sm:$0xf0] }
  0xa3   :  { %1600 = vmatpush.bf16.msrb.mxu1 %v6963_v24  ;;  %v6874_v24 = vld [vmem:[#allocation2 + $0x118] sm:$0xf]  ;;  %v6999_v28 = vor.u32 %v9755_v18, %v6996_v19  ;;  %v9736_v19 = vld [vmem:[#allocation2 + $0x29c] sm:$0xf] }
  0xa4   :  { %1587 = vmatmul.bf16.vlgmr.msrb.gmra.mxu0 %v10457_v57  ;;  %1680 = vmatpush.bf16.msra.mxu3 %v7035_v9  ;;  %v6940_v9 = vld [vmem:[#allocation2 + $0x358] sm:$0xf0]  ;;  %v9802_v18 = vld [vmem:[#allocation2 + $0xad4] sm:$0xf0] }
  0xa5   :  { %1614 = vmatpush.bf16.msrb.mxu2 %v7091_v25  ;;  %1635 = vmatpush.bf16.msra.mxu0 %v7079_v29  ;;  %v9726_v25 = vld [vmem:[#allocation2 + $0x154] sm:$0xf0]  ;;  %v7127_v29 = vor.u32 %v9787_v21, %v7124_v23  ;;  %v10491_v21 = vld [vmem:[#allocation4] sm:$0xf]  ;;  %v6924_v23 = vld [vmem:[#allocation2 + $0x2d8] sm:$0xf0] }
  0xa6   :  { %1601 = vmatmul.bf16.vlgmr.msrb.gmra.mxu1 %v10466_v5  ;;  %v9760_v51 = vld [vmem:[#allocation2 + $0x59c] sm:$0xf] }
  0xa7   :  { %1649 = vmatpush.bf16.msra.mxu1 %v7207_v30  ;;  %v6875_v30 = vor.u32 %v9726_v25, %v6874_v24  ;;  %v9768_v24 = vld [vmem:[#allocation2 + $0x69c] sm:$0xf] }
  0xa8   :  { %1615 = vmatmul.bf16.vlgmr.msrb.gmra.mxu2 %v10476_v20  ;;  %1681 = vmatpush.bf16.msra.mxu3 %v7019_v22  ;;  %v7199_v22 = vor.u32 %v9804_v12, %v7196_v13  ;;  %v7052_v25 = vld [vmem:[#allocation2 + $0x6d8] sm:$0xf0] }
  0xa9   :  { %1663 = vmatpush.bf16.msra.mxu2 %v6955_v31  ;;  %1636 = vmatpush.bf16.msra.mxu0 %v7063_v41  ;;  %v9751_v31 = vld [vmem:[#allocation2 + $0x494] sm:$0xf]  ;;  %v9724_v63 = vld [vmem:[#allocation2 + $0x11c] sm:$0xf] }
  0xaa   :  { %v6983_v40 = vor.u32 %v9751_v31, %v6980_v32  ;;  %v9747_v41 = vld [vmem:[#allocation2 + $0x414] sm:$0xf]  ;;  %v7055_v31 = vor.u32 %v9768_v24, %v7052_v25  ;;  %v7162_v32 = vld [vmem:[#allocation2 + $0xa18] sm:$0xf]  ;;  %v9720_v12 = vld [vmem:[#allocation2 + $0x9c] sm:$0xf] }
  0xab   :  { %1650 = vmatpush.bf16.msra.mxu1 %v7191_v42  ;;  %v6964_v42 = vld [vmem:[#allocation2 + $0x450] sm:$0xf0]  ;;  %v9782_v25 = vld [vmem:[#allocation2 + $0x854] sm:$0xf0] }
  0xac   :  { %1682 = vmatpush.bf16.msra.mxu3 %v7003_v34  ;;  %v9732_v34 = vld [vmem:[#allocation2 + $0x21c] sm:$0xf] }
  0xad   :  { %1664 = vmatpush.bf16.msra.mxu2 %v6939_v43  ;;  %1637 = vmatpush.bf16.msra.mxu0 %v7047_v53  ;;  %v7111_v43 = vor.u32 %v9783_v33, %v7108_v35  ;;  %v9810_v53 = vld [vmem:[#allocation2 + $0xbd4] sm:$0xf0]  ;;  %v7183_v35 = vor.u32 %v9800_v26, %v7180_v27  ;;  %v9716_v26 = vld [vmem:[#allocation2 + $0x1c] sm:$0xf] }
  0xae   :  { %v7211_v1 = vor.u32 %v9810_v53, %v7210_v52  ;;  %v9798_v33 = vld [vmem:[#allocation2 + $0xa54] sm:$0xf0]  ;;  %v7020_v52 = vld [vmem:[#allocation2 + $0x5d8] sm:$0xf0] }
  0xaf   :  { %1651 = vmatpush.bf16.msra.mxu1 %v7175_v54  ;;  %v9744_v54 = vld [vmem:[#allocation2 + $0x39c] sm:$0xf] }
  0xb0   :  { %1683 = vmatpush.bf16.msra.mxu3 %v6987_v48  ;;  %v9728_v48 = vld [vmem:[#allocation2 + $0x19c] sm:$0xf] }
  0xb1   :  { %1665 = vmatpush.bf16.msra.mxu2 %v6923_v55  ;;  %1638 = vmatpush.bf16.msra.mxu0 %v7031_v2  ;;  %v6967_v55 = vor.u32 %v9747_v41, %v6964_v42  ;;  %v6959_v2 = vor.u32 %v9744_v54, %v6956_v56  ;;  %v7163_v42 = vor.u32 %v9798_v33, %v7162_v32  ;;  %v9792_v53 = vld [vmem:[#allocation2 + $0x99c] sm:$0xf] }
  0xb2   :  { %v7148_v54 = vld [vmem:[#allocation2 + $0x9d8] sm:$0xf0]  ;;  %v7147_v56 = vor.u32 %v9794_v47, %v7146_v46 }
  0xb3   :  { %1652 = vmatpush.bf16.msra.mxu1 %v7159_v3  ;;  %v7087_v3 = vor.u32 %v9776_v58, %v7084_v59  ;;  %v6895_v59 = vor.u32 %v9728_v48, %v6892_v50  ;;  %v6844_v27 = vld [vmem:[#allocation2 + $0x58] sm:$0xf0]  ;;  %v182_v48 = vperm.slane %v10491_v21, 1 }
  0xb4   :  { %1684 = vmatpush.bf16.msra.mxu3 %v6971_v0  ;;  %v7151_v0 = vor.u32 %v9792_v53, %v7148_v54  ;;  %v6972_v32 = vld [vmem:[#allocation2 + $0x458] sm:$0xf0]  ;;  %v9827_v53 = vld [vmem:[#allocation6 + $0x380] sm:$0xf0] }
  0xb5   :  { %1666 = vmatpush.bf16.msra.mxu2 %v6907_v4  ;;  %1639 = vmatpush.bf16.msra.mxu0 %v7015_v15  ;;  %v7194_v4 = vld [vmem:[#allocation2 + $0xb18] sm:$0xf]  ;;  %v9780_v33 = vld [vmem:[#allocation2 + $0x81c] sm:$0xf] }
  0xb6   :  { %v7195_v14 = vor.u32 %v9806_v6, %v7194_v4  ;;  %v7178_v15 = vld [vmem:[#allocation2 + $0xa98] sm:$0xf]  ;;  %v9788_v4 = vld [vmem:[#allocation2 + $0x91c] sm:$0xf] }
  0xb7   :  { %1653 = vmatpush.bf16.msra.mxu1 %v7143_v16  ;;  %v6943_v16 = vor.u32 %v9740_v7, %v6940_v9  ;;  %1685 = vmatmul.bf16.vlgmr.msra.gmra.mxu3 %v10466_v5  ;;  %v7132_v6 = vld [vmem:[#allocation2 + $0x958] sm:$0xf0] }
  0xb8   :  { %1733 = vmatpush.bf16.msrb.mxu3 %v7215_v8  ;;  %v7135_v13 = vor.u32 %v9788_v4, %v7132_v6 }
  0xb9   :  { %1667 = vmatpush.bf16.msra.mxu2 %v6891_v17  ;;  %1640 = vmatpush.bf16.msra.mxu0 %v6999_v28  ;;  %v7071_v17 = vor.u32 %v9772_v10, %v7068_v11  ;;  %v7179_v28 = vor.u32 %v9802_v18, %v7178_v15  ;;  %v7114_v10 = vld [vmem:[#allocation2 + $0x898] sm:$0xf]  ;;  %v9752_v15 = vld [vmem:[#allocation2 + $0x49c] sm:$0xf] }
  0xba   :  { %v9786_v11 = vld [vmem:[#allocation2 + $0x8d4] sm:$0xf0]  ;;  %v7116_v18 = vld [vmem:[#allocation2 + $0x8d8] sm:$0xf0] }
  0xbb   :  { %1654 = vmatpush.bf16.msra.mxu1 %v7127_v29  ;;  %v181_v29 = vperm.slane %v10491_v21, 0 }
  0xbc   :  { %1734 = vmatpush.bf16.msrb.mxu3 %v7199_v22  ;;  %v7098_v22 = vld [vmem:[#allocation2 + $0x818] sm:$0xf] }
  0xbd   :  { %1668 = vmatpush.bf16.msra.mxu2 %v6875_v30  ;;  %1641 = vmatpush.bf16.msra.mxu0 %v6983_v40  ;;  %v6927_v30 = vor.u32 %v9736_v19, %v6924_v23  ;;  %v7164_v40 = vld [vmem:[#allocation2 + $0xa58] sm:$0xf0]  ;;  %v7115_v19 = vor.u32 %v9786_v11, %v7114_v10  ;;  %v7099_v38 = vor.u32 %v9782_v25, %v7098_v22  ;;  %v9818_v10 = vld [vmem:[#allocation6 + $0x338] sm:$0xf0]  ;;  %v7230_v11 = vld [vmem:[#allocation6 + $0x318] sm:$0xf] }
  0xbe   :  { %v7167_v49 = vor.u32 %v9796_v39, %v7164_v40  ;;  %v6847_v39 = vor.u32 %v9716_v26, %v6844_v27  ;;  %v7218_v22 = vld [vmem:[#allocation6 + $0x300] sm:$0xf]  ;;  %v9832_v25 = vld [vmem:[#allocation6 + $0x3ac] sm:$0xf]  ;;  %v7304_v26 = vld [vmem:[#allocation6 + $0x3b4] sm:$0xf0] }
  0xbf   :  { %1655 = vmatpush.bf16.msra.mxu1 %v7111_v43  ;;  %v7374_v27 = vld [vmem:[#allocation6 + $0x438] sm:$0xf] }
  0xc0   :  { %1735 = vmatpush.bf16.msrb.mxu3 %v7183_v35  ;;  %v7100_v35 = vld [vmem:[#allocation2 + $0x858] sm:$0xf0] }
  0xc1   :  { %1669 = vmatpush.bf16.msra.mxu2 %v6859_v44  ;;  %1642 = vmatpush.bf16.msra.mxu0 %v6967_v55  ;;  %v6911_v44 = vor.u32 %v9732_v34, %v6908_v36  ;;  %v7302_v36 = vld [vmem:[#allocation6 + $0x3a8] sm:$0xf] }
  0xc3   :  { %1656 = vmatpush.bf16.msra.mxu1 %v7095_v60  ;;  %v694_v41 = vpop.f32.mrf.mxu0  ;;  %v7023_v60 = vor.u32 %v9760_v51, %v7020_v52  ;;  %v7278_v52 = vld [vmem:[#allocation6 + $0x378] sm:$0xf] }
  0xc4   :  { %1643 = vmatmul.bf16.vlgmr.msra.gmra.mxu0 %v10466_v5  ;;  %v695_v43 = vadd.f32 %v694_v41, %v181_v29  ;;  %1736 = vmatpush.bf16.msrb.mxu3 %v7167_v49  ;;  %v7103_v41 = vor.u32 %v9780_v33, %v7100_v35  ;;  %v9829_v33 = vld [vmem:[#allocation6 + $0x394] sm:$0xf]  ;;  %v7292_v35 = vld [vmem:[#allocation6 + $0x39c] sm:$0xf0] }
  0xc5   :  { %1670 = vmatpush.bf16.msra.mxu2 %v6843_v61  ;;  %1691 = vmatpush.bf16.msrb.mxu0 %v7211_v1  ;;  %v708_v55 = vpop.f32.mrf.mxu1  ;;  %v7130_v61 = vld [vmem:[#allocation2 + $0x918] sm:$0xf]  ;;  %v6876_v1 = vld [vmem:[#allocation2 + $0x158] sm:$0xf0] }
  0xc6   :  { %1657 = vmatmul.bf16.vlgmr.msra.gmra.mxu1 %v10476_v20  ;;  %v709_v58 = vadd.f32 %v708_v55, %v695_v43  ;;  %v7131_v7 = vor.u32 %v9790_v62, %v7130_v61  ;;  %v6879_v8 = vor.u32 %v9724_v63, %v6876_v1  ;;  %v7279_v55 = vor.u32 %v9827_v53, %v7278_v52 }
  0xc7   :  { %1705 = vmatpush.bf16.msrb.mxu1 %v6959_v2  ;;  %v9756_v2 = vld [vmem:[#allocation2 + $0x51c] sm:$0xf] }
  0xc8   :  { %1671 = vmatmul.bf16.vlgmr.msra.gmra.mxu2 %v10457_v57  ;;  %1737 = vmatpush.bf16.msrb.mxu3 %v7151_v0  ;;  %v183_v0 = vperm.slane %v10491_v21, 2 }
  0xc9   :  { %1719 = vmatpush.bf16.msrb.mxu2 %v7087_v3  ;;  %1692 = vmatpush.bf16.msrb.mxu0 %v7195_v14  ;;  %v7004_v3 = vld [vmem:[#allocation2 + $0x558] sm:$0xf0]  ;;  %v736_v46 = vpop.f32.mrf.mxu3 }
  0xca   :  { %v7007_v9 = vor.u32 %v9756_v2, %v7004_v3  ;;  %v6860_v14 = vld [vmem:[#allocation2 + $0xd8] sm:$0xf0]  ;;  %v737_v50 = vadd.f32 %v736_v46, %v182_v48  ;;  %v7254_v2 = vld [vmem:[#allocation6 + $0x348] sm:$0xf]  ;;  %v9821_v3 = vld [vmem:[#allocation6 + $0x350] sm:$0xf0] }
  0xcb   :  { %1706 = vmatpush.bf16.msrb.mxu1 %v6943_v16  ;;  %v6988_v16 = vld [vmem:[#allocation2 + $0x4d8] sm:$0xf0]  ;;  %v6863_v23 = vor.u32 %v9720_v12, %v6860_v14  ;;  %v10502_v43 = vpop.f32.mrf.mxu0  ;;  %v7255_v6 = vor.u32 %v9821_v3, %v7254_v2  ;;  %v7398_v14 = vld [vmem:[#allocation6 + $0x468] sm:$0xf]  ;;  %v7338_v2 = vld [vmem:[#allocation6 + $0x3f0] sm:$0xf] }
  0xcc   :  { %v6991_v24 = vor.u32 %v9752_v15, %v6988_v16  ;;  %1738 = vmatpush.bf16.msrb.mxu3 %v7135_v13  ;;  %v9815_v13 = vld [vmem:[#allocation6 + $0x320] sm:$0xf0]  ;;  %v9857_v15 = vld [vmem:[#allocation6 + $0x470] sm:$0xf0]  ;;  %v9842_v3 = vld [vmem:[#allocation6 + $0x3f8] sm:$0xf0] }
  0xcd   :  { %1720 = vmatpush.bf16.msrb.mxu2 %v7071_v17  ;;  %1693 = vmatpush.bf16.msrb.mxu0 %v7179_v28  ;;  %v9784_v17 = vld [vmem:[#allocation2 + $0x89c] sm:$0xf]  ;;  %v722_v28 = vpop.f32.mrf.mxu2  ;;  %v10504_v47 = vpop.f32.mrf.mxu1  ;;  %v7231_v16 = vor.u32 %v9815_v13, %v7230_v11  ;;  %v7326_v13 = vld [vmem:[#allocation6 + $0x3d8] sm:$0xf] }
  0xce   :  { %v10500_v34 = vadd.f32 %v722_v28, %v709_v58  ;;  %v9851_v28 = vld [vmem:[#allocation6 + $0x440] sm:$0xf0] }
  0xcf   :  { %1707 = vmatpush.bf16.msrb.mxu1 %v6927_v30  ;;  %v7119_v30 = vor.u32 %v9784_v17, %v7116_v18  ;;  %v7399_v17 = vor.u32 %v9857_v15, %v7398_v14  ;;  %v7386_v18 = vld [vmem:[#allocation6 + $0x450] sm:$0xf]  ;;  %v9839_v14 = vld [vmem:[#allocation6 + $0x3e0] sm:$0xf0]  ;;  %v9817_v15 = vld [vmem:[#allocation6 + $0x334] sm:$0xf] }
  0xd1   :  { %1721 = vmatpush.bf16.msrb.mxu2 %v7055_v31  ;;  %1694 = vmatpush.bf16.msrb.mxu0 %v7163_v42  ;;  %v9748_v31 = vld [vmem:[#allocation2 + $0x41c] sm:$0xf]  ;;  %v7303_v42 = vor.u32 %v9833_v37, %v7302_v36  ;;  %v10515_v58 = vpop.f32.mrf.mxu3  ;;  %v7362_v36 = vld [vmem:[#allocation6 + $0x420] sm:$0xf] }
  0xd2   :  { %v6975_v40 = vor.u32 %v9748_v31, %v6972_v32  ;;  %1739 = vmatpush.bf16.msrb.mxu3 %v7119_v30  ;;  %v7307_v31 = vor.u32 %v9832_v25, %v7304_v26  ;;  %v7375_v32 = vor.u32 %v9851_v28, %v7374_v27  ;;  %v9848_v37 = vld [vmem:[#allocation6 + $0x428] sm:$0xf0]  ;;  %v9814_v26 = vld [vmem:[#allocation6 + $0x31c] sm:$0xf]  ;;  %v7232_v28 = vld [vmem:[#allocation6 + $0x324] sm:$0xf0] }
  0xd3   :  { %1708 = vmatpush.bf16.msrb.mxu1 %v6911_v44  ;;  %v7290_v44 = vld [vmem:[#allocation6 + $0x390] sm:$0xf]  ;;  %v9836_v25 = vld [vmem:[#allocation6 + $0x3c8] sm:$0xf0] }
  0xd5   :  { %1722 = vmatpush.bf16.msrb.mxu2 %v7039_v45  ;;  %1695 = vmatpush.bf16.msrb.mxu0 %v7147_v56  ;;  %v9830_v45 = vld [vmem:[#allocation6 + $0x398] sm:$0xf0]  ;;  %v10513_v51 = vpop.f32.mrf.mxu2 }
  0xd6   :  { %1740 = vmatpush.bf16.msrb.mxu3 %v7103_v41  ;;  %v7291_v49 = vor.u32 %v9830_v45, %v7290_v44  ;;  %v9826_v41 = vld [vmem:[#allocation6 + $0x37c] sm:$0xf] }
  0xd7   :  { %1709 = vmatpush.bf16.msrb.mxu1 %v6895_v59  ;;  %v7266_v59 = vld [vmem:[#allocation6 + $0x360] sm:$0xf] }
  0xd9   :  { %1723 = vmatpush.bf16.msrb.mxu2 %v7023_v60  ;;  %1696 = vmatpush.bf16.msrb.mxu0 %v7131_v7  ;;  %v9824_v60 = vld [vmem:[#allocation6 + $0x368] sm:$0xf0] }
  0xda   :  { %1741 = vmatmul.bf16.vlgmr.msrb.gmra.mxu3 %v10476_v20  ;;  %v7267_v62 = vor.u32 %v9824_v60, %v7266_v59  ;;  %v792_v7 = vpop.f32.mrf.mxu3 }
  0xdb   :  { %1710 = vmatpush.bf16.msrb.mxu1 %v6879_v8 }
  0xdd   :  { %1724 = vmatpush.bf16.msrb.mxu2 %v7007_v9  ;;  %1697 = vmatpush.bf16.msrb.mxu0 %v7115_v19  ;;  %v7242_v9 = vld [vmem:[#allocation6 + $0x330] sm:$0xf]  ;;  %v9854_v19 = vld [vmem:[#allocation6 + $0x458] sm:$0xf0] }
  0xde   :  { %v7243_v12 = vor.u32 %v9818_v10, %v7242_v9 }
  0xdf   :  { %1711 = vmatpush.bf16.msrb.mxu1 %v6863_v23  ;;  %v9812_v23 = vld [vmem:[#allocation6 + $0x308] sm:$0xf0] }
  0xe0   :  { %v7219_v30 = vor.u32 %v9812_v23, %v7218_v22  ;;  %v9881_v22 = vld [vmem:[#allocation6 + $0x530] sm:$0xf0] }
  0xe1   :  { %1725 = vmatpush.bf16.msrb.mxu2 %v6991_v24  ;;  %1698 = vmatpush.bf16.msrb.mxu0 %v7099_v38  ;;  %v750_v54 = vpop.f32.mrf.mxu0  ;;  %v7387_v24 = vor.u32 %v9854_v19, %v7386_v18  ;;  %v7494_v19 = vld [vmem:[#allocation6 + $0x528] sm:$0xf] }
  0xe2   :  { %v751_v56 = vadd.f32 %v750_v54, %v737_v50  ;;  %v184_v50 = vperm.slane %v10491_v21, 3  ;;  %v10531_v53 = vpop.f32.mrf.mxu3  ;;  %v7350_v54 = vld [vmem:[#allocation6 + $0x408] sm:$0xf]  ;;  %v7495_v23 = vor.u32 %v9881_v22, %v7494_v19  ;;  %v9869_v22 = vld [vmem:[#allocation6 + $0x4d0] sm:$0xf0] }
  0xe3   :  { %1712 = vmatpush.bf16.msrb.mxu1 %v6847_v39  ;;  %v764_v61 = vpop.f32.mrf.mxu1  ;;  %v7295_v39 = vor.u32 %v9829_v33, %v7292_v35  ;;  %v7482_v35 = vld [vmem:[#allocation6 + $0x510] sm:$0xf]  ;;  %v7446_v19 = vld [vmem:[#allocation6 + $0x4c8] sm:$0xf] }
  0xe4   :  { %1699 = vmatmul.bf16.vlgmr.msrb.gmra.mxu0 %v10476_v20  ;;  %v10517_v63 = vadd.f32 %v764_v61, %v751_v56  ;;  %v9823_v56 = vld [vmem:[#allocation6 + $0x364] sm:$0xf]  ;;  %v7268_v61 = vld [vmem:[#allocation6 + $0x36c] sm:$0xf0] }
  0xe5   :  { %1726 = vmatpush.bf16.msrb.mxu2 %v6975_v40  ;;  %2399 = vmatpush.bf16.msra.mxu0 %v7303_v42  ;;  %v7363_v40 = vor.u32 %v9848_v37, %v7362_v36  ;;  %v7280_v42 = vld [vmem:[#allocation6 + $0x384] sm:$0xf0]  ;;  %v9878_v36 = vld [vmem:[#allocation6 + $0x518] sm:$0xf0]  ;;  %v9811_v37 = vld [vmem:[#allocation6 + $0x304] sm:$0xf] }
  0xe6   :  { %1713 = vmatmul.bf16.vlgmr.msrb.gmra.mxu1 %v10457_v57  ;;  %v7283_v45 = vor.u32 %v9826_v41, %v7280_v42  ;;  %v9853_v42 = vld [vmem:[#allocation6 + $0x454] sm:$0xf] }
  0xe7   :  { %2413 = vmatpush.bf16.msra.mxu1 %v7399_v17  ;;  %v7244_v17 = vld [vmem:[#allocation6 + $0x33c] sm:$0xf0] }
  0xe8   :  { %1727 = vmatmul.bf16.vlgmr.msrb.gmra.mxu2 %v10466_v5  ;;  %v7247_v18 = vor.u32 %v9817_v15, %v7244_v17  ;;  %v9847_v15 = vld [vmem:[#allocation6 + $0x424] sm:$0xf] }
  0xe9   :  { %2400 = vmatpush.bf16.msra.mxu0 %v7291_v49  ;;  %v10522_v38 = vpop.f32.mrf.mxu0  ;;  %2427 = vmatpush.bf16.msra.mxu2 %v7495_v23  ;;  %v7566_v23 = vld [vmem:[#allocation6 + $0x5b8] sm:$0xf] }
  0xeb   :  { %v778_v1 = vpop.f32.mrf.mxu2  ;;  %2414 = vmatpush.bf16.msra.mxu1 %v7387_v24  ;;  %v10524_v44 = vpop.f32.mrf.mxu1  ;;  %v7314_v24 = vld [vmem:[#allocation6 + $0x3c0] sm:$0xf] }
  0xec   :  { %v779_v4 = vadd.f32 %v778_v1, %v183_v0  ;;  %v7271_v1 = vor.u32 %v9823_v56, %v7268_v61  ;;  %v7315_v27 = vor.u32 %v9836_v25, %v7314_v24  ;;  %v9875_v56 = vld [vmem:[#allocation6 + $0x500] sm:$0xf0]  ;;  %v7447_v24 = vor.u32 %v9869_v22, %v7446_v19 }
  0xed   :  { %2401 = vmatpush.bf16.msra.mxu0 %v7279_v55  ;;  %v9845_v55 = vld [vmem:[#allocation6 + $0x410] sm:$0xf0]  ;;  %v9899_v25 = vld [vmem:[#allocation6 + $0x5c0] sm:$0xf0] }
  0xee   :  { %v793_v8 = vadd.f32 %v792_v7, %v779_v4  ;;  %v7351_v60 = vor.u32 %v9845_v55, %v7350_v54  ;;  %v9820_v4 = vld [vmem:[#allocation6 + $0x34c] sm:$0xf]  ;;  %v7339_v7 = vor.u32 %v9842_v3, %v7338_v2  ;;  %v7470_v54 = vld [vmem:[#allocation6 + $0x4f8] sm:$0xf]  ;;  %v7376_v2 = vld [vmem:[#allocation6 + $0x444] sm:$0xf0] }
  0xef   :  { %2415 = vmatpush.bf16.msra.mxu1 %v7375_v32  ;;  %v7235_v32 = vor.u32 %v9814_v26, %v7232_v28  ;;  %v7471_v61 = vor.u32 %v9875_v56, %v7470_v54  ;;  %v7567_v28 = vor.u32 %v9899_v25, %v7566_v23  ;;  %v9890_v23 = vld [vmem:[#allocation6 + $0x578] sm:$0xf0]  ;;  %v7496_v25 = vld [vmem:[#allocation6 + $0x534] sm:$0xf0] }
  0xf1   :  { %2402 = vmatpush.bf16.msra.mxu0 %v7267_v62 }
  0xf3   :  { %2416 = vmatpush.bf16.msra.mxu1 %v7363_v40  ;;  %v10526_v46 = vpop.f32.mrf.mxu2  ;;  %v7220_v40 = vld [vmem:[#allocation6 + $0x30c] sm:$0xf0] }
  0xf4   :  { %v7223_v41 = vor.u32 %v9811_v37, %v7220_v40  ;;  %v7554_v37 = vld [vmem:[#allocation6 + $0x5a0] sm:$0xf]  ;;  %v9896_v40 = vld [vmem:[#allocation6 + $0x5a8] sm:$0xf0] }
  0xf5   :  { %2403 = vmatpush.bf16.msra.mxu0 %v7255_v6 }
  0xf7   :  { %2417 = vmatpush.bf16.msra.mxu1 %v7351_v60  ;;  %v9905_v60 = vld [vmem:[#allocation6 + $0x5f0] sm:$0xf0] }
  0xf9   :  { %2404 = vmatpush.bf16.msra.mxu0 %v7243_v12 }
  0xfa   :  { %v848_v11 = vpop.f32.mrf.mxu3 }
  0xfb   :  { %2418 = vmatpush.bf16.msra.mxu1 %v7339_v7  ;;  %v9872_v7 = vld [vmem:[#allocation6 + $0x4e8] sm:$0xf0] }
  0xfd   :  { %2405 = vmatpush.bf16.msra.mxu0 %v7231_v16  ;;  %v7327_v16 = vor.u32 %v9839_v14, %v7326_v13 }
  0xff   :  { %2419 = vmatpush.bf16.msra.mxu1 %v7327_v16  ;;  %v7364_v16 = vld [vmem:[#allocation6 + $0x42c] sm:$0xf0] }
 0x101   :  { %2406 = vmatpush.bf16.msra.mxu0 %v7219_v30  ;;  %v806_v49 = vpop.f32.mrf.mxu0  ;;  %v9856_v30 = vld [vmem:[#allocation6 + $0x46c] sm:$0xf] }
 0x102   :  { %v10529_v52 = vadd.f32 %v806_v49, %v793_v8  ;;  %v7256_v8 = vld [vmem:[#allocation6 + $0x354] sm:$0xf0] }
 0x103   :  { %v820_v59 = vpop.f32.mrf.mxu1  ;;  %v7259_v10 = vor.u32 %v9820_v4, %v7256_v8  ;;  %2420 = vmatpush.bf16.msra.mxu1 %v7315_v27  ;;  %v10541_v8 = vld [vmem:[#allocation4 + $0x4] sm:$0xf] }
 0x104   :  { %v821_v62 = vadd.f32 %v820_v59, %v184_v50  ;;  %v7590_v59 = vld [vmem:[#allocation6 + $0x5e8] sm:$0xf]  ;;  %v1091_v17 = vperm.slane %v10541_v8, 0 }
 0x105   :  { %2455 = vmatpush.bf16.msrb.mxu0 %v7307_v31  ;;  %v7400_v31 = vld [vmem:[#allocation6 + $0x474] sm:$0xf0] }
 0x106   :  { %v7403_v33 = vor.u32 %v9856_v30, %v7400_v31  ;;  %v9844_v30 = vld [vmem:[#allocation6 + $0x40c] sm:$0xf]  ;;  %v7352_v31 = vld [vmem:[#allocation6 + $0x414] sm:$0xf0] }
 0x108   :  { %2469 = vmatpush.bf16.msrb.mxu1 %v7403_v33 }
 0x109   :  { %2456 = vmatpush.bf16.msrb.mxu0 %v7295_v39  ;;  %v7483_v39 = vor.u32 %v9878_v36, %v7482_v35  ;;  %v10539_v3 = vpop.f32.mrf.mxu0  ;;  %v7434_v35 = vld [vmem:[#allocation6 + $0x4b0] sm:$0xf]  ;;  %v9866_v36 = vld [vmem:[#allocation6 + $0x4b8] sm:$0xf0] }
 0x10b   :  { %v834_v6 = vpop.f32.mrf.mxu2  ;;  %2428 = vmatpush.bf16.msra.mxu2 %v7483_v39  ;;  %v10537_v55 = vpop.f32.mrf.mxu1  ;;  %v7435_v39 = vor.u32 %v9866_v36, %v7434_v35 }
 0x10c   :  { %v835_v9 = vadd.f32 %v834_v6, %v821_v62  ;;  %v7591_v62 = vor.u32 %v9905_v60, %v7590_v59  ;;  %v7458_v6 = vld [vmem:[#allocation6 + $0x4e0] sm:$0xf]  ;;  %v7422_v59 = vld [vmem:[#allocation6 + $0x498] sm:$0xf]  ;;  %v9863_v60 = vld [vmem:[#allocation6 + $0x4a0] sm:$0xf0] }
 0x10d   :  { %2457 = vmatpush.bf16.msrb.mxu0 %v7283_v45  ;;  %v7388_v45 = vld [vmem:[#allocation6 + $0x45c] sm:$0xf0] }
 0x10e   :  { %v10535_v12 = vadd.f32 %v848_v11, %v835_v9  ;;  %v7391_v49 = vor.u32 %v9853_v42, %v7388_v45  ;;  %2441 = vmatpush.bf16.msra.mxu3 %v7591_v62  ;;  %v7459_v9 = vor.u32 %v9872_v7, %v7458_v6  ;;  %v9902_v11 = vld [vmem:[#allocation6 + $0x5d8] sm:$0xf0]  ;;  %v9841_v42 = vld [vmem:[#allocation6 + $0x3f4] sm:$0xf]  ;;  %v7340_v45 = vld [vmem:[#allocation6 + $0x3fc] sm:$0xf0]  ;;  %v7423_v62 = vor.u32 %v9863_v60, %v7422_v59 }
 0x10f   :  { %2429 = vmatpush.bf16.msra.mxu2 %v7471_v61  ;;  %v7343_v54 = vor.u32 %v9841_v42, %v7340_v45  ;;  %v7542_v61 = vld [vmem:[#allocation6 + $0x588] sm:$0xf]  ;;  %v9838_v7 = vld [vmem:[#allocation6 + $0x3dc] sm:$0xf]  ;;  %v9877_v42 = vld [vmem:[#allocation6 + $0x514] sm:$0xf] }
 0x110   :  { %2470 = vmatpush.bf16.msrb.mxu1 %v7391_v49  ;;  %v7484_v45 = vld [vmem:[#allocation6 + $0x51c] sm:$0xf0]  ;;  %v7298_v59 = vld [vmem:[#allocation6 + $0x398] sm:$0xf] }
 0x111   :  { %2458 = vmatpush.bf16.msrb.mxu0 %v7271_v1  ;;  %v9850_v1 = vld [vmem:[#allocation6 + $0x43c] sm:$0xf] }
 0x112   :  { %v7379_v4 = vor.u32 %v9850_v1, %v7376_v2  ;;  %v9893_v1 = vld [vmem:[#allocation6 + $0x590] sm:$0xf0] }
 0x113   :  { %v10543_v13 = vpop.f32.mrf.mxu2  ;;  %2430 = vmatpush.bf16.msra.mxu2 %v7459_v9  ;;  %v7543_v6 = vor.u32 %v9893_v1, %v7542_v61  ;;  %v7328_v9 = vld [vmem:[#allocation6 + $0x3e4] sm:$0xf0]  ;;  %v9831_v61 = vld [vmem:[#allocation6 + $0x3a0] sm:$0xf0]  ;;  %v9884_v1 = vld [vmem:[#allocation6 + $0x548] sm:$0xf0] }
 0x114   :  { %2471 = vmatpush.bf16.msrb.mxu1 %v7379_v4 }
 0x115   :  { %2459 = vmatpush.bf16.msrb.mxu0 %v7259_v10  ;;  %v7578_v10 = vld [vmem:[#allocation6 + $0x5d0] sm:$0xf] }
 0x116   :  { %v7579_v14 = vor.u32 %v9902_v11, %v7578_v10  ;;  %v7331_v11 = vor.u32 %v9838_v7, %v7328_v9  ;;  %v9904_v7 = vld [vmem:[#allocation6 + $0x5ec] sm:$0xf] }
 0x117   :  { %2431 = vmatpush.bf16.msra.mxu2 %v7447_v24  ;;  %v9880_v24 = vld [vmem:[#allocation6 + $0x52c] sm:$0xf] }
 0x118   :  { %2442 = vmatpush.bf16.msra.mxu3 %v7579_v14 }
 0x119   :  { %2460 = vmatpush.bf16.msrb.mxu0 %v7247_v18  ;;  %v7367_v18 = vor.u32 %v9847_v15, %v7364_v16  ;;  %v7410_v15 = vld [vmem:[#allocation6 + $0x480] sm:$0xf]  ;;  %v9860_v16 = vld [vmem:[#allocation6 + $0x488] sm:$0xf0] }
 0x11a   :  { %v7411_v22 = vor.u32 %v9860_v16, %v7410_v15  ;;  %v7286_v16 = vld [vmem:[#allocation6 + $0x380] sm:$0xf] }
 0x11b   :  { %2472 = vmatpush.bf16.msrb.mxu1 %v7367_v18  ;;  %2432 = vmatpush.bf16.msra.mxu2 %v7435_v39  ;;  %v7530_v18 = vld [vmem:[#allocation6 + $0x570] sm:$0xf]  ;;  %v7518_v39 = vld [vmem:[#allocation6 + $0x558] sm:$0xf] }
 0x11c   :  { %2443 = vmatpush.bf16.msra.mxu3 %v7567_v28  ;;  %v9835_v28 = vld [vmem:[#allocation6 + $0x3c4] sm:$0xf] }
 0x11d   :  { %2461 = vmatpush.bf16.msrb.mxu0 %v7235_v32  ;;  %v7355_v32 = vor.u32 %v9844_v30, %v7352_v31  ;;  %v7316_v30 = vld [vmem:[#allocation6 + $0x3cc] sm:$0xf0]  ;;  %v10546_v31 = vpop.f32.mrf.mxu3 }
 0x11e   :  { %v7319_v35 = vor.u32 %v9835_v28, %v7316_v30  ;;  %v7274_v30 = vld [vmem:[#allocation6 + $0x368] sm:$0xf] }
 0x11f   :  { %2473 = vmatpush.bf16.msrb.mxu1 %v7355_v32  ;;  %2433 = vmatpush.bf16.msra.mxu2 %v7423_v62  ;;  %v7310_v32 = vld [vmem:[#allocation6 + $0x3b0] sm:$0xf]  ;;  %v7506_v62 = vld [vmem:[#allocation6 + $0x540] sm:$0xf] }
 0x121   :  { %2462 = vmatpush.bf16.msrb.mxu0 %v7223_v41  ;;  %v1588_v26 = vpop.f32.mrf.mxu0  ;;  %v7555_v41 = vor.u32 %v9896_v40, %v7554_v37  ;;  %v9887_v40 = vld [vmem:[#allocation6 + $0x560] sm:$0xf0] }
 0x122   :  { %v1589_v33 = vadd.f32 %v1588_v26, %v1091_v17  ;;  %v7531_v26 = vor.u32 %v9890_v23, %v7530_v18  ;;  %v9828_v18 = vld [vmem:[#allocation6 + $0x388] sm:$0xf0]  ;;  %v9901_v23 = vld [vmem:[#allocation6 + $0x5d4] sm:$0xf] }
 0x123   :  { %v1602_v27 = vpop.f32.mrf.mxu1  ;;  %2444 = vmatpush.bf16.msra.mxu3 %v7555_v41  ;;  %2474 = vmatpush.bf16.msrb.mxu1 %v7343_v54  ;;  %v7519_v41 = vor.u32 %v9887_v40, %v7518_v39  ;;  %v7487_v54 = vor.u32 %v9877_v42, %v7484_v45  ;;  %v7568_v39 = vld [vmem:[#allocation6 + $0x5c4] sm:$0xf0] }
 0x124   :  { %v1603_v56 = vadd.f32 %v1602_v27, %v1589_v33  ;;  %v7499_v27 = vor.u32 %v9880_v24, %v7496_v25  ;;  %v9834_v33 = vld [vmem:[#allocation6 + $0x3b8] sm:$0xf0]  ;;  %2434 = vmatpush.bf16.msra.mxu2 %v7411_v22  ;;  %v7460_v22 = vld [vmem:[#allocation6 + $0x4ec] sm:$0xf0]  ;;  %v1092_v24 = vperm.slane %v10541_v8, 1 }
 0x127   :  { %2445 = vmatpush.bf16.msra.mxu3 %v7543_v6  ;;  %2475 = vmatpush.bf16.msrb.mxu1 %v7331_v11  ;;  %v7472_v6 = vld [vmem:[#allocation6 + $0x504] sm:$0xf0]  ;;  %v7299_v11 = vor.u32 %v9831_v61, %v7298_v59  ;;  %v9865_v59 = vld [vmem:[#allocation6 + $0x4b4] sm:$0xf]  ;;  %v7436_v61 = vld [vmem:[#allocation6 + $0x4bc] sm:$0xf0] }
 0x128   :  { %2483 = vmatpush.bf16.msrb.mxu2 %v7499_v27  ;;  %v7287_v27 = vor.u32 %v9828_v18, %v7286_v16  ;;  %v9892_v16 = vld [vmem:[#allocation6 + $0x58c] sm:$0xf] }
 0x129   :  { %v1590_v2 = vpop.f32.mrf.mxu0 }
 0x12a   :  { %v1591_v10 = vadd.f32 %v1590_v2, %v1091_v17  ;;  %v7507_v2 = vor.u32 %v9884_v1, %v7506_v62  ;;  %v9895_v62 = vld [vmem:[#allocation6 + $0x5a4] sm:$0xf] }
 0x12b   :  { %v1616_v49 = vpop.f32.mrf.mxu2  ;;  %v1604_v4 = vpop.f32.mrf.mxu1  ;;  %2446 = vmatpush.bf16.msra.mxu3 %v7531_v26  ;;  %2476 = vmatpush.bf16.msrb.mxu1 %v7319_v35  ;;  %v7580_v26 = vld [vmem:[#allocation6 + $0x5dc] sm:$0xf0]  ;;  %v9898_v35 = vld [vmem:[#allocation6 + $0x5bc] sm:$0xf] }
 0x12c   :  { %v1617_v14 = vadd.f32 %v1616_v49, %v1603_v56  ;;  %v1605_v19 = vadd.f32 %v1604_v4, %v1591_v10  ;;  %v7311_v56 = vor.u32 %v9834_v33, %v7310_v32  ;;  %2484 = vmatpush.bf16.msrb.mxu2 %v7487_v54  ;;  %v9874_v4 = vld [vmem:[#allocation6 + $0x4fc] sm:$0xf]  ;;  %v7592_v10 = vld [vmem:[#allocation6 + $0x5f4] sm:$0xf0]  ;;  %v7583_v28 = vor.u32 %v9901_v23, %v7580_v26  ;;  %v9868_v32 = vld [vmem:[#allocation6 + $0x4cc] sm:$0xf] }
 0x12d   :  { %v7475_v9 = vor.u32 %v9874_v4, %v7472_v6  ;;  %v7595_v15 = vor.u32 %v9904_v7, %v7592_v10  ;;  %v7448_v33 = vld [vmem:[#allocation6 + $0x4d4] sm:$0xf0]  ;;  %v7571_v42 = vor.u32 %v9898_v35, %v7568_v39  ;;  %v9822_v54 = vld [vmem:[#allocation6 + $0x358] sm:$0xf0]  ;;  %v7556_v4 = vld [vmem:[#allocation6 + $0x5ac] sm:$0xf0] }
 0x12e   :  { %v1747_v36 = vmax.f32 %v1617_v14, 0.0  ;;  %v1630_v14 = vpop.f32.mrf.mxu3  ;;  %v7559_v7 = vor.u32 %v9895_v62, %v7556_v4  ;;  %v7250_v10 = vld [vmem:[#allocation6 + $0x338] sm:$0xf]  ;;  %v9889_v35 = vld [vmem:[#allocation6 + $0x574] sm:$0xf] }
 0x12f   :  { %2447 = vmatpush.bf16.msra.mxu3 %v7519_v41  ;;  %v9858_v39 = vld [vmem:[#allocation6 + $0x478] sm:$0xf0]  ;;  %v9641_v62 = vld [vmem:[#allocation6 + $0xb0] sm:$0xf0] }
 0x130   :  { %2485 = vmatpush.bf16.msrb.mxu2 %v7475_v9 }
 0x133   :  { %v1618_v17 = vpop.f32.mrf.mxu2  ;;  %2448 = vmatpush.bf16.msra.mxu3 %v7507_v2  ;;  %v7439_v2 = vor.u32 %v9865_v59, %v7436_v61  ;;  %v7686_v59 = vld [vmem:[#allocation6 + $0xa8] sm:$0xf] }
 0x134   :  { %v1619_v37 = vadd.f32 %v1618_v17, %v1605_v19  ;;  %v9871_v19 = vld [vmem:[#allocation6 + $0x4e4] sm:$0xf]  ;;  %v9825_v17 = vld [vmem:[#allocation6 + $0x370] sm:$0xf0] }
 0x135   :  { %v7463_v25 = vor.u32 %v9871_v19, %v7460_v22  ;;  %v7275_v41 = vor.u32 %v9825_v17, %v7274_v30  ;;  %v7544_v22 = vld [vmem:[#allocation6 + $0x594] sm:$0xf0]  ;;  %v7238_v30 = vld [vmem:[#allocation6 + $0x320] sm:$0xf]  ;;  %v7406_v17 = vld [vmem:[#allocation6 + $0x470] sm:$0xf] }
 0x136   :  { %v1751_v49 = vmax.f32 %v1619_v37, 0.0  ;;  %v7451_v37 = vor.u32 %v9868_v32, %v7448_v33  ;;  %v7547_v26 = vor.u32 %v9892_v16, %v7544_v22  ;;  %v9859_v32 = vld [vmem:[#allocation6 + $0x484] sm:$0xf]  ;;  %v7412_v33 = vld [vmem:[#allocation6 + $0x48c] sm:$0xf0]  ;;  %v7407_v61 = vor.u32 %v9858_v39, %v7406_v17 }
 0x137   :  { %2497 = vmatpush.bf16.msrb.mxu3 %v7595_v15  ;;  %2486 = vmatpush.bf16.msrb.mxu2 %v7463_v25  ;;  %v7424_v15 = vld [vmem:[#allocation6 + $0x4a4] sm:$0xf0]  ;;  %v7508_v22 = vld [vmem:[#allocation6 + $0x54c] sm:$0xf0]  ;;  %v9635_v17 = vld [vmem:[#allocation6 + $0x80] sm:$0xf0] }
 0x138   :  { %v10548_v60 = vpack.c.bf16 %v1751_v49, %v1747_v36  ;;  %v1631_v36 = vadd.f32 %v1630_v14, %v1092_v24  ;;  %v7262_v49 = vld [vmem:[#allocation6 + $0x350] sm:$0xf]  ;;  %v9862_v14 = vld [vmem:[#allocation6 + $0x49c] sm:$0xf]  ;;  %v7650_v39 = vld [vmem:[#allocation6 + $0x60] sm:$0xf] }
 0x139   :  { %v7263_v6 = vor.u32 %v9822_v54, %v7262_v49  ;;  %v7427_v19 = vor.u32 %v9862_v14, %v7424_v15  ;;  %v7674_v14 = vld [vmem:[#allocation6 + $0x90] sm:$0xf] }
 0x13a   :  { %2407 = vmatmul.bf16.vlgmr.msra.gmra.mxu0 %v10548_v60 }
 0x13b   :  { %2511 = vmatpush.bf16.msra.mxu0 %v7311_v56  ;;  %2498 = vmatpush.bf16.msrb.mxu3 %v7583_v28  ;;  %v1632_v56 = vpop.f32.mrf.mxu3 }
 0x13c   :  { %2487 = vmatpush.bf16.msrb.mxu2 %v7451_v37  ;;  %v1633_v9 = vadd.f32 %v1632_v56, %v1092_v24  ;;  %v9816_v24 = vld [vmem:[#allocation6 + $0x328] sm:$0xf0]  ;;  %v9813_v56 = vld [vmem:[#allocation6 + $0x310] sm:$0xf0] }
 0x13f   :  { %2512 = vmatpush.bf16.msra.mxu0 %v7299_v11  ;;  %2499 = vmatpush.bf16.msrb.mxu3 %v7571_v42  ;;  %v9819_v11 = vld [vmem:[#allocation6 + $0x340] sm:$0xf0]  ;;  %v7239_v42 = vor.u32 %v9816_v24, %v7238_v30  ;;  %v7662_v24 = vld [vmem:[#allocation6 + $0x78] sm:$0xf] }
 0x140   :  { %2488 = vmatpush.bf16.msrb.mxu2 %v7439_v2  ;;  %v7251_v25 = vor.u32 %v9819_v11, %v7250_v10  ;;  %v7520_v2 = vld [vmem:[#allocation6 + $0x564] sm:$0xf0]  ;;  %v7687_v11 = vor.u32 %v9641_v62, %v7686_v59 }
 0x141   :  { %v1644_v40 = vpop.f32.mrf.mxu0  ;;  %v7638_v62 = vld [vmem:[#allocation6 + $0x48] sm:$0xf] }
 0x142   :  { %v1645_v1 = vadd.f32 %v1644_v40, %v1631_v36  ;;  %v7415_v40 = vor.u32 %v9859_v32, %v7412_v33  ;;  %v7370_v32 = vld [vmem:[#allocation6 + $0x428] sm:$0xf]  ;;  %v9849_v33 = vld [vmem:[#allocation6 + $0x430] sm:$0xf0] }
 0x143   :  { %2513 = vmatpush.bf16.msra.mxu0 %v7287_v27  ;;  %v1658_v45 = vpop.f32.mrf.mxu1  ;;  %2500 = vmatpush.bf16.msrb.mxu3 %v7559_v7  ;;  %v9855_v7 = vld [vmem:[#allocation6 + $0x460] sm:$0xf0] }
 0x144   :  { %v1659_v18 = vadd.f32 %v1658_v45, %v1645_v1  ;;  %2489 = vmatpush.bf16.msrb.mxu2 %v7427_v19  ;;  %v7226_v45 = vld [vmem:[#allocation6 + $0x308] sm:$0xf]  ;;  %v9886_v1 = vld [vmem:[#allocation6 + $0x55c] sm:$0xf]  ;;  %v9883_v19 = vld [vmem:[#allocation6 + $0x544] sm:$0xf] }
 0x145   :  { %v7227_v10 = vor.u32 %v9813_v56, %v7226_v45 }
 0x146   :  { %v1748_v36 = vmax.f32 %v1659_v18, 0.0  ;;  %v9638_v18 = vld [vmem:[#allocation6 + $0x98] sm:$0xf0] }
 0x147   :  { %2514 = vmatpush.bf16.msra.mxu0 %v7275_v41  ;;  %2501 = vmatpush.bf16.msrb.mxu3 %v7547_v26  ;;  %v7532_v41 = vld [vmem:[#allocation6 + $0x57c] sm:$0xf0]  ;;  %v9852_v26 = vld [vmem:[#allocation6 + $0x448] sm:$0xf0] }
 0x148   :  { %v7535_v49 = vor.u32 %v9889_v35, %v7532_v41  ;;  %2490 = vmatpush.bf16.msrb.mxu2 %v7415_v40  ;;  %v7663_v35 = vor.u32 %v9635_v17, %v7662_v24  ;;  %v9632_v40 = vld [vmem:[#allocation6 + $0x68] sm:$0xf0]  ;;  %v7358_v41 = vld [vmem:[#allocation6 + $0x410] sm:$0xf] }
 0x149   :  { %v1646_v23 = vpop.f32.mrf.mxu0  ;;  %v7651_v56 = vor.u32 %v9632_v40, %v7650_v39  ;;  %v7502_v17 = vld [vmem:[#allocation6 + $0x530] sm:$0xf] }
 0x14a   :  { %2463 = vmatmul.bf16.vlgmr.msrb.gmra.mxu0 %v10548_v60  ;;  %v1647_v27 = vadd.f32 %v1646_v23, %v1633_v9  ;;  %v7523_v9 = vor.u32 %v9886_v1, %v7520_v2  ;;  %v1686_v23 = vpop.f32.mrf.mxu3  ;;  %v9629_v1 = vld [vmem:[#allocation6 + $0x50] sm:$0xf0]  ;;  %v7346_v2 = vld [vmem:[#allocation6 + $0x3f8] sm:$0xf] }
 0x14b   :  { %2515 = vmatpush.bf16.msra.mxu0 %v7263_v6  ;;  %v1660_v28 = vpop.f32.mrf.mxu1  ;;  %2502 = vmatpush.bf16.msrb.mxu3 %v7535_v49  ;;  %v7394_v6 = vld [vmem:[#allocation6 + $0x458] sm:$0xf]  ;;  %v1672_v15 = vpop.f32.mrf.mxu2 }
 0x14c   :  { %v1661_v37 = vadd.f32 %v1660_v28, %v1647_v27  ;;  %v7395_v16 = vor.u32 %v9855_v7, %v7394_v6  ;;  %v7511_v27 = vor.u32 %v9883_v19, %v7508_v22  ;;  %v7675_v28 = vor.u32 %v9638_v18, %v7674_v14  ;;  %v9843_v6 = vld [vmem:[#allocation6 + $0x400] sm:$0xf0]  ;;  %v9626_v18 = vld [vmem:[#allocation6 + $0x38] sm:$0xf0]  ;;  %v7334_v19 = vld [vmem:[#allocation6 + $0x3e0] sm:$0xf] }
 0x14d   :  { %v9840_v22 = vld [vmem:[#allocation6 + $0x3e8] sm:$0xf0] }
 0x14e   :  { %v1752_v54 = vmax.f32 %v1661_v37, 0.0  ;;  %v7371_v37 = vor.u32 %v9849_v33, %v7370_v32 }
 0x14f   :  { %2516 = vmatpush.bf16.msra.mxu0 %v7251_v25  ;;  %2503 = vmatpush.bf16.msrb.mxu3 %v7523_v9  ;;  %v7382_v25 = vld [vmem:[#allocation6 + $0x440] sm:$0xf]  ;;  %v1094_v9 = vperm.slane %v10541_v8, 3 }
 0x150   :  { %v10553_v4 = vpack.c.bf16 %v1752_v54, %v1748_v36  ;;  %v7383_v30 = vor.u32 %v9852_v26, %v7382_v25  ;;  %v1093_v36 = vperm.slane %v10541_v8, 2 }
 0x152   :  { %2421 = vmatmul.bf16.vlgmr.msra.gmra.mxu1 %v10553_v4  ;;  %v1688_v49 = vpop.f32.mrf.mxu3  ;;  %v1673_v59 = vadd.f32 %v1672_v15, %v1093_v36  ;;  %v7347_v15 = vor.u32 %v9843_v6, %v7346_v2  ;;  %v7602_v6 = vld [vmem:[#allocation6] sm:$0xf] }
 0x153   :  { %2517 = vmatpush.bf16.msra.mxu0 %v7239_v42  ;;  %2525 = vmatpush.bf16.msra.mxu1 %v7407_v61  ;;  %v9846_v42 = vld [vmem:[#allocation6 + $0x418] sm:$0xf0]  ;;  %v1674_v45 = vpop.f32.mrf.mxu2 }
 0x154   :  { %2504 = vmatpush.bf16.msrb.mxu3 %v7511_v27  ;;  %v1675_v7 = vadd.f32 %v1674_v45, %v1093_v36  ;;  %v1687_v14 = vadd.f32 %v1686_v23, %v1673_v59  ;;  %v7614_v23 = vld [vmem:[#allocation6 + $0x18] sm:$0xf]  ;;  %v7322_v36 = vld [vmem:[#allocation6 + $0x3c8] sm:$0xf]  ;;  %v9665_v45 = vld [vmem:[#allocation6 + $0x170] sm:$0xf0] }
 0x156   :  { %v1689_v25 = vadd.f32 %v1688_v49, %v1675_v7  ;;  %v9620_v7 = vld [vmem:[#allocation6 + $0x8] sm:$0xf0] }
 0x157   :  { %2518 = vmatpush.bf16.msra.mxu0 %v7227_v10  ;;  %2526 = vmatpush.bf16.msra.mxu1 %v7395_v16  ;;  %v7639_v10 = vor.u32 %v9629_v1, %v7638_v62  ;;  %v7626_v16 = vld [vmem:[#allocation6 + $0x30] sm:$0xf]  ;;  %v9879_v62 = vld [vmem:[#allocation6 + $0x520] sm:$0xf0] }
 0x158   :  { %v7627_v24 = vor.u32 %v9626_v18, %v7626_v16  ;;  %v7688_v16 = vld [vmem:[#allocation6 + $0xb4] sm:$0xf0] }
 0x15a   :  { %2519 = vmatmul.bf16.vlgmr.msra.gmra.mxu0 %v10548_v60  ;;  %v7359_v60 = vor.u32 %v9846_v42, %v7358_v41  ;;  %v7782_v42 = vld [vmem:[#allocation6 + $0x168] sm:$0xf] }
 0x15b   :  { %3079 = vmatpush.bf16.msrb.mxu0 %v7687_v11  ;;  %2527 = vmatpush.bf16.msra.mxu1 %v7383_v30  ;;  %v697_v11 = vadd.f32 %v10502_v43, %v181_v29  ;;  %v7335_v29 = vor.u32 %v9840_v22, %v7334_v19  ;;  %v9882_v43 = vld [vmem:[#allocation6 + $0x538] sm:$0xf0]  ;;  %v7783_v2 = vor.u32 %v9665_v45, %v7782_v42  ;;  %v853_v22 = vmax.f32 %v10500_v34, 0.0 }
 0x15d   :  { %v1742_v8 = vpop.f32.mrf.mxu3  ;;  %v711_v32 = vadd.f32 %v10504_v47, %v697_v11 }
 0x15f   :  { %3080 = vmatpush.bf16.msrb.mxu0 %v7675_v28  ;;  %2528 = vmatpush.bf16.msra.mxu1 %v7371_v37  ;;  %v9837_v37 = vld [vmem:[#allocation6 + $0x3d0] sm:$0xf0]  ;;  %v725_v59 = vadd.f32 %v10513_v51, %v711_v32  ;;  %v7598_v32 = vld [vmem:[#allocation6 + $0x5f0] sm:$0xf] }
 0x161   :  { %v1700_v54 = vpop.f32.mrf.mxu0 }
 0x162   :  { %2477 = vmatmul.bf16.vlgmr.msrb.gmra.mxu1 %v10553_v4  ;;  %v1701_v26 = vadd.f32 %v1700_v54, %v1687_v14  ;;  %v7503_v54 = vor.u32 %v9882_v43, %v7502_v17  ;;  %v9662_v14 = vld [vmem:[#allocation6 + $0x158] sm:$0xf0]  ;;  %v9637_v43 = vld [vmem:[#allocation6 + $0x94] sm:$0xf] }
 0x163   :  { %3081 = vmatpush.bf16.msrb.mxu0 %v7663_v35  ;;  %v1714_v61 = vpop.f32.mrf.mxu1  ;;  %2529 = vmatpush.bf16.msra.mxu1 %v7359_v60  ;;  %v9623_v35 = vld [vmem:[#allocation6 + $0x20] sm:$0xf0]  ;;  %v7490_v60 = vld [vmem:[#allocation6 + $0x518] sm:$0xf] }
 0x164   :  { %v1715_v28 = vadd.f32 %v1714_v61, %v1094_v9  ;;  %v1749_v39 = vmax.f32 %v1701_v26, 0.0  ;;  %v7323_v61 = vor.u32 %v9837_v37, %v7322_v36  ;;  %v7491_v51 = vor.u32 %v9879_v62, %v7490_v60  ;;  %v9634_v60 = vld [vmem:[#allocation6 + $0x7c] sm:$0xf]  ;;  %v7664_v62 = vld [vmem:[#allocation6 + $0x84] sm:$0xf0] }
 0x165   :  { %v1744_v26 = vpop.f32.mrf.mxu3 }
 0x167   :  { %3082 = vmatpush.bf16.msrb.mxu0 %v7651_v56  ;;  %2530 = vmatpush.bf16.msra.mxu1 %v7347_v15  ;;  %v7615_v56 = vor.u32 %v9623_v35, %v7614_v23  ;;  %v9640_v15 = vld [vmem:[#allocation6 + $0xac] sm:$0xf]  ;;  %v7676_v23 = vld [vmem:[#allocation6 + $0x9c] sm:$0xf0] }
 0x168   :  { %v7691_v17 = vor.u32 %v9640_v15, %v7688_v16  ;;  %v7679_v45 = vor.u32 %v9637_v43, %v7676_v23  ;;  %v7734_v15 = vld [vmem:[#allocation6 + $0x108] sm:$0xf]  ;;  %v9653_v16 = vld [vmem:[#allocation6 + $0x110] sm:$0xf0]  ;;  %v7430_v43 = vld [vmem:[#allocation6 + $0x4a0] sm:$0xf] }
 0x169   :  { %v1702_v30 = vpop.f32.mrf.mxu0  ;;  %v9864_v23 = vld [vmem:[#allocation6 + $0x4a8] sm:$0xf0] }
 0x16a   :  { %v1703_v33 = vadd.f32 %v1702_v30, %v1689_v25  ;;  %v857_v25 = vmax.f32 %v725_v59, 0.0 }
 0x16b   :  { %v1728_v27 = vpop.f32.mrf.mxu2  ;;  %3083 = vmatpush.bf16.msrb.mxu0 %v7639_v10  ;;  %v1716_v41 = vpop.f32.mrf.mxu1  ;;  %2531 = vmatpush.bf16.msra.mxu1 %v7335_v29  ;;  %v7770_v10 = vld [vmem:[#allocation6 + $0x150] sm:$0xf]  ;;  %v7758_v29 = vld [vmem:[#allocation6 + $0x138] sm:$0xf] }
 0x16c   :  { %v1753_v40 = vmax.f32 %v1703_v33, 0.0  ;;  %v1729_v49 = vadd.f32 %v1728_v27, %v1715_v28  ;;  %v1717_v1 = vadd.f32 %v1716_v41, %v1094_v9  ;;  %v7603_v9 = vor.u32 %v9620_v7, %v7602_v6  ;;  %v7478_v27 = vld [vmem:[#allocation6 + $0x500] sm:$0xf]  ;;  %v9876_v28 = vld [vmem:[#allocation6 + $0x508] sm:$0xf0] }
 0x16d   :  { %v9906_v33 = vld [vmem:[#allocation6 + $0x5f8] sm:$0xf0]  ;;  %v7479_v34 = vor.u32 %v9876_v28, %v7478_v27  ;;  %v10572_v59 = vpack.c.bf16 %v857_v25, %v853_v22  ;;  %v739_v22 = vadd.f32 %v10515_v58, %v182_v48  ;;  %v7735_v27 = vor.u32 %v9653_v16, %v7734_v15  ;;  %v7784_v16 = vld [vmem:[#allocation6 + $0x174] sm:$0xf0] }
 0x16e   :  { %v10565_v47 = vpack.c.bf16 %v1753_v40, %v1749_v39  ;;  %v1743_v18 = vadd.f32 %v1742_v8, %v1729_v49  ;;  %v9659_v8 = vld [vmem:[#allocation6 + $0x140] sm:$0xf0]  ;;  %v7599_v37 = vor.u32 %v9906_v33, %v7598_v32  ;;  %v7466_v39 = vld [vmem:[#allocation6 + $0x4e8] sm:$0xf]  ;;  %v9873_v40 = vld [vmem:[#allocation6 + $0x4f0] sm:$0xf0] }
 0x16f   :  { %3084 = vmatpush.bf16.msrb.mxu0 %v7627_v24  ;;  %2532 = vmatpush.bf16.msra.mxu1 %v7323_v61  ;;  %v7771_v24 = vor.u32 %v9662_v14, %v7770_v10  ;;  %v7759_v42 = vor.u32 %v9659_v8, %v7758_v29  ;;  %v7586_v49 = vld [vmem:[#allocation6 + $0x5d8] sm:$0xf]  ;;  %v9656_v61 = vld [vmem:[#allocation6 + $0x128] sm:$0xf0]  ;;  %v9870_v6 = vld [vmem:[#allocation6 + $0x4d8] sm:$0xf0]  ;;  %v7667_v10 = vor.u32 %v9634_v60, %v7664_v62 }
 0x170   :  { %2435 = vmatmul.bf16.vlgmr.msra.gmra.mxu2 %v10565_v47  ;;  %v1750_v35 = vmax.f32 %v1743_v18, 0.0  ;;  %v9900_v14 = vld [vmem:[#allocation6 + $0x5c8] sm:$0xf0]  ;;  %v9631_v18 = vld [vmem:[#allocation6 + $0x64] sm:$0xf]  ;;  %v753_v48 = vadd.f32 %v10522_v38, %v739_v22 }
 0x171   :  { %2539 = vmatpush.bf16.msra.mxu2 %v7503_v54  ;;  %v9903_v54 = vld [vmem:[#allocation6 + $0x5e0] sm:$0xf0]  ;;  %v9650_v32 = vld [vmem:[#allocation6 + $0xf8] sm:$0xf0]  ;;  %v9628_v33 = vld [vmem:[#allocation6 + $0x4c] sm:$0xf] }
 0x172   :  { %2533 = vmatmul.bf16.vlgmr.msra.gmra.mxu1 %v10553_v4  ;;  %v7467_v4 = vor.u32 %v9873_v40, %v7466_v39  ;;  %v7640_v29 = vld [vmem:[#allocation6 + $0x54] sm:$0xf0]  ;;  %v9647_v40 = vld [vmem:[#allocation6 + $0xe0] sm:$0xf0] }
 0x173   :  { %v1730_v11 = vpop.f32.mrf.mxu2  ;;  %3085 = vmatpush.bf16.msrb.mxu0 %v7615_v56  ;;  %3093 = vmatpush.bf16.msrb.mxu1 %v7783_v2  ;;  %v7746_v56 = vld [vmem:[#allocation6 + $0x120] sm:$0xf]  ;;  %v7454_v2 = vld [vmem:[#allocation6 + $0x4d0] sm:$0xf]  ;;  %v7710_v39 = vld [vmem:[#allocation6 + $0xd8] sm:$0xf] }
 0x174   :  { %v1731_v19 = vadd.f32 %v1730_v11, %v1717_v1  ;;  %v7587_v1 = vor.u32 %v9903_v54, %v7586_v49  ;;  %v7747_v7 = vor.u32 %v9656_v61, %v7746_v56  ;;  %v7574_v11 = vld [vmem:[#allocation6 + $0x5c0] sm:$0xf]  ;;  %v7431_v49 = vor.u32 %v9864_v23, %v7430_v43  ;;  %v7418_v54 = vld [vmem:[#allocation6 + $0x488] sm:$0xf]  ;;  %v9861_v61 = vld [vmem:[#allocation6 + $0x490] sm:$0xf0] }
 0x175   :  { %2540 = vmatpush.bf16.msra.mxu2 %v7491_v51  ;;  %v7455_v51 = vor.u32 %v9870_v6, %v7454_v2  ;;  %v7575_v25 = vor.u32 %v9900_v14, %v7574_v11  ;;  %v767_v56 = vadd.f32 %v10524_v44, %v753_v48  ;;  %v7538_v60 = vld [vmem:[#allocation6 + $0x578] sm:$0xf]  ;;  %v9891_v62 = vld [vmem:[#allocation6 + $0x580] sm:$0xf0]  ;;  %v7878_v2 = vld [vmem:[#allocation6 + $0x228] sm:$0xf]  ;;  %v7419_v15 = vor.u32 %v9861_v61, %v7418_v54 }
 0x176   :  { %v1745_v30 = vadd.f32 %v1744_v26, %v1731_v19  ;;  %v7652_v19 = vld [vmem:[#allocation6 + $0x6c] sm:$0xf0]  ;;  %v7442_v26 = vld [vmem:[#allocation6 + $0x4b8] sm:$0xf]  ;;  %v9689_v6 = vld [vmem:[#allocation6 + $0x230] sm:$0xf0] }
 0x177   :  { %3086 = vmatpush.bf16.msrb.mxu0 %v7603_v9  ;;  %3094 = vmatpush.bf16.msrb.mxu1 %v7771_v24  ;;  %v9867_v9 = vld [vmem:[#allocation6 + $0x4c0] sm:$0xf0]  ;;  %v7655_v28 = vor.u32 %v9631_v18, %v7652_v19  ;;  %v9897_v24 = vld [vmem:[#allocation6 + $0x5b0] sm:$0xf0]  ;;  %v9622_v11 = vld [vmem:[#allocation6 + $0x1c] sm:$0xf]  ;;  %v7879_v22 = vor.u32 %v9689_v6, %v7878_v2 }
 0x178   :  { %v1754_v36 = vmax.f32 %v1745_v30, 0.0  ;;  %v7562_v30 = vld [vmem:[#allocation6 + $0x5a8] sm:$0xf]  ;;  %v7443_v8 = vor.u32 %v9867_v9, %v7442_v26  ;;  %v9664_v44 = vld [vmem:[#allocation6 + $0x16c] sm:$0xf]  ;;  %v854_v18 = vmax.f32 %v10517_v63, 0.0 }
 0x179   :  { %2541 = vmatpush.bf16.msra.mxu2 %v7479_v34  ;;  %v7563_v58 = vor.u32 %v9897_v24, %v7562_v30  ;;  %v7550_v34 = vld [vmem:[#allocation6 + $0x590] sm:$0xf]  ;;  %v7616_v14 = vld [vmem:[#allocation6 + $0x24] sm:$0xf0]  ;;  %v858_v19 = vmax.f32 %v767_v56, 0.0  ;;  %v7787_v24 = vor.u32 %v9664_v44, %v7784_v16 }
 0x17a   :  { %v10570_v41 = vpack.c.bf16 %v1754_v36, %v1750_v35  ;;  %3087 = vmatmul.bf16.vlgmr.msrb.gmra.mxu0 %v10572_v59  ;;  %v7643_v36 = vor.u32 %v9628_v33, %v7640_v29  ;;  %v7619_v9 = vor.u32 %v9622_v11, %v7616_v14  ;;  %v9686_v30 = vld [vmem:[#allocation6 + $0x218] sm:$0xf0]  ;;  %v9661_v33 = vld [vmem:[#allocation6 + $0x154] sm:$0xf]  ;;  %v7772_v29 = vld [vmem:[#allocation6 + $0x15c] sm:$0xf0] }
 0x17b   :  { %3135 = vmatpush.bf16.msra.mxu0 %v7691_v17  ;;  %3095 = vmatpush.bf16.msrb.mxu1 %v7759_v42  ;;  %v7722_v17 = vld [vmem:[#allocation6 + $0xf0] sm:$0xf]  ;;  %v9625_v42 = vld [vmem:[#allocation6 + $0x34] sm:$0xf]  ;;  %v9642_v63 = vld [vmem:[#allocation6 + $0xb8] sm:$0xf0] }
 0x17c   :  { %2449 = vmatmul.bf16.vlgmr.msra.gmra.mxu3 %v10570_v41  ;;  %v7723_v35 = vor.u32 %v9650_v32, %v7722_v17  ;;  %v9619_v17 = vld [vmem:[#allocation6 + $0x4] sm:$0xf]  ;;  %v7604_v32 = vld [vmem:[#allocation6 + $0xc] sm:$0xf0]  ;;  %v7760_v54 = vld [vmem:[#allocation6 + $0x144] sm:$0xf0] }
 0x17d   :  { %2553 = vmatpush.bf16.msra.mxu3 %v7599_v37  ;;  %2542 = vmatpush.bf16.msra.mxu2 %v7467_v4  ;;  %v9894_v37 = vld [vmem:[#allocation6 + $0x598] sm:$0xf0]  ;;  %v7711_v4 = vor.u32 %v9647_v40, %v7710_v39  ;;  %v7607_v23 = vor.u32 %v9619_v17, %v7604_v32  ;;  %v7775_v39 = vor.u32 %v9661_v33, %v7772_v29  ;;  %v7682_v56 = vld [vmem:[#allocation6 + $0x98] sm:$0xf]  ;;  %v7962_v6 = vld [vmem:[#allocation6 + $0x2d0] sm:$0xf] }
 0x17e   :  { %v7551_v38 = vor.u32 %v9894_v37, %v7550_v34  ;;  %v9683_v34 = vld [vmem:[#allocation6 + $0x200] sm:$0xf0]  ;;  %v10584_v37 = vpack.c.bf16 %v858_v19, %v854_v18  ;;  %v7748_v11 = vld [vmem:[#allocation6 + $0x12c] sm:$0xf0]  ;;  %v7670_v14 = vld [vmem:[#allocation6 + $0x80] sm:$0xf] }
 0x17f   :  { %3136 = vmatpush.bf16.msra.mxu0 %v7679_v45  ;;  %3096 = vmatpush.bf16.msrb.mxu1 %v7747_v7  ;;  %v7628_v45 = vld [vmem:[#allocation6 + $0x3c] sm:$0xf0]  ;;  %v7830_v18 = vld [vmem:[#allocation6 + $0x1c8] sm:$0xf]  ;;  %v9677_v19 = vld [vmem:[#allocation6 + $0x1d0] sm:$0xf0] }
 0x180   :  { %2491 = vmatmul.bf16.vlgmr.msrb.gmra.mxu2 %v10565_v47  ;;  %v7698_v7 = vld [vmem:[#allocation6 + $0xc0] sm:$0xf]  ;;  %v7831_v17 = vor.u32 %v9677_v19, %v7830_v18  ;;  %v7818_v33 = vld [vmem:[#allocation6 + $0x1b0] sm:$0xf]  ;;  %v9674_v29 = vld [vmem:[#allocation6 + $0x1b8] sm:$0xf0] }
 0x181   :  { %2554 = vmatpush.bf16.msra.mxu3 %v7587_v1  ;;  %2543 = vmatpush.bf16.msra.mxu2 %v7455_v51  ;;  %v7631_v1 = vor.u32 %v9625_v42, %v7628_v45  ;;  %v7539_v51 = vor.u32 %v9891_v62, %v7538_v60  ;;  %v7974_v42 = vld [vmem:[#allocation6 + $0x2e8] sm:$0xf]  ;;  %v9713_v45 = vld [vmem:[#allocation6 + $0x2f0] sm:$0xf0]  ;;  %v7790_v18 = vld [vmem:[#allocation6 + $0x170] sm:$0xf] }
 0x182   :  { %v7975_v62 = vor.u32 %v9713_v45, %v7974_v42  ;;  %v7926_v45 = vld [vmem:[#allocation6 + $0x288] sm:$0xf]  ;;  %v9666_v19 = vld [vmem:[#allocation6 + $0x178] sm:$0xf0] }
 0x183   :  { %3137 = vmatpush.bf16.msra.mxu0 %v7667_v10  ;;  %3097 = vmatpush.bf16.msrb.mxu1 %v7735_v27  ;;  %v9644_v10 = vld [vmem:[#allocation6 + $0xc8] sm:$0xf0] }
 0x184   :  { %v7699_v26 = vor.u32 %v9644_v10, %v7698_v7  ;;  %v9888_v27 = vld [vmem:[#allocation6 + $0x568] sm:$0xf0]  ;;  %v9710_v7 = vld [vmem:[#allocation6 + $0x2d8] sm:$0xf0]  ;;  %v9655_v10 = vld [vmem:[#allocation6 + $0x124] sm:$0xf] }
 0x185   :  { %2555 = vmatpush.bf16.msra.mxu3 %v7575_v25  ;;  %2544 = vmatpush.bf16.msra.mxu2 %v7443_v8  ;;  %v7526_v25 = vld [vmem:[#allocation6 + $0x560] sm:$0xf]  ;;  %v7694_v8 = vld [vmem:[#allocation6 + $0xb0] sm:$0xf]  ;;  %v7963_v16 = vor.u32 %v9710_v7, %v7962_v6 }
 0x186   :  { %v7527_v48 = vor.u32 %v9888_v27, %v7526_v25  ;;  %v7695_v40 = vor.u32 %v9642_v63, %v7694_v8  ;;  %v7950_v25 = vld [vmem:[#allocation6 + $0x2b8] sm:$0xf] }
 0x187   :  { %3138 = vmatpush.bf16.msra.mxu0 %v7655_v28  ;;  %3098 = vmatpush.bf16.msrb.mxu1 %v7723_v35  ;;  %v7866_v28 = vld [vmem:[#allocation6 + $0x210] sm:$0xf]  ;;  %v9885_v35 = vld [vmem:[#allocation6 + $0x550] sm:$0xf0]  ;;  %v7736_v27 = vld [vmem:[#allocation6 + $0x114] sm:$0xf0] }
 0x188   :  { %v7867_v43 = vor.u32 %v9686_v30, %v7866_v28  ;;  %v7658_v28 = vld [vmem:[#allocation6 + $0x68] sm:$0xf]  ;;  %v9633_v30 = vld [vmem:[#allocation6 + $0x70] sm:$0xf0] }
 0x189   :  { %2556 = vmatpush.bf16.msra.mxu3 %v7563_v58  ;;  %2545 = vmatpush.bf16.msra.mxu2 %v7431_v49  ;;  %v7514_v58 = vld [vmem:[#allocation6 + $0x548] sm:$0xf]  ;;  %v9658_v49 = vld [vmem:[#allocation6 + $0x13c] sm:$0xf]  ;;  %v7659_v63 = vor.u32 %v9633_v30, %v7658_v28  ;;  %v7791_v30 = vor.u32 %v9666_v19, %v7790_v18  ;;  %v9937_v18 = vld [vmem:[#allocation2 + $0x3dc] sm:$0xf0] }
 0x18a   :  { %v7515_v61 = vor.u32 %v9885_v35, %v7514_v58  ;;  %v9704_v58 = vld [vmem:[#allocation6 + $0x2a8] sm:$0xf0]  ;;  %v9630_v35 = vld [vmem:[#allocation6 + $0x58] sm:$0xf0] }
 0x18b   :  { %3139 = vmatpush.bf16.msra.mxu0 %v7643_v36  ;;  %3099 = vmatpush.bf16.msrb.mxu1 %v7711_v4  ;;  %v7854_v36 = vld [vmem:[#allocation6 + $0x1f8] sm:$0xf]  ;;  %v7842_v4 = vld [vmem:[#allocation6 + $0x1e0] sm:$0xf] }
 0x18c   :  { %2505 = vmatmul.bf16.vlgmr.msrb.gmra.mxu3 %v10570_v41  ;;  %v7855_v60 = vor.u32 %v9683_v34, %v7854_v36  ;;  %v7806_v34 = vld [vmem:[#allocation6 + $0x198] sm:$0xf] }
 0x18d   :  { %2557 = vmatpush.bf16.msra.mxu3 %v7551_v38  ;;  %2546 = vmatpush.bf16.msra.mxu2 %v7419_v15  ;;  %v9639_v38 = vld [vmem:[#allocation6 + $0xa0] sm:$0xf0]  ;;  %v9636_v15 = vld [vmem:[#allocation6 + $0x88] sm:$0xf0] }
 0x18e   :  { %v7683_v2 = vor.u32 %v9639_v38, %v7682_v56  ;;  %v7712_v56 = vld [vmem:[#allocation6 + $0xe4] sm:$0xf0]  ;;  %v7634_v38 = vld [vmem:[#allocation6 + $0x38] sm:$0xf] }
 0x18f   :  { %3140 = vmatpush.bf16.msra.mxu0 %v7631_v1  ;;  %3100 = vmatpush.bf16.msrb.mxu1 %v7699_v26  ;;  %v9680_v1 = vld [vmem:[#allocation6 + $0x1e8] sm:$0xf0]  ;;  %v9707_v26 = vld [vmem:[#allocation6 + $0x2c0] sm:$0xf0] }
 0x190   :  { %2547 = vmatmul.bf16.vlgmr.msra.gmra.mxu2 %v10565_v47  ;;  %v7763_v47 = vor.u32 %v9658_v49, %v7760_v54  ;;  %v7843_v44 = vor.u32 %v9680_v1, %v7842_v4  ;;  %v7951_v32 = vor.u32 %v9707_v26, %v7950_v25  ;;  %v9701_v49 = vld [vmem:[#allocation6 + $0x290] sm:$0xf0]  ;;  %v9646_v54 = vld [vmem:[#allocation6 + $0xdc] sm:$0xf]  ;;  %v7794_v4 = vld [vmem:[#allocation6 + $0x180] sm:$0xf] }
 0x191   :  { %2558 = vmatpush.bf16.msra.mxu3 %v7539_v51  ;;  %3107 = vmatpush.bf16.msrb.mxu2 %v7879_v22  ;;  %v7751_v51 = vor.u32 %v9655_v10, %v7748_v11  ;;  %v7671_v22 = vor.u32 %v9636_v15, %v7670_v14  ;;  %v9668_v1 = vld [vmem:[#allocation6 + $0x188] sm:$0xf0]  ;;  %v7715_v6 = vor.u32 %v9646_v54, %v7712_v56  ;;  %v9698_v10 = vld [vmem:[#allocation6 + $0x278] sm:$0xf0]  ;;  %v7880_v14 = vld [vmem:[#allocation6 + $0x234] sm:$0xf0] }
 0x192   :  { %3101 = vmatmul.bf16.vlgmr.msrb.gmra.mxu1 %v10584_v37  ;;  %v9688_v11 = vld [vmem:[#allocation6 + $0x22c] sm:$0xf]  ;;  %v9643_v15 = vld [vmem:[#allocation6 + $0xc4] sm:$0xf]  ;;  %v7795_v21 = vor.u32 %v9668_v1, %v7794_v4 }
 0x193   :  { %3141 = vmatpush.bf16.msra.mxu0 %v7619_v9  ;;  %3149 = vmatpush.bf16.msra.mxu1 %v7787_v24  ;;  %v9652_v9 = vld [vmem:[#allocation6 + $0x10c] sm:$0xf]  ;;  %v781_v24 = vadd.f32 %v10526_v46, %v183_v0  ;;  %v7819_v0 = vor.u32 %v9674_v29, %v7818_v33  ;;  %v7883_v25 = vor.u32 %v9688_v11, %v7880_v14  ;;  %v9621_v33 = vld [vmem:[#allocation6 + $0x10] sm:$0xf0]  ;;  %v9663_v29 = vld [vmem:[#allocation6 + $0x160] sm:$0xf0] }
 0x194   :  { %v7739_v8 = vor.u32 %v9652_v9, %v7736_v27  ;;  %v7902_v9 = vld [vmem:[#allocation6 + $0x258] sm:$0xf]  ;;  %v9695_v27 = vld [vmem:[#allocation6 + $0x260] sm:$0xf0]  ;;  %v7742_v11 = vld [vmem:[#allocation6 + $0x110] sm:$0xf] }
 0x195   :  { %2559 = vmatpush.bf16.msra.mxu3 %v7527_v48  ;;  %3108 = vmatpush.bf16.msrb.mxu2 %v7867_v43  ;;  %v7938_v48 = vld [vmem:[#allocation6 + $0x2a0] sm:$0xf]  ;;  %v795_v36 = vadd.f32 %v10531_v53, %v781_v24  ;;  %v9685_v24 = vld [vmem:[#allocation6 + $0x214] sm:$0xf]  ;;  %v9679_v54 = vld [vmem:[#allocation6 + $0x1e4] sm:$0xf] }
 0x196   :  { %v7724_v43 = vld [vmem:[#allocation6 + $0xfc] sm:$0xf0]  ;;  %v7939_v46 = vor.u32 %v9704_v58, %v7938_v48  ;;  %v9654_v14 = vld [vmem:[#allocation6 + $0x118] sm:$0xf0] }
 0x197   :  { %3142 = vmatpush.bf16.msra.mxu0 %v7607_v23  ;;  %3150 = vmatpush.bf16.msra.mxu1 %v7775_v39  ;;  %v7646_v23 = vld [vmem:[#allocation6 + $0x50] sm:$0xf]  ;;  %v9671_v39 = vld [vmem:[#allocation6 + $0x1a0] sm:$0xf0]  ;;  %v7890_v58 = vld [vmem:[#allocation6 + $0x240] sm:$0xf]  ;;  %v7743_v19 = vor.u32 %v9654_v14, %v7742_v11 }
 0x198   :  { %v7647_v42 = vor.u32 %v9630_v35, %v7646_v23  ;;  %v7807_v53 = vor.u32 %v9671_v39, %v7806_v34  ;;  %v7766_v34 = vld [vmem:[#allocation6 + $0x140] sm:$0xf]  ;;  %v9660_v39 = vld [vmem:[#allocation6 + $0x148] sm:$0xf0]  ;;  %v9921_v14 = vld [vmem:[#allocation2 + $0x1dc] sm:$0xf0] }
 0x199   :  { %2560 = vmatpush.bf16.msra.mxu3 %v7515_v61  ;;  %3109 = vmatpush.bf16.msrb.mxu2 %v7855_v60  ;;  %v9627_v61 = vld [vmem:[#allocation6 + $0x40] sm:$0xf0]  ;;  %v809_v60 = vadd.f32 %v10539_v3, %v795_v36  ;;  %v7700_v3 = vld [vmem:[#allocation6 + $0xcc] sm:$0xf0]  ;;  %v7856_v36 = vld [vmem:[#allocation6 + $0x204] sm:$0xf0]  ;;  %v7767_v56 = vor.u32 %v9660_v39, %v7766_v34 }
 0x19a   :  { %3143 = vmatmul.bf16.vlgmr.msra.gmra.mxu0 %v10572_v59  ;;  %v7635_v7 = vor.u32 %v9627_v61, %v7634_v38  ;;  %v7703_v26 = vor.u32 %v9643_v15, %v7700_v3  ;;  %v7844_v38 = vld [vmem:[#allocation6 + $0x1ec] sm:$0xf0]  ;;  %v9709_v61 = vld [vmem:[#allocation6 + $0x2d4] sm:$0xf]  ;;  %v9690_v34 = vld [vmem:[#allocation6 + $0x238] sm:$0xf0] }
 0x19b   :  { %3191 = vmatpush.bf16.msrb.mxu0 %v7695_v40  ;;  %3151 = vmatpush.bf16.msra.mxu1 %v7763_v47  ;;  %v7914_v47 = vld [vmem:[#allocation6 + $0x270] sm:$0xf]  ;;  %v7847_v1 = vor.u32 %v9679_v54, %v7844_v38  ;;  %v7706_v39 = vld [vmem:[#allocation6 + $0xc8] sm:$0xf] }
 0x19c   :  { %2561 = vmatmul.bf16.vlgmr.msra.gmra.mxu3 %v10570_v41  ;;  %v9649_v41 = vld [vmem:[#allocation6 + $0xf4] sm:$0xf]  ;;  %v8098_v15 = vld [vmem:[#allocation2 + $0x3a0] sm:$0xf] }
 0x19d   :  { %3121 = vmatpush.bf16.msrb.mxu3 %v7975_v62  ;;  %3110 = vmatpush.bf16.msrb.mxu2 %v7843_v44  ;;  %v7727_v40 = vor.u32 %v9649_v41, %v7724_v43  ;;  %v7927_v62 = vor.u32 %v9701_v49, %v7926_v45  ;;  %v7622_v44 = vld [vmem:[#allocation6 + $0x20] sm:$0xf]  ;;  %v9692_v41 = vld [vmem:[#allocation6 + $0x248] sm:$0xf0]  ;;  %v9682_v43 = vld [vmem:[#allocation6 + $0x1fc] sm:$0xf] }
 0x19e   :  { %v7859_v45 = vor.u32 %v9682_v43, %v7856_v36  ;;  %v9929_v43 = vld [vmem:[#allocation2 + $0x2dc] sm:$0xf0]  ;;  %v7916_v36 = vld [vmem:[#allocation6 + $0x27c] sm:$0xf0] }
 0x19f   :  { %3192 = vmatpush.bf16.msrb.mxu0 %v7683_v2  ;;  %3152 = vmatpush.bf16.msra.mxu1 %v7751_v51  ;;  %v823_v2 = vadd.f32 %v10537_v55, %v184_v50  ;;  %v855_v51 = vmax.f32 %v10529_v52, 0.0  ;;  %v859_v50 = vmax.f32 %v809_v60, 0.0  ;;  %v7778_v52 = vld [vmem:[#allocation6 + $0x158] sm:$0xf]  ;;  %v7964_v60 = vld [vmem:[#allocation6 + $0x2dc] sm:$0xf0] }
 0x1a0   :  { %v7779_v35 = vor.u32 %v9663_v29, %v7778_v52  ;;  %v7718_v52 = vld [vmem:[#allocation6 + $0xe0] sm:$0xf]  ;;  %v9648_v29 = vld [vmem:[#allocation6 + $0xe8] sm:$0xf0]  ;;  %v9925_v38 = vld [vmem:[#allocation2 + $0x25c] sm:$0xf0] }
 0x1a1   :  { %3122 = vmatpush.bf16.msrb.mxu3 %v7963_v16  ;;  %3111 = vmatpush.bf16.msrb.mxu2 %v7831_v17  ;;  %v9624_v16 = vld [vmem:[#allocation6 + $0x28] sm:$0xf0]  ;;  %v837_v55 = vadd.f32 %v10543_v13, %v823_v2  ;;  %v7868_v17 = vld [vmem:[#allocation6 + $0x21c] sm:$0xf0] }
 0x1a2   :  { %v7623_v28 = vor.u32 %v9624_v16, %v7622_v44  ;;  %v7871_v48 = vor.u32 %v9685_v24, %v7868_v17  ;;  %v9673_v16 = vld [vmem:[#allocation6 + $0x1b4] sm:$0xf]  ;;  %v7808_v24 = vld [vmem:[#allocation6 + $0x1a4] sm:$0xf0]  ;;  %v9700_v17 = vld [vmem:[#allocation6 + $0x28c] sm:$0xf] }
 0x1a3   :  { %3193 = vmatpush.bf16.msrb.mxu0 %v7671_v22  ;;  %3153 = vmatpush.bf16.msra.mxu1 %v7739_v8  ;;  %v7915_v22 = vor.u32 %v9698_v10, %v7914_v47  ;;  %v7903_v8 = vor.u32 %v9695_v27, %v7902_v9  ;;  %v851_v13 = vadd.f32 %v10546_v31, %v837_v55  ;;  %v9676_v47 = vld [vmem:[#allocation6 + $0x1cc] sm:$0xf]  ;;  %v7952_v10 = vld [vmem:[#allocation6 + $0x2c4] sm:$0xf0]  ;;  %v9651_v55 = vld [vmem:[#allocation6 + $0x100] sm:$0xf0] }
 0x1a4   :  { %v7891_v31 = vor.u32 %v9692_v41, %v7890_v58  ;;  %v9670_v9 = vld [vmem:[#allocation6 + $0x19c] sm:$0xf]  ;;  %v8082_v27 = vld [vmem:[#allocation2 + $0x320] sm:$0xf]  ;;  %v9667_v58 = vld [vmem:[#allocation6 + $0x184] sm:$0xf] }
 0x1a5   :  { %3123 = vmatpush.bf16.msrb.mxu3 %v7951_v32  ;;  %3112 = vmatpush.bf16.msrb.mxu2 %v7819_v0  ;;  %v7610_v32 = vld [vmem:[#allocation6 + $0x8] sm:$0xf]  ;;  %v9712_v0 = vld [vmem:[#allocation6 + $0x2ec] sm:$0xf]  ;;  %v7796_v41 = vld [vmem:[#allocation6 + $0x18c] sm:$0xf0] }
 0x1a6   :  { %v7611_v23 = vor.u32 %v9621_v33, %v7610_v32  ;;  %v7928_v32 = vld [vmem:[#allocation6 + $0x294] sm:$0xf0] }
 0x1a7   :  { %3194 = vmatpush.bf16.msrb.mxu0 %v7659_v63  ;;  %3154 = vmatpush.bf16.msra.mxu1 %v7727_v40  ;;  %v10600_v63 = vpack.c.bf16 %v859_v50, %v855_v51  ;;  %v856_v40 = vmax.f32 %v10535_v12, 0.0  ;;  %v7967_v12 = vor.u32 %v9709_v61, %v7964_v60  ;;  %v7820_v51 = vld [vmem:[#allocation6 + $0x1bc] sm:$0xf0]  ;;  %v7730_v50 = vld [vmem:[#allocation6 + $0xf8] sm:$0xf] }
 0x1a9   :  { %3124 = vmatpush.bf16.msrb.mxu3 %v7939_v46  ;;  %3113 = vmatpush.bf16.msrb.mxu2 %v7807_v53  ;;  %v7976_v46 = vld [vmem:[#allocation6 + $0x2f4] sm:$0xf0]  ;;  %v7754_v53 = vld [vmem:[#allocation6 + $0x128] sm:$0xf] }
 0x1aa   :  { %v7979_v49 = vor.u32 %v9712_v0, %v7976_v46  ;;  %v7886_v0 = vld [vmem:[#allocation6 + $0x230] sm:$0xf] }
 0x1ab   :  { %3195 = vmatpush.bf16.msrb.mxu0 %v7647_v42  ;;  %3155 = vmatpush.bf16.msra.mxu1 %v7715_v6  ;;  %v860_v42 = vmax.f32 %v851_v13, 0.0  ;;  %v7832_v6 = vld [vmem:[#allocation6 + $0x1d4] sm:$0xf0]  ;;  %v7811_v13 = vor.u32 %v9670_v9, %v7808_v24  ;;  %v7887_v61 = vor.u32 %v9690_v34, %v7886_v0  ;;  %v9708_v0 = vld [vmem:[#allocation6 + $0x2c8] sm:$0xf0] }
 0x1ac   :  { %v7835_v3 = vor.u32 %v9676_v47, %v7832_v6  ;;  %v9687_v47 = vld [vmem:[#allocation6 + $0x220] sm:$0xf0]  ;;  %v8210_v6 = vld [vmem:[#allocation2 + $0x720] sm:$0xf] }
 0x1ad   :  { %3125 = vmatpush.bf16.msrb.mxu3 %v7927_v62  ;;  %3114 = vmatpush.bf16.msrb.mxu2 %v7795_v21  ;;  %v9657_v62 = vld [vmem:[#allocation6 + $0x130] sm:$0xf0]  ;;  %v10606_v4 = vpack.c.bf16 %v860_v42, %v856_v40  ;;  %v7940_v21 = vld [vmem:[#allocation6 + $0x2ac] sm:$0xf0] }
 0x1ae   :  { %v7755_v2 = vor.u32 %v9657_v62, %v7754_v53  ;;  %v8226_v40 = vld [vmem:[#allocation2 + $0x7a0] sm:$0xf]  ;;  %v9694_v53 = vld [vmem:[#allocation6 + $0x25c] sm:$0xf]  ;;  %v7904_v62 = vld [vmem:[#allocation6 + $0x264] sm:$0xf0] }
 0x1af   :  { %3196 = vmatpush.bf16.msrb.mxu0 %v7635_v7  ;;  %3156 = vmatpush.bf16.msra.mxu1 %v7703_v26  ;;  %v9706_v7 = vld [vmem:[#allocation6 + $0x2bc] sm:$0xf]  ;;  %v9969_v42 = vld [vmem:[#allocation2 + $0x7dc] sm:$0xf0]  ;;  %v7907_v11 = vor.u32 %v9694_v53, %v7904_v62  ;;  %v9675_v53 = vld [vmem:[#allocation6 + $0x1c0] sm:$0xf0] }
 0x1b0   :  { %3115 = vmatmul.bf16.vlgmr.msrb.gmra.mxu2 %v10600_v63  ;;  %v7955_v44 = vor.u32 %v9706_v7, %v7952_v10  ;;  %v9965_v7 = vld [vmem:[#allocation2 + $0x75c] sm:$0xf0]  ;;  %v7946_v62 = vld [vmem:[#allocation6 + $0x2a8] sm:$0xf] }
 0x1b1   :  { %3126 = vmatpush.bf16.msrb.mxu3 %v7915_v22  ;;  %3163 = vmatpush.bf16.msra.mxu2 %v7883_v25  ;;  %v8099_v22 = vor.u32 %v9937_v18, %v8098_v15  ;;  %v7823_v25 = vor.u32 %v9673_v16, %v7820_v51  ;;  %v8034_v10 = vld [vmem:[#allocation2 + $0x1a0] sm:$0xf]  ;;  %v7862_v16 = vld [vmem:[#allocation6 + $0x200] sm:$0xf] }
 0x1b2   :  { %3157 = vmatmul.bf16.vlgmr.msra.gmra.mxu1 %v10584_v37  ;;  %v8035_v18 = vor.u32 %v9921_v14, %v8034_v10  ;;  %v7982_v51 = vld [vmem:[#allocation6 + $0x2f0] sm:$0xf]  ;;  %v7814_v14 = vld [vmem:[#allocation6 + $0x1a0] sm:$0xf] }
 0x1b3   :  { %3197 = vmatpush.bf16.msrb.mxu0 %v7623_v28  ;;  %3205 = vmatpush.bf16.msrb.mxu1 %v7791_v30  ;;  %v9933_v28 = vld [vmem:[#allocation2 + $0x35c] sm:$0xf0]  ;;  %v7731_v30 = vor.u32 %v9651_v55, %v7730_v50 }
 0x1b4   :  { %v8083_v33 = vor.u32 %v9933_v28, %v8082_v27  ;;  %v9961_v50 = vld [vmem:[#allocation2 + $0x6dc] sm:$0xf0]  ;;  %v7850_v28 = vld [vmem:[#allocation6 + $0x1e8] sm:$0xf] }
 0x1b5   :  { %3127 = vmatpush.bf16.msrb.mxu3 %v7903_v8  ;;  %3164 = vmatpush.bf16.msra.mxu2 %v7871_v48  ;;  %v8066_v8 = vld [vmem:[#allocation2 + $0x2a0] sm:$0xf]  ;;  %v7931_v48 = vor.u32 %v9700_v17, %v7928_v32  ;;  %v7970_v32 = vld [vmem:[#allocation6 + $0x2d8] sm:$0xf] }
 0x1b6   :  { %v8067_v46 = vor.u32 %v9929_v43, %v8066_v8  ;;  %v8018_v55 = vld [vmem:[#allocation2 + $0x120] sm:$0xf] }
 0x1b7   :  { %3198 = vmatpush.bf16.msrb.mxu0 %v7611_v23  ;;  %3206 = vmatpush.bf16.msrb.mxu1 %v7779_v35  ;;  %v7719_v23 = vor.u32 %v9648_v29, %v7718_v52  ;;  %v9697_v35 = vld [vmem:[#allocation6 + $0x274] sm:$0xf]  ;;  %v8178_v29 = vld [vmem:[#allocation2 + $0x620] sm:$0xf] }
 0x1b8   :  { %v7919_v54 = vor.u32 %v9697_v35, %v7916_v36  ;;  %v9957_v8 = vld [vmem:[#allocation2 + $0x65c] sm:$0xf0]  ;;  %v7958_v36 = vld [vmem:[#allocation6 + $0x2c0] sm:$0xf] }
 0x1b9   :  { %3128 = vmatpush.bf16.msrb.mxu3 %v7891_v31  ;;  %3165 = vmatpush.bf16.msra.mxu2 %v7859_v45  ;;  %v9645_v31 = vld [vmem:[#allocation6 + $0xd0] sm:$0xf0]  ;;  %v10610_v45 = vpop.f32.mrf.mxu0  ;;  %v7838_v43 = vld [vmem:[#allocation6 + $0x1d0] sm:$0xf] }
 0x1ba   :  { %3199 = vmatmul.bf16.vlgmr.msrb.gmra.mxu0 %v10572_v59  ;;  %v9703_v59 = vld [vmem:[#allocation6 + $0x2a4] sm:$0xf]  ;;  %v7707_v60 = vor.u32 %v9645_v31, %v7706_v39  ;;  %v8162_v34 = vld [vmem:[#allocation2 + $0x5a0] sm:$0xf] }
 0x1bb   :  { %3207 = vmatpush.bf16.msrb.mxu1 %v7767_v56  ;;  %3833 = vmatpush.bf16.msra.mxu0 %v8099_v22  ;;  %v7943_v26 = vor.u32 %v9703_v59, %v7940_v21  ;;  %v8050_v56 = vld [vmem:[#allocation2 + $0x220] sm:$0xf]  ;;  %v9714_v59 = vld [vmem:[#allocation6 + $0x2f8] sm:$0xf0]  ;;  %v8211_v21 = vor.u32 %v9965_v7, %v8210_v6  ;;  %v9963_v7 = vld [vmem:[#allocation2 + $0x724] sm:$0xf] }
 0x1bc   :  { %3129 = vmatmul.bf16.vlgmr.msrb.gmra.mxu3 %v10606_v4  ;;  %v8194_v22 = vld [vmem:[#allocation2 + $0x6a0] sm:$0xf]  ;;  %v7983_v27 = vor.u32 %v9714_v59, %v7982_v51 }
 0x1bd   :  { %3177 = vmatpush.bf16.msra.mxu3 %v7979_v49  ;;  %3166 = vmatpush.bf16.msra.mxu2 %v7847_v1  ;;  %v7799_v49 = vor.u32 %v9667_v58, %v7796_v41  ;;  %v8051_v1 = vor.u32 %v9925_v38, %v8050_v56  ;;  %v8195_v52 = vor.u32 %v9961_v50, %v8194_v22  ;;  %v9953_v31 = vld [vmem:[#allocation2 + $0x5dc] sm:$0xf0]  ;;  %v7826_v38 = vld [vmem:[#allocation6 + $0x1b8] sm:$0xf]  ;;  %v7802_v22 = vld [vmem:[#allocation6 + $0x188] sm:$0xf] }
 0x1be   :  { %v7959_v56 = vor.u32 %v9708_v0, %v7958_v36  ;;  %v7827_v10 = vor.u32 %v9675_v53, %v7826_v38  ;;  %v8130_v59 = vld [vmem:[#allocation2 + $0x4a0] sm:$0xf]  ;;  %v7910_v36 = vld [vmem:[#allocation6 + $0x260] sm:$0xf]  ;;  %v9696_v0 = vld [vmem:[#allocation6 + $0x268] sm:$0xf0] }
 0x1bf   :  { %3208 = vmatpush.bf16.msrb.mxu1 %v7755_v2  ;;  %3834 = vmatpush.bf16.msra.mxu0 %v8083_v33  ;;  %v8227_v2 = vor.u32 %v9969_v42, %v8226_v40  ;;  %v9711_v33 = vld [vmem:[#allocation6 + $0x2e0] sm:$0xf0]  ;;  %v7986_v40 = vld [vmem:[#allocation2 + $0x20] sm:$0xf]  ;;  %v9951_v38 = vld [vmem:[#allocation2 + $0x5a4] sm:$0xf] }
 0x1c0   :  { %v7971_v41 = vor.u32 %v9711_v33, %v7970_v32  ;;  %v9909_v42 = vld [vmem:[#allocation2 + $0x5c] sm:$0xf0]  ;;  %v8164_v53 = vld [vmem:[#allocation2 + $0x5e0] sm:$0xf0] }
 0x1c1   :  { %3178 = vmatpush.bf16.msra.mxu3 %v7967_v12  ;;  %3167 = vmatpush.bf16.msra.mxu2 %v7835_v3  ;;  %v7874_v12 = vld [vmem:[#allocation6 + $0x218] sm:$0xf]  ;;  %v9691_v3 = vld [vmem:[#allocation6 + $0x244] sm:$0xf]  ;;  %v10614_v17 = vpop.f32.mrf.mxu0  ;;  %v10001_v33 = vld [vmem:[#allocation2 + $0xbdc] sm:$0xf0] }
 0x1c2   :  { %v7875_v15 = vor.u32 %v9687_v47, %v7874_v12  ;;  %v8163_v12 = vor.u32 %v9953_v31, %v8162_v34 }
 0x1c3   :  { %3209 = vmatpush.bf16.msrb.mxu1 %v7743_v19  ;;  %3835 = vmatpush.bf16.msra.mxu0 %v8067_v46  ;;  %v9684_v19 = vld [vmem:[#allocation6 + $0x208] sm:$0xf0]  ;;  %v8179_v46 = vor.u32 %v9957_v8, %v8178_v29  ;;  %v9941_v29 = vld [vmem:[#allocation2 + $0x45c] sm:$0xf0]  ;;  %v9999_v8 = vld [vmem:[#allocation2 + $0xba4] sm:$0xf] }
 0x1c4   :  { %v7863_v9 = vor.u32 %v9684_v19, %v7862_v16  ;;  %v7934_v16 = vld [vmem:[#allocation6 + $0x290] sm:$0xf] }
 0x1c5   :  { %3179 = vmatpush.bf16.msra.mxu3 %v7955_v44  ;;  %3168 = vmatpush.bf16.msra.mxu2 %v7823_v25  ;;  %v7892_v44 = vld [vmem:[#allocation6 + $0x24c] sm:$0xf0] }
 0x1c6   :  { %v7895_v25 = vor.u32 %v9691_v3, %v7892_v44  ;;  %v9672_v44 = vld [vmem:[#allocation6 + $0x1a8] sm:$0xf0] }
 0x1c7   :  { %3210 = vmatpush.bf16.msrb.mxu1 %v7731_v30  ;;  %3836 = vmatpush.bf16.msra.mxu0 %v8051_v1  ;;  %v9681_v30 = vld [vmem:[#allocation6 + $0x1f0] sm:$0xf0]  ;;  %v7815_v50 = vor.u32 %v9672_v44, %v7814_v14 }
 0x1c8   :  { %v7851_v58 = vor.u32 %v9681_v30, %v7850_v28  ;;  %v9705_v1 = vld [vmem:[#allocation6 + $0x2b0] sm:$0xf0]  ;;  %v9699_v28 = vld [vmem:[#allocation6 + $0x280] sm:$0xf0]  ;;  %v8354_v30 = vld [vmem:[#allocation2 + $0xba0] sm:$0xf] }
 0x1c9   :  { %3180 = vmatpush.bf16.msra.mxu3 %v7943_v26  ;;  %3169 = vmatpush.bf16.msra.mxu2 %v7811_v13  ;;  %v9917_v26 = vld [vmem:[#allocation2 + $0x15c] sm:$0xf0]  ;;  %v2464_v6 = vpop.f32.mrf.mxu0  ;;  %v9947_v14 = vld [vmem:[#allocation2 + $0x524] sm:$0xf] }
 0x1ca   :  { %v8019_v24 = vor.u32 %v9917_v26, %v8018_v55  ;;  %v8002_v13 = vld [vmem:[#allocation2 + $0xa0] sm:$0xf]  ;;  %v9959_v26 = vld [vmem:[#allocation2 + $0x6a4] sm:$0xf] }
 0x1cb   :  { %3211 = vmatpush.bf16.msrb.mxu1 %v7719_v23  ;;  %3837 = vmatpush.bf16.msra.mxu0 %v8035_v18  ;;  %v9678_v23 = vld [vmem:[#allocation6 + $0x1d8] sm:$0xf0] }
 0x1cc   :  { %v9702_v18 = vld [vmem:[#allocation6 + $0x298] sm:$0xf0] }
 0x1cd   :  { %3181 = vmatpush.bf16.msra.mxu3 %v7931_v48  ;;  %3170 = vmatpush.bf16.msra.mxu2 %v7799_v49  ;;  %v9913_v48 = vld [vmem:[#allocation2 + $0xdc] sm:$0xf0]  ;;  %v7987_v49 = vor.u32 %v9909_v42, %v7986_v40  ;;  %v7935_v55 = vor.u32 %v9702_v18, %v7934_v16 }
 0x1ce   :  { %v8338_v40 = vld [vmem:[#allocation2 + $0xb20] sm:$0xf] }
 0x1cf   :  { %3212 = vmatpush.bf16.msrb.mxu1 %v7707_v60  ;;  %3838 = vmatpush.bf16.msra.mxu0 %v8019_v24  ;;  %v2422_v35 = vpop.f32.mrf.mxu1  ;;  %v8228_v60 = vld [vmem:[#allocation2 + $0x7e0] sm:$0xf0]  ;;  %v9997_v42 = vld [vmem:[#allocation2 + $0xb5c] sm:$0xf0] }
 0x1d0   :  { %3171 = vmatmul.bf16.vlgmr.msra.gmra.mxu2 %v10600_v63  ;;  %v10618_v39 = vadd.f32 %v2422_v35, %v10610_v45  ;;  %v8146_v45 = vld [vmem:[#allocation2 + $0x520] sm:$0xf]  ;;  %v8355_v35 = vor.u32 %v10001_v33, %v8354_v30 }
 0x1d1   :  { %3182 = vmatpush.bf16.msra.mxu3 %v7919_v54  ;;  %3219 = vmatpush.bf16.msrb.mxu2 %v7887_v61  ;;  %v7839_v54 = vor.u32 %v9678_v23, %v7838_v43  ;;  %v9967_v61 = vld [vmem:[#allocation2 + $0x7a4] sm:$0xf]  ;;  %v10623_v43 = vpop.f32.mrf.mxu0  ;;  %v9985_v33 = vld [vmem:[#allocation2 + $0x9dc] sm:$0xf0] }
 0x1d2   :  { %3213 = vmatmul.bf16.vlgmr.msrb.gmra.mxu1 %v10584_v37  ;;  %v8003_v37 = vor.u32 %v9913_v48, %v8002_v13  ;;  %v8231_v47 = vor.u32 %v9967_v61, %v8228_v60  ;;  %v8356_v13 = vld [vmem:[#allocation2 + $0xbe0] sm:$0xf0]  ;;  %v7911_v61 = vor.u32 %v9696_v0, %v7910_v36  ;;  %v7898_v60 = vld [vmem:[#allocation6 + $0x248] sm:$0xf]  ;;  %v8274_v0 = vld [vmem:[#allocation2 + $0x920] sm:$0xf] }
 0x1d3   :  { %3847 = vmatpush.bf16.msra.mxu1 %v8227_v2  ;;  %v9949_v2 = vld [vmem:[#allocation2 + $0x55c] sm:$0xf0]  ;;  %v9955_v48 = vld [vmem:[#allocation2 + $0x624] sm:$0xf] }
 0x1d4   :  { %3839 = vmatpush.bf16.msra.mxu0 %v8003_v37  ;;  %v8147_v19 = vor.u32 %v9949_v2, %v8146_v45  ;;  %v8167_v45 = vor.u32 %v9951_v38, %v8164_v53  ;;  %v9935_v2 = vld [vmem:[#allocation2 + $0x3a4] sm:$0xf] }
 0x1d5   :  { %3183 = vmatpush.bf16.msra.mxu3 %v7907_v11  ;;  %3220 = vmatpush.bf16.msrb.mxu2 %v7875_v15  ;;  %v7947_v11 = vor.u32 %v9705_v1, %v7946_v62  ;;  %v8212_v15 = vld [vmem:[#allocation2 + $0x760] sm:$0xf0]  ;;  %v8339_v62 = vor.u32 %v9997_v42, %v8338_v40 }
 0x1d6   :  { %v8215_v51 = vor.u32 %v9963_v7, %v8212_v15  ;;  %v9693_v1 = vld [vmem:[#allocation6 + $0x250] sm:$0xf0] }
 0x1d7   :  { %3848 = vmatpush.bf16.msra.mxu1 %v8211_v21  ;;  %v10620_v3 = vpop.f32.mrf.mxu1  ;;  %v9945_v21 = vld [vmem:[#allocation2 + $0x4dc] sm:$0xf0]  ;;  %v8148_v15 = vld [vmem:[#allocation2 + $0x560] sm:$0xf0]  ;;  %v7899_v44 = vor.u32 %v9693_v1, %v7898_v60 }
 0x1d8   :  { %3840 = vmatpush.bf16.msra.mxu0 %v7987_v49  ;;  %v8131_v24 = vor.u32 %v9945_v21, %v8130_v59  ;;  %v8359_v49 = vor.u32 %v9999_v8, %v8356_v13  ;;  %v8151_v16 = vor.u32 %v9947_v14, %v8148_v15  ;;  %v8306_v59 = vld [vmem:[#allocation2 + $0xa20] sm:$0xf]  ;;  %v9983_v13 = vld [vmem:[#allocation2 + $0x9a4] sm:$0xf] }
 0x1d9   :  { %3184 = vmatpush.bf16.msra.mxu3 %v7895_v25  ;;  %3221 = vmatpush.bf16.msrb.mxu2 %v7863_v9  ;;  %v9669_v25 = vld [vmem:[#allocation6 + $0x190] sm:$0xf0]  ;;  %v9989_v21 = vld [vmem:[#allocation2 + $0xa5c] sm:$0xf0] }
 0x1da   :  { %v8196_v9 = vld [vmem:[#allocation2 + $0x6e0] sm:$0xf0]  ;;  %v7803_v37 = vor.u32 %v9669_v25, %v7802_v22  ;;  %v2520_v25 = vpop.f32.mrf.mxu0  ;;  %v8307_v30 = vor.u32 %v9989_v21, %v8306_v59  ;;  %v9973_v59 = vld [vmem:[#allocation2 + $0x85c] sm:$0xf0]  ;;  %v9994_v21 = vld [vmem:[#allocation2 + $0xae4] sm:$0xf0] }
 0x1db   :  { %3849 = vmatpush.bf16.msra.mxu1 %v8195_v52  ;;  %3841 = vmatmul.bf16.vlgmr.msra.gmra.mxu0 %v10457_v57  ;;  %v8199_v32 = vor.u32 %v9959_v26, %v8196_v9  ;;  %v8114_v52 = vld [vmem:[#allocation2 + $0x420] sm:$0xf]  ;;  %v9931_v22 = vld [vmem:[#allocation2 + $0x324] sm:$0xf] }
 0x1dc   :  { %3185 = vmatmul.bf16.vlgmr.msra.gmra.mxu3 %v10606_v4  ;;  %3889 = vmatpush.bf16.msrb.mxu0 %v8231_v47  ;;  %v9993_v47 = vld [vmem:[#allocation2 + $0xadc] sm:$0xf0]  ;;  %v8308_v26 = vld [vmem:[#allocation2 + $0xa60] sm:$0xf0] }
 0x1dd   :  { %3233 = vmatpush.bf16.msrb.mxu3 %v7983_v27  ;;  %3222 = vmatpush.bf16.msrb.mxu2 %v7851_v58  ;;  %v7922_v27 = vld [vmem:[#allocation6 + $0x278] sm:$0xf]  ;;  %v9943_v9 = vld [vmem:[#allocation2 + $0x4a4] sm:$0xf] }
 0x1de   :  { %v7923_v58 = vor.u32 %v9699_v28, %v7922_v27  ;;  %v8132_v27 = vld [vmem:[#allocation2 + $0x4e0] sm:$0xf0] }
 0x1df   :  { %3850 = vmatpush.bf16.msra.mxu1 %v8179_v46  ;;  %v2478_v23 = vpop.f32.mrf.mxu1  ;;  %v8115_v46 = vor.u32 %v9941_v29, %v8114_v52  ;;  %v8135_v28 = vor.u32 %v9943_v9, %v8132_v27  ;;  %v9927_v52 = vld [vmem:[#allocation2 + $0x2a4] sm:$0xf]  ;;  %v9938_v27 = vld [vmem:[#allocation2 + $0x3e4] sm:$0xf0] }
 0x1e0   :  { %3890 = vmatpush.bf16.msrb.mxu0 %v8215_v51  ;;  %v10625_v31 = vadd.f32 %v2478_v23, %v2464_v6  ;;  %v8100_v6 = vld [vmem:[#allocation2 + $0x3e0] sm:$0xf0] }
 0x1e1   :  { %3234 = vmatpush.bf16.msrb.mxu3 %v7971_v41  ;;  %3223 = vmatpush.bf16.msrb.mxu2 %v7839_v54  ;;  %v8180_v41 = vld [vmem:[#allocation2 + $0x660] sm:$0xf0]  ;;  %v8103_v51 = vor.u32 %v9935_v2, %v8100_v6  ;;  %v9998_v2 = vld [vmem:[#allocation2 + $0xb64] sm:$0xf0]  ;;  %v9977_v6 = vld [vmem:[#allocation2 + $0x8dc] sm:$0xf0] }
 0x1e2   :  { %v8183_v34 = vor.u32 %v9955_v48, %v8180_v41  ;;  %v9995_v54 = vld [vmem:[#allocation2 + $0xb24] sm:$0xf] }
 0x1e3   :  { %3851 = vmatpush.bf16.msra.mxu1 %v8163_v12  ;;  %v8322_v12 = vld [vmem:[#allocation2 + $0xaa0] sm:$0xf]  ;;  %v8068_v29 = vld [vmem:[#allocation2 + $0x2e0] sm:$0xf0] }
 0x1e4   :  { %3891 = vmatpush.bf16.msrb.mxu0 %v8199_v32  ;;  %v8290_v32 = vld [vmem:[#allocation2 + $0x9a0] sm:$0xf]  ;;  %v8292_v48 = vld [vmem:[#allocation2 + $0x9e0] sm:$0xf0]  ;;  %v8071_v36 = vor.u32 %v9927_v52, %v8068_v29  ;;  %v8314_v29 = vld [vmem:[#allocation2 + $0xa28] sm:$0xf] }
 0x1e5   :  { %3235 = vmatpush.bf16.msrb.mxu3 %v7959_v56  ;;  %3224 = vmatpush.bf16.msrb.mxu2 %v7827_v10  ;;  %v8340_v56 = vld [vmem:[#allocation2 + $0xb60] sm:$0xf0] }
 0x1e6   :  { %v8343_v7 = vor.u32 %v9995_v54, %v8340_v56  ;;  %v9991_v10 = vld [vmem:[#allocation2 + $0xaa4] sm:$0xf] }
 0x1e7   :  { %3852 = vmatpush.bf16.msra.mxu1 %v8147_v19  ;;  %v10629_v18 = vpop.f32.mrf.mxu1  ;;  %v8323_v19 = vor.u32 %v9993_v47, %v8322_v12  ;;  %v9923_v54 = vld [vmem:[#allocation2 + $0x224] sm:$0xf]  ;;  %v8258_v47 = vld [vmem:[#allocation2 + $0x8a0] sm:$0xf] }
 0x1e8   :  { %3892 = vmatpush.bf16.msrb.mxu0 %v8183_v34  ;;  %v10002_v34 = vld [vmem:[#allocation2 + $0xbe4] sm:$0xf0]  ;;  %v8052_v56 = vld [vmem:[#allocation2 + $0x260] sm:$0xf0] }
 0x1e9   :  { %3236 = vmatpush.bf16.msrb.mxu3 %v7947_v11  ;;  %3225 = vmatpush.bf16.msrb.mxu2 %v7815_v50  ;;  %v8324_v11 = vld [vmem:[#allocation2 + $0xae0] sm:$0xf0]  ;;  %v8055_v12 = vor.u32 %v9923_v54, %v8052_v56 }
 0x1ea   :  { %v8084_v50 = vld [vmem:[#allocation2 + $0x360] sm:$0xf0] }
 0x1eb   :  { %3853 = vmatpush.bf16.msra.mxu1 %v8131_v24  ;;  %v8087_v24 = vor.u32 %v9931_v22, %v8084_v50  ;;  %v9979_v60 = vld [vmem:[#allocation2 + $0x924] sm:$0xf] }
 0x1ec   :  { %3893 = vmatpush.bf16.msrb.mxu0 %v8167_v45  ;;  %v8276_v53 = vld [vmem:[#allocation2 + $0x960] sm:$0xf0]  ;;  %v8346_v45 = vld [vmem:[#allocation2 + $0xb28] sm:$0xf] }
 0x1ed   :  { %3237 = vmatpush.bf16.msrb.mxu3 %v7935_v55  ;;  %3226 = vmatpush.bf16.msrb.mxu2 %v7803_v37  ;;  %v9987_v55 = vld [vmem:[#allocation2 + $0xa24] sm:$0xf] }
 0x1ee   :  { %v8311_v8 = vor.u32 %v9987_v55, %v8308_v26  ;;  %v9939_v37 = vld [vmem:[#allocation2 + $0x424] sm:$0xf]  ;;  %v8106_v55 = vld [vmem:[#allocation2 + $0x3a8] sm:$0xf] }
 0x1ef   :  { %3854 = vmatpush.bf16.msra.mxu1 %v8115_v46  ;;  %v2534_v23 = vpop.f32.mrf.mxu1  ;;  %v8362_v46 = vld [vmem:[#allocation2 + $0xba8] sm:$0xf]  ;;  %v9975_v14 = vld [vmem:[#allocation2 + $0x8a4] sm:$0xf] }
 0x1f0   :  { %3227 = vmatmul.bf16.vlgmr.msrb.gmra.mxu2 %v10600_v63  ;;  %v8327_v63 = vor.u32 %v9991_v10, %v8324_v11  ;;  %3894 = vmatpush.bf16.msrb.mxu0 %v8151_v16  ;;  %v10632_v40 = vadd.f32 %v2534_v23, %v2520_v25  ;;  %v8363_v38 = vor.u32 %v10002_v34, %v8362_v46  ;;  %v8036_v10 = vld [vmem:[#allocation2 + $0x1e0] sm:$0xf0]  ;;  %v8108_v46 = vld [vmem:[#allocation2 + $0x3e8] sm:$0xf0] }
 0x1f1   :  { %3238 = vmatpush.bf16.msrb.mxu3 %v7923_v58  ;;  %3861 = vmatpush.bf16.msra.mxu2 %v8355_v35  ;;  %v8116_v58 = vld [vmem:[#allocation2 + $0x460] sm:$0xf0]  ;;  %v8291_v35 = vor.u32 %v9985_v33, %v8290_v32  ;;  %v8279_v11 = vor.u32 %v9979_v60, %v8276_v53  ;;  %v8259_v16 = vor.u32 %v9977_v6, %v8258_v47  ;;  %v8074_v53 = vld [vmem:[#allocation2 + $0x2a8] sm:$0xf]  ;;  %v9932_v6 = vld [vmem:[#allocation2 + $0x32c] sm:$0xf] }
 0x1f2   :  { %3855 = vmatmul.bf16.vlgmr.msra.gmra.mxu1 %v10466_v5  ;;  %v8119_v41 = vor.u32 %v9939_v37, %v8116_v58  ;;  %v8260_v15 = vld [vmem:[#allocation2 + $0x8e0] sm:$0xf0]  ;;  %v8090_v58 = vld [vmem:[#allocation2 + $0x328] sm:$0xf] }
 0x1f3   :  { %3903 = vmatpush.bf16.msrb.mxu1 %v8359_v49  ;;  %v2436_v42 = vpop.f32.mrf.mxu2  ;;  %v9981_v49 = vld [vmem:[#allocation2 + $0x95c] sm:$0xf0]  ;;  %v9915_v50 = vld [vmem:[#allocation2 + $0x124] sm:$0xf]  ;;  %v8263_v25 = vor.u32 %v9975_v14, %v8260_v15  ;;  %v9982_v14 = vld [vmem:[#allocation2 + $0x964] sm:$0xf0] }
 0x1f4   :  { %3895 = vmatpush.bf16.msrb.mxu0 %v8135_v28  ;;  %v8275_v1 = vor.u32 %v9981_v49, %v8274_v0  ;;  %v9971_v28 = vld [vmem:[#allocation2 + $0x824] sm:$0xf]  ;;  %v9936_v0 = vld [vmem:[#allocation2 + $0x3ac] sm:$0xf]  ;;  %v9986_v49 = vld [vmem:[#allocation2 + $0x9e4] sm:$0xf0] }
 0x1f5   :  { %3239 = vmatpush.bf16.msrb.mxu3 %v7911_v61  ;;  %3862 = vmatpush.bf16.msra.mxu2 %v8339_v62  ;;  %v2437_v61 = vadd.f32 %v2436_v42, %v10618_v39  ;;  %v10635_v62 = vpop.f32.mrf.mxu0  ;;  %v8347_v39 = vor.u32 %v9998_v2, %v8346_v45  ;;  %v8004_v37 = vld [vmem:[#allocation2 + $0xe0] sm:$0xf0]  ;;  %v8111_v34 = vor.u32 %v9936_v0, %v8108_v46  ;;  %v8298_v42 = vld [vmem:[#allocation2 + $0x9a8] sm:$0xf] }
 0x1f6   :  { %v9907_v56 = vld [vmem:[#allocation2 + $0x24] sm:$0xf]  ;;  %v9970_v2 = vld [vmem:[#allocation2 + $0x7e4] sm:$0xf0] }
 0x1f7   :  { %3904 = vmatpush.bf16.msrb.mxu1 %v8343_v7  ;;  %v9919_v7 = vld [vmem:[#allocation2 + $0x1a4] sm:$0xf]  ;;  %v10647_v15 = vpop.f32.mrf.mxu1 }
 0x1f8   :  { %3896 = vmatpush.bf16.msrb.mxu0 %v8119_v41 }
 0x1f9   :  { %3240 = vmatpush.bf16.msrb.mxu3 %v7899_v44  ;;  %3863 = vmatpush.bf16.msra.mxu2 %v8323_v19  ;;  %v8330_v44 = vld [vmem:[#allocation2 + $0xaa8] sm:$0xf]  ;;  %v8039_v19 = vor.u32 %v9919_v7, %v8036_v10  ;;  %v8092_v7 = vld [vmem:[#allocation2 + $0x368] sm:$0xf0] }
 0x1fa   :  { %v8331_v26 = vor.u32 %v9994_v21, %v8330_v44  ;;  %v8095_v10 = vor.u32 %v9932_v6, %v8092_v7  ;;  %v9966_v21 = vld [vmem:[#allocation2 + $0x764] sm:$0xf0] }
 0x1fb   :  { %3905 = vmatpush.bf16.msrb.mxu1 %v8327_v63  ;;  %3897 = vmatmul.bf16.vlgmr.msrb.gmra.mxu0 %v10466_v5  ;;  %v10638_v22 = vpop.f32.mrf.mxu2  ;;  %v8020_v63 = vld [vmem:[#allocation2 + $0x160] sm:$0xf0]  ;;  %v9914_v6 = vld [vmem:[#allocation2 + $0xe4] sm:$0xf0] }
 0x1fc   :  { %3241 = vmatmul.bf16.vlgmr.msrb.gmra.mxu3 %v10606_v4  ;;  %v8295_v4 = vor.u32 %v9983_v13, %v8292_v48  ;;  %3945 = vmatpush.bf16.msra.mxu0 %v8363_v38  ;;  %v8023_v52 = vor.u32 %v9915_v50, %v8020_v63  ;;  %v8107_v13 = vor.u32 %v9938_v27, %v8106_v55  ;;  %v9911_v48 = vld [vmem:[#allocation2 + $0xa4] sm:$0xf]  ;;  %v9928_v50 = vld [vmem:[#allocation2 + $0x2ac] sm:$0xf]  ;;  %v8170_v7 = vld [vmem:[#allocation2 + $0x5a8] sm:$0xf] }
 0x1fd   :  { %3875 = vmatpush.bf16.msra.mxu3 %v8103_v51  ;;  %3864 = vmatpush.bf16.msra.mxu2 %v8307_v30  ;;  %v8242_v51 = vld [vmem:[#allocation2 + $0x820] sm:$0xf]  ;;  %v8244_v30 = vld [vmem:[#allocation2 + $0x860] sm:$0xf0]  ;;  %v3088_v32 = vpop.f32.mrf.mxu0  ;;  %v8007_v54 = vor.u32 %v9911_v48, %v8004_v37  ;;  %v8299_v38 = vor.u32 %v9986_v49, %v8298_v42  ;;  %v8076_v63 = vld [vmem:[#allocation2 + $0x2e8] sm:$0xf0] }
 0x1fe   :  { %v8243_v33 = vor.u32 %v9973_v59, %v8242_v51  ;;  %v8247_v23 = vor.u32 %v9971_v28, %v8244_v30  ;;  %v8218_v51 = vld [vmem:[#allocation2 + $0x728] sm:$0xf]  ;;  %v8079_v55 = vor.u32 %v9928_v50, %v8076_v63  ;;  %v8060_v48 = vld [vmem:[#allocation2 + $0x268] sm:$0xf0] }
 0x1ff   :  { %3906 = vmatpush.bf16.msrb.mxu1 %v8311_v8  ;;  %v2450_v9 = vpop.f32.mrf.mxu3  ;;  %v9990_v8 = vld [vmem:[#allocation2 + $0xa64] sm:$0xf0]  ;;  %v9912_v63 = vld [vmem:[#allocation2 + $0xac] sm:$0xf] }
 0x200   :  { %3946 = vmatpush.bf16.msra.mxu0 %v8347_v39  ;;  %v8026_v42 = vld [vmem:[#allocation2 + $0x128] sm:$0xf] }
 0x201   :  { %3876 = vmatpush.bf16.msra.mxu3 %v8087_v24  ;;  %3865 = vmatpush.bf16.msra.mxu2 %v8291_v35  ;;  %v2451_v24 = vadd.f32 %v2450_v9, %v2437_v61  ;;  %v8315_v35 = vor.u32 %v9990_v8, %v8314_v29  ;;  %v9962_v8 = vld [vmem:[#allocation2 + $0x6e4] sm:$0xf0] }
 0x202   :  { %v9918_v49 = vld [vmem:[#allocation2 + $0x164] sm:$0xf0] }
 0x203   :  { %3907 = vmatpush.bf16.msrb.mxu1 %v8295_v4  ;;  %v10640_v41 = vadd.f32 %v3088_v32, %v2451_v24  ;;  %v7988_v4 = vld [vmem:[#allocation2 + $0x60] sm:$0xf0]  ;;  %v2492_v61 = vpop.f32.mrf.mxu2  ;;  %v8219_v24 = vor.u32 %v9966_v21, %v8218_v51  ;;  %v8042_v32 = vld [vmem:[#allocation2 + $0x1a8] sm:$0xf] }
 0x204   :  { %3947 = vmatpush.bf16.msra.mxu0 %v8331_v26  ;;  %v2493_v45 = vadd.f32 %v2492_v61, %v10625_v31  ;;  %v7991_v39 = vor.u32 %v9907_v56, %v7988_v4  ;;  %v8058_v31 = vld [vmem:[#allocation2 + $0x228] sm:$0xf]  ;;  %v8044_v61 = vld [vmem:[#allocation2 + $0x1e8] sm:$0xf0] }
 0x205   :  { %3877 = vmatpush.bf16.msra.mxu3 %v8071_v36  ;;  %3866 = vmatpush.bf16.msra.mxu2 %v8275_v1  ;;  %v9934_v36 = vld [vmem:[#allocation2 + $0x364] sm:$0xf0]  ;;  %v10649_v27 = vpop.f32.mrf.mxu0 }
 0x206   :  { %v8091_v60 = vor.u32 %v9934_v36, %v8090_v58  ;;  %v9930_v1 = vld [vmem:[#allocation2 + $0x2e4] sm:$0xf0] }
 0x207   :  { %3908 = vmatpush.bf16.msrb.mxu1 %v8279_v11  ;;  %v10642_v47 = vpop.f32.mrf.mxu3  ;;  %v8282_v11 = vld [vmem:[#allocation2 + $0x928] sm:$0xf]  ;;  %v8075_v44 = vor.u32 %v9930_v1, %v8074_v53 }
 0x208   :  { %3948 = vmatpush.bf16.msra.mxu0 %v8315_v35  ;;  %v8283_v59 = vor.u32 %v9982_v14, %v8282_v11  ;;  %v9978_v26 = vld [vmem:[#allocation2 + $0x8e4] sm:$0xf0]  ;;  %v9916_v14 = vld [vmem:[#allocation2 + $0x12c] sm:$0xf] }
 0x209   :  { %3878 = vmatpush.bf16.msra.mxu3 %v8055_v12  ;;  %3867 = vmatpush.bf16.msra.mxu2 %v8259_v16  ;;  %v8234_v12 = vld [vmem:[#allocation2 + $0x7a8] sm:$0xf] }
 0x20a   :  { %v8235_v16 = vor.u32 %v9970_v2, %v8234_v12  ;;  %v9974_v35 = vld [vmem:[#allocation2 + $0x864] sm:$0xf0]  ;;  %v8027_v12 = vor.u32 %v9918_v49, %v8026_v42  ;;  %v10000_v42 = vld [vmem:[#allocation2 + $0xbac] sm:$0xf] }
 0x20b   :  { %3909 = vmatpush.bf16.msrb.mxu1 %v8263_v25  ;;  %v8266_v25 = vld [vmem:[#allocation2 + $0x8a8] sm:$0xf]  ;;  %v10651_v28 = vpop.f32.mrf.mxu2  ;;  %v8364_v49 = vld [vmem:[#allocation2 + $0xbe8] sm:$0xf0] }
 0x20c   :  { %3949 = vmatpush.bf16.msra.mxu0 %v8299_v38  ;;  %v8267_v9 = vor.u32 %v9978_v26, %v8266_v25  ;;  %v9958_v4 = vld [vmem:[#allocation2 + $0x664] sm:$0xf0]  ;;  %v9920_v38 = vld [vmem:[#allocation2 + $0x1ac] sm:$0xf] }
 0x20d   :  { %3879 = vmatpush.bf16.msra.mxu3 %v8039_v19  ;;  %3868 = vmatpush.bf16.msra.mxu2 %v8243_v33  ;;  %v9926_v19 = vld [vmem:[#allocation2 + $0x264] sm:$0xf0]  ;;  %v9968_v25 = vld [vmem:[#allocation2 + $0x7ac] sm:$0xf] }
 0x20e   :  { %v8059_v30 = vor.u32 %v9926_v19, %v8058_v31  ;;  %v9922_v33 = vld [vmem:[#allocation2 + $0x1e4] sm:$0xf0] }
 0x20f   :  { %3910 = vmatpush.bf16.msrb.mxu1 %v8247_v23  ;;  %v2506_v29 = vpop.f32.mrf.mxu3  ;;  %v8250_v23 = vld [vmem:[#allocation2 + $0x828] sm:$0xf]  ;;  %v3102_v0 = vpop.f32.mrf.mxu1  ;;  %v8043_v46 = vor.u32 %v9922_v33, %v8042_v32 }
 0x210   :  { %3869 = vmatmul.bf16.vlgmr.msra.gmra.mxu2 %v10476_v20  ;;  %3950 = vmatpush.bf16.msra.mxu0 %v8283_v59  ;;  %v2507_v37 = vadd.f32 %v2506_v29, %v2493_v45  ;;  %v8251_v36 = vor.u32 %v9974_v35, %v8250_v23  ;;  %v10655_v56 = vadd.f32 %v3102_v0, %v10640_v41  ;;  %v8010_v2 = vld [vmem:[#allocation2 + $0xa8] sm:$0xf]  ;;  %v9908_v29 = vld [vmem:[#allocation2 + $0x2c] sm:$0xf] }
 0x211   :  { %3880 = vmatpush.bf16.msra.mxu3 %v8023_v52  ;;  %3917 = vmatpush.bf16.msrb.mxu2 %v8107_v13  ;;  %v8202_v52 = vld [vmem:[#allocation2 + $0x6a8] sm:$0xf]  ;;  %v9924_v13 = vld [vmem:[#allocation2 + $0x22c] sm:$0xf]  ;;  %v8011_v31 = vor.u32 %v9914_v6, %v8010_v2 }
 0x212   :  { %3911 = vmatmul.bf16.vlgmr.msrb.gmra.mxu1 %v10476_v20  ;;  %v8063_v58 = vor.u32 %v9924_v13, %v8060_v48  ;;  %v7994_v51 = vld [vmem:[#allocation2 + $0x28] sm:$0xf]  ;;  %v9964_v48 = vld [vmem:[#allocation2 + $0x72c] sm:$0xf] }
 0x213   :  { %3959 = vmatpush.bf16.msra.mxu1 %v8111_v34  ;;  %v8203_v34 = vor.u32 %v9962_v8, %v8202_v52  ;;  %v2548_v1 = vpop.f32.mrf.mxu2  ;;  %v9910_v59 = vld [vmem:[#allocation2 + $0x64] sm:$0xf0]  ;;  %v7996_v8 = vld [vmem:[#allocation2 + $0x68] sm:$0xf0] }
 0x214   :  { %3951 = vmatpush.bf16.msra.mxu0 %v8267_v9  ;;  %v2549_v41 = vadd.f32 %v2548_v1, %v10632_v40  ;;  %v8154_v21 = vld [vmem:[#allocation2 + $0x528] sm:$0xf]  ;;  %v8236_v40 = vld [vmem:[#allocation2 + $0x7e8] sm:$0xf0]  ;;  %v7995_v9 = vor.u32 %v9910_v59, %v7994_v51 }
 0x215   :  { %3881 = vmatpush.bf16.msra.mxu3 %v8007_v54  ;;  %3918 = vmatpush.bf16.msrb.mxu2 %v8091_v60  ;;  %v8186_v54 = vld [vmem:[#allocation2 + $0x628] sm:$0xf]  ;;  %v8047_v60 = vor.u32 %v9920_v38, %v8044_v61  ;;  %v8239_v33 = vor.u32 %v9968_v25, %v8236_v40  ;;  %v8367_v61 = vor.u32 %v10000_v42, %v8364_v49  ;;  %v9996_v1 = vld [vmem:[#allocation2 + $0xb2c] sm:$0xf]  ;;  %v10025_v49 = vld [vmem:[#allocation6 + $0x6b0] sm:$0xf0] }
 0x216   :  { %v8187_v45 = vor.u32 %v9958_v4, %v8186_v54  ;;  %v9950_v50 = vld [vmem:[#allocation2 + $0x564] sm:$0xf0]  ;;  %v9952_v6 = vld [vmem:[#allocation2 + $0x5ac] sm:$0xf] }
 0x217   :  { %3960 = vmatpush.bf16.msra.mxu1 %v8095_v10  ;;  %v3144_v53 = vpop.f32.mrf.mxu0  ;;  %v10659_v11 = vpop.f32.mrf.mxu3  ;;  %v9946_v52 = vld [vmem:[#allocation2 + $0x4e4] sm:$0xf0]  ;;  %v9948_v51 = vld [vmem:[#allocation2 + $0x52c] sm:$0xf] }
 0x218   :  { %3952 = vmatpush.bf16.msra.mxu0 %v8251_v36  ;;  %v10657_v10 = vadd.f32 %v3144_v53, %v2507_v37  ;;  %v8220_v37 = vld [vmem:[#allocation2 + $0x768] sm:$0xf0]  ;;  %v8122_v36 = vld [vmem:[#allocation2 + $0x428] sm:$0xf]  ;;  %v10665_v4 = vpop.f32.mrf.mxu1 }
 0x219   :  { %3882 = vmatpush.bf16.msra.mxu3 %v7991_v39  ;;  %3919 = vmatpush.bf16.msrb.mxu2 %v8075_v44  ;;  %v9954_v39 = vld [vmem:[#allocation2 + $0x5e4] sm:$0xf0]  ;;  %v8028_v44 = vld [vmem:[#allocation2 + $0x168] sm:$0xf0]  ;;  %v8223_v35 = vor.u32 %v9964_v48, %v8220_v37 }
 0x21a   :  { %v8171_v19 = vor.u32 %v9954_v39, %v8170_v7  ;;  %v9942_v0 = vld [vmem:[#allocation2 + $0x464] sm:$0xf0]  ;;  %v8188_v53 = vld [vmem:[#allocation2 + $0x668] sm:$0xf0] }
 0x21b   :  { %3961 = vmatpush.bf16.msra.mxu1 %v8079_v55  ;;  %3953 = vmatmul.bf16.vlgmr.msra.gmra.mxu0 %v10476_v20  ;;  %v8012_v55 = vld [vmem:[#allocation2 + $0xe8] sm:$0xf0]  ;;  %v8123_v54 = vor.u32 %v9942_v0, %v8122_v36  ;;  %v10667_v7 = vpop.f32.mrf.mxu2 }
 0x21c   :  { %3883 = vmatmul.bf16.vlgmr.msra.gmra.mxu3 %v10457_v57  ;;  %v8015_v26 = vor.u32 %v9912_v63, %v8012_v55  ;;  %v9992_v39 = vld [vmem:[#allocation2 + $0xaac] sm:$0xf] }
 0x21d   :  { %3931 = vmatpush.bf16.msrb.mxu3 %v8235_v16  ;;  %3920 = vmatpush.bf16.msrb.mxu2 %v8059_v30  ;;  %v8031_v16 = vor.u32 %v9916_v14, %v8028_v44  ;;  %v8155_v30 = vor.u32 %v9950_v50, %v8154_v21  ;;  %v8332_v14 = vld [vmem:[#allocation2 + $0xae8] sm:$0xf0] }
 0x21e   :  { %v8156_v21 = vld [vmem:[#allocation2 + $0x568] sm:$0xf0] }
 0x21f   :  { %3962 = vmatpush.bf16.msra.mxu1 %v8063_v58  ;;  %v2562_v32 = vpop.f32.mrf.mxu3  ;;  %v7999_v58 = vor.u32 %v9908_v29, %v7996_v8  ;;  %v10669_v44 = vpop.f32.mrf.mxu0  ;;  %v9988_v50 = vld [vmem:[#allocation2 + $0xa2c] sm:$0xf]  ;;  %v8159_v55 = vor.u32 %v9948_v51, %v8156_v21 }
 0x220   :  { %v2563_v13 = vadd.f32 %v2562_v32, %v2549_v41  ;;  %v8172_v41 = vld [vmem:[#allocation2 + $0x5e8] sm:$0xf0] }
 0x221   :  { %3932 = vmatpush.bf16.msrb.mxu3 %v8219_v24  ;;  %3921 = vmatpush.bf16.msrb.mxu2 %v8043_v46  ;;  %v8138_v24 = vld [vmem:[#allocation2 + $0x4a8] sm:$0xf]  ;;  %v9960_v46 = vld [vmem:[#allocation2 + $0x6ac] sm:$0xf] }
 0x222   :  { %v8139_v23 = vor.u32 %v9946_v52, %v8138_v24  ;;  %v8316_v63 = vld [vmem:[#allocation2 + $0xa68] sm:$0xf0] }
 0x223   :  { %3963 = vmatpush.bf16.msra.mxu1 %v8047_v60  ;;  %v9956_v60 = vld [vmem:[#allocation2 + $0x62c] sm:$0xf]  ;;  %v8319_v25 = vor.u32 %v9988_v50, %v8316_v63 }
 0x224   :  { %v9944_v40 = vld [vmem:[#allocation2 + $0x4ac] sm:$0xf] }
 0x225   :  { %3933 = vmatpush.bf16.msrb.mxu3 %v8203_v34  ;;  %3922 = vmatpush.bf16.msrb.mxu2 %v8027_v12  ;;  %v8204_v34 = vld [vmem:[#allocation2 + $0x6e8] sm:$0xf0] }
 0x226   :  { %v8207_v38 = vor.u32 %v9960_v46, %v8204_v34  ;;  %v8348_v12 = vld [vmem:[#allocation2 + $0xb68] sm:$0xf0] }
 0x227   :  { %3964 = vmatpush.bf16.msra.mxu1 %v8031_v16  ;;  %v8351_v2 = vor.u32 %v9996_v1, %v8348_v12  ;;  %v9984_v24 = vld [vmem:[#allocation2 + $0x9ac] sm:$0xf] }
 0x228   :  { %v8300_v32 = vld [vmem:[#allocation2 + $0x9e8] sm:$0xf0] }
 0x229   :  { %3934 = vmatpush.bf16.msrb.mxu3 %v8187_v45  ;;  %3923 = vmatpush.bf16.msrb.mxu2 %v8011_v31  ;;  %v8191_v45 = vor.u32 %v9956_v60, %v8188_v53  ;;  %v8175_v31 = vor.u32 %v9952_v6, %v8172_v41  ;;  %v8303_v8 = vor.u32 %v9984_v24, %v8300_v32  ;;  %v9940_v48 = vld [vmem:[#allocation2 + $0x42c] sm:$0xf]  ;;  %v8442_v60 = vld [vmem:[#allocation6 + $0x690] sm:$0xf]  ;;  %v8550_v41 = vld [vmem:[#allocation6 + $0x768] sm:$0xf] }
 0x22a   :  { %v8124_v37 = vld [vmem:[#allocation2 + $0x468] sm:$0xf0]  ;;  %v8394_v24 = vld [vmem:[#allocation6 + $0x630] sm:$0xf] }
 0x22b   :  { %3965 = vmatpush.bf16.msra.mxu1 %v8015_v26  ;;  %v10675_v26 = vpop.f32.mrf.mxu3  ;;  %v9976_v46 = vld [vmem:[#allocation2 + $0x8ac] sm:$0xf] }
 0x22c   :  { %v8268_v34 = vld [vmem:[#allocation2 + $0x8e8] sm:$0xf0] }
 0x22d   :  { %3935 = vmatpush.bf16.msrb.mxu3 %v8171_v19  ;;  %3924 = vmatpush.bf16.msrb.mxu2 %v7995_v9  ;;  %v8335_v19 = vor.u32 %v9992_v39, %v8332_v14  ;;  %v10022_v53 = vld [vmem:[#allocation6 + $0x698] sm:$0xf0]  ;;  %v10049_v39 = vld [vmem:[#allocation6 + $0x770] sm:$0xf0] }
 0x22e   :  { %v8443_v12 = vor.u32 %v10022_v53, %v8442_v60  ;;  %v8551_v14 = vor.u32 %v10049_v39, %v8550_v41  ;;  %v10010_v32 = vld [vmem:[#allocation6 + $0x638] sm:$0xf0]  ;;  %v10024_v53 = vld [vmem:[#allocation6 + $0x6ac] sm:$0xf]  ;;  %v10021_v41 = vld [vmem:[#allocation6 + $0x694] sm:$0xf] }
 0x22f   :  { %3966 = vmatpush.bf16.msra.mxu1 %v7999_v58  ;;  %v3158_v16 = vpop.f32.mrf.mxu1  ;;  %v9980_v58 = vld [vmem:[#allocation2 + $0x92c] sm:$0xf] }
 0x230   :  { %3925 = vmatmul.bf16.vlgmr.msrb.gmra.mxu2 %v10457_v57  ;;  %v10673_v59 = vadd.f32 %v3158_v16, %v10657_v10 }
 0x231   :  { %3936 = vmatpush.bf16.msrb.mxu3 %v8155_v30  ;;  %3973 = vmatpush.bf16.msra.mxu2 %v8239_v33  ;;  %v8140_v30 = vld [vmem:[#allocation2 + $0x4e8] sm:$0xf0] }
 0x232   :  { %3967 = vmatmul.bf16.vlgmr.msra.gmra.mxu1 %v10457_v57  ;;  %v8143_v10 = vor.u32 %v9944_v40, %v8140_v30  ;;  %v8538_v40 = vld [vmem:[#allocation6 + $0x750] sm:$0xf]  ;;  %v10046_v30 = vld [vmem:[#allocation6 + $0x758] sm:$0xf0] }
 0x233   :  { %v3116_v9 = vpop.f32.mrf.mxu2  ;;  %4667 = vmatpush.bf16.msrb.mxu1 %v8551_v14  ;;  %v8444_v14 = vld [vmem:[#allocation6 + $0x69c] sm:$0xf0] }
 0x234   :  { %v3117_v33 = vadd.f32 %v3116_v9, %v10655_v56  ;;  %v8271_v56 = vor.u32 %v9976_v46, %v8268_v34  ;;  %v10040_v46 = vld [vmem:[#allocation6 + $0x728] sm:$0xf0]  ;;  %v8370_v34 = vld [vmem:[#allocation6 + $0x600] sm:$0xf] }
 0x235   :  { %3937 = vmatpush.bf16.msrb.mxu3 %v8139_v23  ;;  %3974 = vmatpush.bf16.msra.mxu2 %v8223_v35  ;;  %v8284_v23 = vld [vmem:[#allocation2 + $0x968] sm:$0xf0]  ;;  %v8127_v35 = vor.u32 %v9940_v48, %v8124_v37  ;;  %v10043_v48 = vld [vmem:[#allocation6 + $0x740] sm:$0xf0] }
 0x236   :  { %v8287_v36 = vor.u32 %v9980_v58, %v8284_v23  ;;  %v8395_v58 = vor.u32 %v10010_v32, %v8394_v24  ;;  %v8382_v23 = vld [vmem:[#allocation6 + $0x618] sm:$0xf]  ;;  %v8466_v24 = vld [vmem:[#allocation6 + $0x6c0] sm:$0xf]  ;;  %v10028_v32 = vld [vmem:[#allocation6 + $0x6c8] sm:$0xf0] }
 0x237   :  { %v3200_v52 = vpop.f32.mrf.mxu0  ;;  %v10681_v6 = vpop.f32.mrf.mxu1 }
 0x238   :  { %v3201_v29 = vadd.f32 %v3200_v52, %v2563_v13  ;;  %v8454_v13 = vld [vmem:[#allocation6 + $0x6a8] sm:$0xf] }
 0x239   :  { %3938 = vmatpush.bf16.msrb.mxu3 %v8123_v54  ;;  %3975 = vmatpush.bf16.msra.mxu2 %v8207_v38  ;;  %v9972_v54 = vld [vmem:[#allocation2 + $0x82c] sm:$0xf] }
 0x23a   :  { %v8252_v38 = vld [vmem:[#allocation2 + $0x868] sm:$0xf0] }
 0x23b   :  { %v8255_v1 = vor.u32 %v9972_v54, %v8252_v38  ;;  %v10683_v51 = vpop.f32.mrf.mxu2  ;;  %v8502_v54 = vld [vmem:[#allocation6 + $0x708] sm:$0xf]  ;;  %v10037_v38 = vld [vmem:[#allocation6 + $0x710] sm:$0xf0] }
 0x23c   :  { %3939 = vmatmul.bf16.vlgmr.msrb.gmra.mxu3 %v10466_v5  ;;  %v8503_v60 = vor.u32 %v10037_v38, %v8502_v54 }
 0x23d   :  { %3987 = vmatpush.bf16.msra.mxu3 %v8367_v61  ;;  %3976 = vmatpush.bf16.msra.mxu2 %v8191_v45  ;;  %v8455_v61 = vor.u32 %v10025_v49, %v8454_v13  ;;  %v8430_v45 = vld [vmem:[#allocation6 + $0x678] sm:$0xf] }
 0x23f   :  { %v3130_v0 = vpop.f32.mrf.mxu3  ;;  %4653 = vmatpush.bf16.msrb.mxu0 %v8455_v61 }
 0x240   :  { %v10678_v42 = vadd.f32 %v3130_v0, %v3117_v33 }
 0x241   :  { %3988 = vmatpush.bf16.msra.mxu3 %v8351_v2  ;;  %3977 = vmatpush.bf16.msra.mxu2 %v8175_v31  ;;  %v10019_v2 = vld [vmem:[#allocation6 + $0x680] sm:$0xf0]  ;;  %v8418_v31 = vld [vmem:[#allocation6 + $0x660] sm:$0xf] }
 0x242   :  { %v8431_v16 = vor.u32 %v10019_v2, %v8430_v45  ;;  %v8490_v45 = vld [vmem:[#allocation6 + $0x6f0] sm:$0xf]  ;;  %v10034_v2 = vld [vmem:[#allocation6 + $0x6f8] sm:$0xf0] }
 0x243   :  { %4654 = vmatpush.bf16.msrb.mxu0 %v8443_v12  ;;  %v8491_v39 = vor.u32 %v10034_v2, %v8490_v45  ;;  %v8396_v2 = vld [vmem:[#allocation6 + $0x63c] sm:$0xf0] }
 0x245   :  { %3989 = vmatpush.bf16.msra.mxu3 %v8335_v19  ;;  %3978 = vmatpush.bf16.msra.mxu2 %v8159_v55  ;;  %v10016_v19 = vld [vmem:[#allocation6 + $0x668] sm:$0xf0]  ;;  %v8406_v55 = vld [vmem:[#allocation6 + $0x648] sm:$0xf] }
 0x246   :  { %v8419_v21 = vor.u32 %v10016_v19, %v8418_v31  ;;  %v8447_v31 = vor.u32 %v10021_v41, %v8444_v14  ;;  %v10031_v19 = vld [vmem:[#allocation6 + $0x6e0] sm:$0xf0]  ;;  %v10042_v41 = vld [vmem:[#allocation6 + $0x73c] sm:$0xf] }
 0x247   :  { %4655 = vmatpush.bf16.msrb.mxu0 %v8431_v16  ;;  %v10688_v33 = vpop.f32.mrf.mxu3  ;;  %v8478_v16 = vld [vmem:[#allocation6 + $0x6d8] sm:$0xf] }
 0x249   :  { %3990 = vmatpush.bf16.msra.mxu3 %v8319_v25  ;;  %3979 = vmatpush.bf16.msra.mxu2 %v8143_v10  ;;  %v10013_v25 = vld [vmem:[#allocation6 + $0x650] sm:$0xf0]  ;;  %v8539_v10 = vor.u32 %v10046_v30, %v8538_v40  ;;  %v8479_v40 = vor.u32 %v10031_v19, %v8478_v16  ;;  %v10064_v19 = vld [vmem:[#allocation6 + $0x7e8] sm:$0xf0] }
 0x24a   :  { %v8407_v9 = vor.u32 %v10013_v25, %v8406_v55  ;;  %v8646_v55 = vld [vmem:[#allocation6 + $0x828] sm:$0xf]  ;;  %v10073_v25 = vld [vmem:[#allocation6 + $0x830] sm:$0xf0] }
 0x24b   :  { %4656 = vmatpush.bf16.msrb.mxu0 %v8419_v21  ;;  %4668 = vmatpush.bf16.msrb.mxu1 %v8539_v10  ;;  %v10018_v21 = vld [vmem:[#allocation6 + $0x67c] sm:$0xf]  ;;  %v8647_v30 = vor.u32 %v10073_v25, %v8646_v55  ;;  %v8420_v10 = vld [vmem:[#allocation6 + $0x66c] sm:$0xf0]  ;;  %v8384_v55 = vld [vmem:[#allocation6 + $0x624] sm:$0xf0] }
 0x24c   :  { %v10039_v25 = vld [vmem:[#allocation6 + $0x724] sm:$0xf] }
 0x24d   :  { %3991 = vmatpush.bf16.msra.mxu3 %v8303_v8  ;;  %3980 = vmatpush.bf16.msra.mxu2 %v8127_v35  ;;  %v8526_v8 = vld [vmem:[#allocation6 + $0x738] sm:$0xf]  ;;  %v10007_v35 = vld [vmem:[#allocation6 + $0x620] sm:$0xf0] }
 0x24e   :  { %v8383_v0 = vor.u32 %v10007_v35, %v8382_v23  ;;  %v8634_v35 = vld [vmem:[#allocation6 + $0x810] sm:$0xf] }
 0x24f   :  { %v3214_v50 = vpop.f32.mrf.mxu1  ;;  %4657 = vmatpush.bf16.msrb.mxu0 %v8407_v9 }
 0x250   :  { %3981 = vmatmul.bf16.vlgmr.msra.gmra.mxu2 %v10466_v5  ;;  %v10686_v63 = vadd.f32 %v3214_v50, %v3201_v29  ;;  %v8527_v29 = vor.u32 %v10043_v48, %v8526_v8  ;;  %v8432_v50 = vld [vmem:[#allocation6 + $0x684] sm:$0xf0]  ;;  %v10048_v8 = vld [vmem:[#allocation6 + $0x76c] sm:$0xf]  ;;  %v8552_v48 = vld [vmem:[#allocation6 + $0x774] sm:$0xf0] }
 0x251   :  { %3992 = vmatpush.bf16.msra.mxu3 %v8287_v36  ;;  %v8514_v36 = vld [vmem:[#allocation6 + $0x720] sm:$0xf]  ;;  %v8435_v9 = vor.u32 %v10018_v21, %v8432_v50  ;;  %4681 = vmatpush.bf16.msrb.mxu2 %v8647_v30  ;;  %v8555_v23 = vor.u32 %v10048_v8, %v8552_v48  ;;  %v10006_v50 = vld [vmem:[#allocation6 + $0x61c] sm:$0xf] }
 0x252   :  { %4669 = vmatpush.bf16.msrb.mxu1 %v8527_v29  ;;  %v8515_v49 = vor.u32 %v10040_v46, %v8514_v36  ;;  %v10070_v36 = vld [vmem:[#allocation6 + $0x818] sm:$0xf0]  ;;  %v10012_v46 = vld [vmem:[#allocation6 + $0x64c] sm:$0xf] }
 0x253   :  { %v3172_v52 = vpop.f32.mrf.mxu2  ;;  %4658 = vmatpush.bf16.msrb.mxu0 %v8395_v58  ;;  %v8467_v58 = vor.u32 %v10028_v32, %v8466_v24 }
 0x254   :  { %v3173_v37 = vadd.f32 %v3172_v52, %v10673_v59  ;;  %v10015_v52 = vld [vmem:[#allocation6 + $0x664] sm:$0xf] }
 0x255   :  { %3993 = vmatpush.bf16.msra.mxu3 %v8271_v56  ;;  %v10004_v56 = vld [vmem:[#allocation6 + $0x608] sm:$0xf0]  ;;  %v8423_v29 = vor.u32 %v10015_v52, %v8420_v10  ;;  %v8598_v52 = vld [vmem:[#allocation6 + $0x7c8] sm:$0xf]  ;;  %v10061_v10 = vld [vmem:[#allocation6 + $0x7d0] sm:$0xf0] }
 0x256   :  { %v8371_v59 = vor.u32 %v10004_v56, %v8370_v34  ;;  %4670 = vmatpush.bf16.msrb.mxu1 %v8515_v49  ;;  %v8408_v34 = vld [vmem:[#allocation6 + $0x654] sm:$0xf0]  ;;  %v10045_v56 = vld [vmem:[#allocation6 + $0x754] sm:$0xf]  ;;  %v8540_v49 = vld [vmem:[#allocation6 + $0x75c] sm:$0xf0]  ;;  %v8599_v48 = vor.u32 %v10061_v10, %v8598_v52 }
 0x257   :  { %4659 = vmatpush.bf16.msrb.mxu0 %v8383_v0  ;;  %v8635_v0 = vor.u32 %v10070_v36, %v8634_v35  ;;  %v10700_v30 = vpop.f32.mrf.mxu1  ;;  %v10036_v35 = vld [vmem:[#allocation6 + $0x70c] sm:$0xf]  ;;  %v8504_v36 = vld [vmem:[#allocation6 + $0x714] sm:$0xf0]  ;;  %v10094_v52 = vld [vmem:[#allocation6 + $0x8d8] sm:$0xf0] }
 0x258   :  { %v10027_v10 = vld [vmem:[#allocation6 + $0x6c4] sm:$0xf] }
 0x259   :  { %3994 = vmatpush.bf16.msra.mxu3 %v8255_v1  ;;  %v8456_v1 = vld [vmem:[#allocation6 + $0x6b4] sm:$0xf0]  ;;  %4682 = vmatpush.bf16.msrb.mxu2 %v8635_v0  ;;  %v8507_v0 = vor.u32 %v10036_v35, %v8504_v36  ;;  %v10069_v35 = vld [vmem:[#allocation6 + $0x814] sm:$0xf]  ;;  %v8636_v36 = vld [vmem:[#allocation6 + $0x81c] sm:$0xf0] }
 0x25a   :  { %v8459_v12 = vor.u32 %v10024_v53, %v8456_v1  ;;  %4671 = vmatpush.bf16.msrb.mxu1 %v8503_v60  ;;  %v8622_v60 = vld [vmem:[#allocation6 + $0x7f8] sm:$0xf]  ;;  %v10067_v53 = vld [vmem:[#allocation6 + $0x800] sm:$0xf0]  ;;  %v10009_v1 = vld [vmem:[#allocation6 + $0x634] sm:$0xf] }
 0x25b   :  { %4660 = vmatpush.bf16.msrb.mxu0 %v8371_v59  ;;  %v8543_v59 = vor.u32 %v10045_v56, %v8540_v49  ;;  %v8623_v45 = vor.u32 %v10067_v53, %v8622_v60  ;;  %v8399_v14 = vor.u32 %v10009_v1, %v8396_v2  ;;  %v8492_v49 = vld [vmem:[#allocation6 + $0x6fc] sm:$0xf0]  ;;  %v8574_v53 = vld [vmem:[#allocation6 + $0x798] sm:$0xf]  ;;  %v10055_v1 = vld [vmem:[#allocation6 + $0x7a0] sm:$0xf0] }
 0x25c   :  { %3995 = vmatmul.bf16.vlgmr.msra.gmra.mxu3 %v10476_v20  ;;  %v8742_v2 = vld [vmem:[#allocation6 + $0x8e8] sm:$0xf] }
 0x25d   :  { %4683 = vmatpush.bf16.msrb.mxu2 %v8623_v45  ;;  %v8575_v45 = vor.u32 %v10055_v1, %v8574_v53  ;;  %v10066_v1 = vld [vmem:[#allocation6 + $0x7fc] sm:$0xf] }
 0x25e   :  { %4672 = vmatpush.bf16.msrb.mxu1 %v8491_v39  ;;  %v8528_v39 = vld [vmem:[#allocation6 + $0x744] sm:$0xf0] }
 0x25f   :  { %v3186_v13 = vpop.f32.mrf.mxu3  ;;  %4709 = vmatpush.bf16.msra.mxu0 %v8459_v12  ;;  %v8531_v16 = vor.u32 %v10042_v41, %v8528_v39  ;;  %v10097_v41 = vld [vmem:[#allocation6 + $0x8f0] sm:$0xf0]  ;;  %v10030_v39 = vld [vmem:[#allocation6 + $0x6dc] sm:$0xf] }
 0x260   :  { %v10691_v61 = vadd.f32 %v3186_v13, %v3173_v37  ;;  %v10693_v37 = vpop.f32.mrf.mxu2  ;;  %v8411_v13 = vor.u32 %v10012_v46, %v8408_v34  ;;  %v8586_v46 = vld [vmem:[#allocation6 + $0x7b0] sm:$0xf]  ;;  %v10058_v34 = vld [vmem:[#allocation6 + $0x7b8] sm:$0xf0] }
 0x261   :  { %v8587_v56 = vor.u32 %v10058_v34, %v8586_v46 }
 0x262   :  { %4673 = vmatpush.bf16.msrb.mxu1 %v8479_v40  ;;  %v10698_v40 = vpop.f32.mrf.mxu0 }
 0x263   :  { %4710 = vmatpush.bf16.msra.mxu0 %v8447_v31  ;;  %v8610_v31 = vld [vmem:[#allocation6 + $0x7e0] sm:$0xf] }
 0x264   :  { %v8611_v21 = vor.u32 %v10064_v19, %v8610_v31  ;;  %v8562_v19 = vld [vmem:[#allocation6 + $0x780] sm:$0xf] }
 0x266   :  { %4674 = vmatpush.bf16.msrb.mxu1 %v8467_v58  ;;  %4684 = vmatpush.bf16.msrb.mxu2 %v8611_v21  ;;  %v10003_v58 = vld [vmem:[#allocation6 + $0x604] sm:$0xf]  ;;  %v10052_v21 = vld [vmem:[#allocation6 + $0x788] sm:$0xf0] }
 0x267   :  { %4711 = vmatpush.bf16.msra.mxu0 %v8435_v9  ;;  %v10695_v54 = vpop.f32.mrf.mxu3  ;;  %v8516_v9 = vld [vmem:[#allocation6 + $0x72c] sm:$0xf0] }
 0x268   :  { %v8519_v32 = vor.u32 %v10039_v25, %v8516_v9  ;;  %v8563_v25 = vor.u32 %v10052_v21, %v8562_v19  ;;  %v8648_v9 = vld [vmem:[#allocation6 + $0x834] sm:$0xf0]  ;;  %v8612_v19 = vld [vmem:[#allocation6 + $0x7ec] sm:$0xf0] }
 0x26a   :  { %4723 = vmatpush.bf16.msra.mxu1 %v8555_v23  ;;  %4685 = vmatpush.bf16.msrb.mxu2 %v8599_v48 }
 0x26b   :  { %4712 = vmatpush.bf16.msra.mxu0 %v8423_v29  ;;  %v8372_v29 = vld [vmem:[#allocation6 + $0x60c] sm:$0xf0] }
 0x26c   :  { %v8375_v23 = vor.u32 %v10003_v58, %v8372_v29  ;;  %v8468_v58 = vld [vmem:[#allocation6 + $0x6cc] sm:$0xf0] }
 0x26d   :  { %v8471_v29 = vor.u32 %v10027_v10, %v8468_v58 }
 0x26e   :  { %4724 = vmatpush.bf16.msra.mxu1 %v8543_v59  ;;  %4686 = vmatpush.bf16.msrb.mxu2 %v8587_v56  ;;  %v8639_v56 = vor.u32 %v10069_v35, %v8636_v36  ;;  %v8600_v35 = vld [vmem:[#allocation6 + $0x7d4] sm:$0xf0] }
 0x26f   :  { %4713 = vmatpush.bf16.msra.mxu0 %v8411_v13  ;;  %v10033_v13 = vld [vmem:[#allocation6 + $0x6f4] sm:$0xf]  ;;  %v3856_v60 = vpop.f32.mrf.mxu1 }
 0x270   :  { %v8495_v59 = vor.u32 %v10033_v13, %v8492_v49  ;;  %v10091_v13 = vld [vmem:[#allocation6 + $0x8c0] sm:$0xf0] }
 0x272   :  { %4725 = vmatpush.bf16.msra.mxu1 %v8531_v16  ;;  %4687 = vmatpush.bf16.msrb.mxu2 %v8575_v45  ;;  %v8480_v16 = vld [vmem:[#allocation6 + $0x6e4] sm:$0xf0] }
 0x273   :  { %v3228_v38 = vpop.f32.mrf.mxu2  ;;  %4714 = vmatpush.bf16.msra.mxu0 %v8399_v14  ;;  %v8743_v14 = vor.u32 %v10097_v41, %v8742_v2  ;;  %v8483_v31 = vor.u32 %v10030_v39, %v8480_v16  ;;  %v8624_v45 = vld [vmem:[#allocation6 + $0x804] sm:$0xf0]  ;;  %v10088_v16 = vld [vmem:[#allocation6 + $0x8a8] sm:$0xf0] }
 0x274   :  { %v3229_v12 = vadd.f32 %v3228_v38, %v10686_v63  ;;  %v8387_v63 = vor.u32 %v10006_v50, %v8384_v55  ;;  %v3842_v38 = vpop.f32.mrf.mxu0  ;;  %v8627_v39 = vor.u32 %v10066_v1, %v8624_v45  ;;  %v8450_v45 = vld [vmem:[#allocation6 + $0x698] sm:$0xf] }
 0x275   :  { %4695 = vmatpush.bf16.msrb.mxu3 %v8743_v14  ;;  %v8706_v14 = vld [vmem:[#allocation6 + $0x8a0] sm:$0xf] }
 0x276   :  { %4726 = vmatpush.bf16.msra.mxu1 %v8519_v32  ;;  %v8730_v32 = vld [vmem:[#allocation6 + $0x8d0] sm:$0xf]  ;;  %4688 = vmatpush.bf16.msrb.mxu2 %v8563_v25 }
 0x277   :  { %4715 = vmatpush.bf16.msra.mxu0 %v8387_v63  ;;  %v10072_v63 = vld [vmem:[#allocation6 + $0x82c] sm:$0xf]  ;;  %v8731_v48 = vor.u32 %v10094_v52, %v8730_v32  ;;  %v3858_v34 = vpop.f32.mrf.mxu1  ;;  %v10085_v32 = vld [vmem:[#allocation6 + $0x890] sm:$0xf0] }
 0x279   :  { %4696 = vmatpush.bf16.msrb.mxu3 %v8731_v48 }
 0x27a   :  { %4727 = vmatpush.bf16.msra.mxu1 %v8507_v0  ;;  %v8718_v0 = vld [vmem:[#allocation6 + $0x8b8] sm:$0xf] }
 0x27b   :  { %4716 = vmatpush.bf16.msra.mxu0 %v8375_v23  ;;  %v10706_v50 = vpop.f32.mrf.mxu2  ;;  %v8719_v49 = vor.u32 %v10091_v13, %v8718_v0  ;;  %v10082_v13 = vld [vmem:[#allocation6 + $0x878] sm:$0xf0] }
 0x27c   :  { %v3844_v23 = vpop.f32.mrf.mxu0 }
 0x27d   :  { %4697 = vmatpush.bf16.msrb.mxu3 %v8719_v49 }
 0x27e   :  { %4728 = vmatpush.bf16.msra.mxu1 %v8495_v59 }
 0x27f   :  { %v3242_v24 = vpop.f32.mrf.mxu3 }
 0x280   :  { %v10702_v8 = vadd.f32 %v3242_v24, %v3229_v12  ;;  %v10704_v12 = vld [vmem:[#allocation4 + $0x8] sm:$0xf]  ;;  %v8651_v24 = vor.u32 %v10072_v63, %v8648_v9 }
 0x281   :  { %v3345_v55 = vperm.slane %v10704_v12, 0  ;;  %v3346_v63 = vperm.slane %v10704_v12, 1 }
 0x282   :  { %4729 = vmatpush.bf16.msra.mxu1 %v8483_v31  ;;  %4737 = vmatpush.bf16.msra.mxu2 %v8651_v24  ;;  %v8707_v31 = vor.u32 %v10088_v16, %v8706_v14  ;;  %v8694_v24 = vld [vmem:[#allocation6 + $0x888] sm:$0xf]  ;;  %v10023_v16 = vld [vmem:[#allocation6 + $0x6a0] sm:$0xf0] }
 0x283   :  { %v3843_v46 = vadd.f32 %v3842_v38, %v3345_v55  ;;  %v3845_v41 = vadd.f32 %v3844_v23, %v3345_v55  ;;  %v10063_v38 = vld [vmem:[#allocation6 + $0x7e4] sm:$0xf]  ;;  %v8695_v10 = vor.u32 %v10085_v32, %v8694_v24  ;;  %v10060_v23 = vld [vmem:[#allocation6 + $0x7cc] sm:$0xf]  ;;  %v8451_v24 = vor.u32 %v10023_v16, %v8450_v45  ;;  %v8438_v32 = vld [vmem:[#allocation6 + $0x680] sm:$0xf] }
 0x284   :  { %4698 = vmatpush.bf16.msrb.mxu3 %v8707_v31  ;;  %v8615_v9 = vor.u32 %v10063_v38, %v8612_v19  ;;  %v3898_v52 = vpop.f32.mrf.mxu0  ;;  %v8670_v38 = vld [vmem:[#allocation6 + $0x858] sm:$0xf]  ;;  %v10079_v19 = vld [vmem:[#allocation6 + $0x860] sm:$0xf0] }
 0x285   :  { %v3857_v2 = vadd.f32 %v3856_v60, %v3843_v46  ;;  %v3859_v25 = vadd.f32 %v3858_v34, %v3845_v41  ;;  %v8462_v60 = vld [vmem:[#allocation6 + $0x6b0] sm:$0xf]  ;;  %v8603_v34 = vor.u32 %v10060_v23, %v8600_v35  ;;  %v8588_v41 = vld [vmem:[#allocation6 + $0x7bc] sm:$0xf0]  ;;  %v10076_v35 = vld [vmem:[#allocation6 + $0x848] sm:$0xf0] }
 0x286   :  { %4730 = vmatpush.bf16.msra.mxu1 %v8471_v29  ;;  %4738 = vmatpush.bf16.msra.mxu2 %v8639_v56  ;;  %v10026_v29 = vld [vmem:[#allocation6 + $0x6b8] sm:$0xf0]  ;;  %v8682_v56 = vld [vmem:[#allocation6 + $0x870] sm:$0xf]  ;;  %v8658_v23 = vld [vmem:[#allocation6 + $0x840] sm:$0xf] }
 0x287   :  { %v10709_v59 = vpop.f32.mrf.mxu3  ;;  %v8683_v49 = vor.u32 %v10082_v13, %v8682_v56  ;;  %v8463_v1 = vor.u32 %v10026_v29, %v8462_v60  ;;  %v8576_v60 = vld [vmem:[#allocation6 + $0x7a4] sm:$0xf0]  ;;  %v10020_v29 = vld [vmem:[#allocation6 + $0x688] sm:$0xf0]  ;;  %v10051_v45 = vld [vmem:[#allocation6 + $0x784] sm:$0xf] }
 0x288   :  { %4699 = vmatpush.bf16.msrb.mxu3 %v8695_v10  ;;  %v10054_v10 = vld [vmem:[#allocation6 + $0x79c] sm:$0xf]  ;;  %v8426_v13 = vld [vmem:[#allocation6 + $0x668] sm:$0xf] }
 0x28a   :  { %4739 = vmatpush.bf16.msra.mxu2 %v8627_v39 }
 0x28c   :  { %4700 = vmatpush.bf16.msrb.mxu3 %v8683_v49 }
 0x28e   :  { %4740 = vmatpush.bf16.msra.mxu2 %v8615_v9  ;;  %v3900_v9 = vpop.f32.mrf.mxu0 }
 0x28f   :  { %v3912_v48 = vpop.f32.mrf.mxu1 }
 0x292   :  { %4741 = vmatpush.bf16.msra.mxu2 %v8603_v34  ;;  %v8744_v34 = vld [vmem:[#allocation6 + $0x8f4] sm:$0xf0] }
 0x293   :  { %v3870_v53 = vpop.f32.mrf.mxu2 }
 0x294   :  { %v3871_v21 = vadd.f32 %v3870_v53, %v3857_v2  ;;  %v10057_v2 = vld [vmem:[#allocation6 + $0x7b4] sm:$0xf] }
 0x295   :  { %v8591_v31 = vor.u32 %v10057_v2, %v8588_v41  ;;  %v8564_v2 = vld [vmem:[#allocation6 + $0x78c] sm:$0xf0] }
 0x296   :  { %v4001_v36 = vmax.f32 %v3871_v21, 0.0  ;;  %v8671_v21 = vor.u32 %v10079_v19, %v8670_v38  ;;  %v8558_v41 = vld [vmem:[#allocation6 + $0x770] sm:$0xf]  ;;  %v8567_v16 = vor.u32 %v10051_v45, %v8564_v2  ;;  %v8732_v38 = vld [vmem:[#allocation6 + $0x8dc] sm:$0xf0] }
 0x297   :  { %4742 = vmatpush.bf16.msra.mxu2 %v8591_v31  ;;  %v10093_v31 = vld [vmem:[#allocation6 + $0x8d4] sm:$0xf] }
 0x298   :  { %4701 = vmatpush.bf16.msrb.mxu3 %v8671_v21  ;;  %v8735_v21 = vor.u32 %v10093_v31, %v8732_v38  ;;  %v8696_v31 = vld [vmem:[#allocation6 + $0x894] sm:$0xf0]  ;;  %v3954_v38 = vpop.f32.mrf.mxu0 }
 0x29b   :  { %v3872_v55 = vpop.f32.mrf.mxu2 }
 0x29c   :  { %v3873_v0 = vadd.f32 %v3872_v55, %v3859_v25 }
 0x29e   :  { %v4005_v53 = vmax.f32 %v3873_v0, 0.0  ;;  %v8659_v0 = vor.u32 %v10076_v35, %v8658_v23 }
 0x29f   :  { %v3884_v58 = vpop.f32.mrf.mxu3 }
 0x2a0   :  { %v3885_v46 = vadd.f32 %v3884_v58, %v3346_v63  ;;  %v10712_v39 = vpack.c.bf16 %v4005_v53, %v4001_v36  ;;  %v3914_v36 = vpop.f32.mrf.mxu1  ;;  %v8439_v53 = vor.u32 %v10020_v29, %v8438_v32  ;;  %4702 = vmatpush.bf16.msrb.mxu3 %v8659_v0  ;;  %v8720_v29 = vld [vmem:[#allocation6 + $0x8c4] sm:$0xf0] }
 0x2a2   :  { %v3899_v14 = vadd.f32 %v3898_v52, %v3885_v46  ;;  %4661 = vmatmul.bf16.vlgmr.msrb.gmra.mxu0 %v10712_v39  ;;  %v8579_v52 = vor.u32 %v10054_v10, %v8576_v60  ;;  %v10096_v46 = vld [vmem:[#allocation6 + $0x8ec] sm:$0xf]  ;;  %v10014_v10 = vld [vmem:[#allocation6 + $0x658] sm:$0xf0]  ;;  %v8546_v60 = vld [vmem:[#allocation6 + $0x758] sm:$0xf] }
 0x2a3   :  { %4765 = vmatpush.bf16.msrb.mxu0 %v8463_v1  ;;  %v8747_v49 = vor.u32 %v10096_v46, %v8744_v34  ;;  %v10017_v1 = vld [vmem:[#allocation6 + $0x670] sm:$0xf0]  ;;  %v10011_v46 = vld [vmem:[#allocation6 + $0x640] sm:$0xf0]  ;;  %v8534_v34 = vld [vmem:[#allocation6 + $0x740] sm:$0xf] }
 0x2a4   :  { %v3913_v55 = vadd.f32 %v3912_v48, %v3899_v14  ;;  %4743 = vmatpush.bf16.msra.mxu2 %v8579_v52  ;;  %v10050_v14 = vld [vmem:[#allocation6 + $0x778] sm:$0xf0] }
 0x2a5   :  { %4751 = vmatpush.bf16.msra.mxu3 %v8747_v49  ;;  %v8708_v49 = vld [vmem:[#allocation6 + $0x8ac] sm:$0xf0] }
 0x2a6   :  { %v4002_v48 = vmax.f32 %v3913_v55, 0.0  ;;  %v10090_v55 = vld [vmem:[#allocation6 + $0x8bc] sm:$0xf] }
 0x2a7   :  { %v3886_v25 = vpop.f32.mrf.mxu3  ;;  %4766 = vmatpush.bf16.msrb.mxu0 %v8451_v24  ;;  %v8414_v24 = vld [vmem:[#allocation6 + $0x650] sm:$0xf]  ;;  %v8723_v52 = vor.u32 %v10090_v55, %v8720_v29  ;;  %v10038_v55 = vld [vmem:[#allocation6 + $0x718] sm:$0xf0]  ;;  %v10081_v29 = vld [vmem:[#allocation6 + $0x874] sm:$0xf] }
 0x2a8   :  { %v3887_v58 = vadd.f32 %v3886_v25, %v3346_v63  ;;  %4744 = vmatpush.bf16.msra.mxu2 %v8567_v16  ;;  %v8427_v25 = vor.u32 %v10017_v1, %v8426_v13  ;;  %v8415_v23 = vor.u32 %v10014_v10, %v8414_v24  ;;  %v10087_v13 = vld [vmem:[#allocation6 + $0x8a4] sm:$0xf]  ;;  %v3347_v1 = vperm.slane %v10704_v12, 2  ;;  %v10084_v16 = vld [vmem:[#allocation6 + $0x88c] sm:$0xf] }
 0x2a9   :  { %4752 = vmatpush.bf16.msra.mxu3 %v8735_v21  ;;  %v8378_v24 = vld [vmem:[#allocation6 + $0x608] sm:$0xf] }
 0x2aa   :  { %v3901_v56 = vadd.f32 %v3900_v9, %v3887_v58  ;;  %v8559_v9 = vor.u32 %v10050_v14, %v8558_v41  ;;  %v10047_v58 = vld [vmem:[#allocation6 + $0x760] sm:$0xf0]  ;;  %v8522_v41 = vld [vmem:[#allocation6 + $0x728] sm:$0xf]  ;;  %v10041_v14 = vld [vmem:[#allocation6 + $0x730] sm:$0xf0] }
 0x2ab   :  { %4767 = vmatpush.bf16.msrb.mxu0 %v8439_v53  ;;  %v8547_v35 = vor.u32 %v10047_v58, %v8546_v60  ;;  %v8711_v53 = vor.u32 %v10087_v13, %v8708_v49  ;;  %v10005_v60 = vld [vmem:[#allocation6 + $0x610] sm:$0xf0]  ;;  %v8510_v58 = vld [vmem:[#allocation6 + $0x710] sm:$0xf]  ;;  %v10078_v49 = vld [vmem:[#allocation6 + $0x85c] sm:$0xf] }
 0x2ac   :  { %v3915_v63 = vadd.f32 %v3914_v36, %v3901_v56  ;;  %v8402_v36 = vld [vmem:[#allocation6 + $0x638] sm:$0xf]  ;;  %v10044_v56 = vld [vmem:[#allocation6 + $0x748] sm:$0xf0] }
 0x2ad   :  { %4753 = vmatpush.bf16.msra.mxu3 %v8723_v52  ;;  %v8403_v45 = vor.u32 %v10011_v46, %v8402_v36  ;;  %v8535_v2 = vor.u32 %v10044_v56, %v8534_v34  ;;  %v8684_v52 = vld [vmem:[#allocation6 + $0x87c] sm:$0xf0]  ;;  %v8379_v46 = vor.u32 %v10005_v60, %v8378_v24  ;;  %v8511_v34 = vor.u32 %v10038_v55, %v8510_v58  ;;  %v10035_v56 = vld [vmem:[#allocation6 + $0x700] sm:$0xf0]  ;;  %v8474_v60 = vld [vmem:[#allocation6 + $0x6c8] sm:$0xf] }
 0x2ae   :  { %v4006_v19 = vmax.f32 %v3915_v63, 0.0  ;;  %v10008_v63 = vld [vmem:[#allocation6 + $0x628] sm:$0xf0]  ;;  %v10029_v58 = vld [vmem:[#allocation6 + $0x6d0] sm:$0xf0] }
 0x2af   :  { %4768 = vmatpush.bf16.msrb.mxu0 %v8427_v25 }
 0x2b0   :  { %v10715_v32 = vpack.c.bf16 %v4006_v19, %v4002_v48  ;;  %v8390_v48 = vld [vmem:[#allocation6 + $0x620] sm:$0xf]  ;;  %v8699_v19 = vor.u32 %v10084_v16, %v8696_v31  ;;  %v10032_v16 = vld [vmem:[#allocation6 + $0x6e8] sm:$0xf0] }
 0x2b1   :  { %4754 = vmatpush.bf16.msra.mxu3 %v8711_v53  ;;  %v8391_v25 = vor.u32 %v10008_v63, %v8390_v48  ;;  %v8672_v53 = vld [vmem:[#allocation6 + $0x864] sm:$0xf0] }
 0x2b2   :  { %4675 = vmatmul.bf16.vlgmr.msrb.gmra.mxu1 %v10715_v32  ;;  %4717 = vmatmul.bf16.vlgmr.msra.gmra.mxu0 %v10712_v39 }
 0x2b3   :  { %4779 = vmatpush.bf16.msrb.mxu1 %v8559_v9  ;;  %v3926_v0 = vpop.f32.mrf.mxu2  ;;  %4769 = vmatpush.bf16.msrb.mxu0 %v8415_v23  ;;  %v8523_v9 = vor.u32 %v10041_v14, %v8522_v41  ;;  %v3956_v41 = vpop.f32.mrf.mxu0  ;;  %v8486_v14 = vld [vmem:[#allocation6 + $0x6e0] sm:$0xf] }
 0x2b4   :  { %v3927_v21 = vadd.f32 %v3926_v0, %v3347_v1  ;;  %v8498_v0 = vld [vmem:[#allocation6 + $0x6f8] sm:$0xf]  ;;  %v8487_v24 = vor.u32 %v10032_v16, %v8486_v14  ;;  %v8618_v14 = vld [vmem:[#allocation6 + $0x7e8] sm:$0xf] }
 0x2b5   :  { %4755 = vmatpush.bf16.msra.mxu3 %v8699_v19  ;;  %v8499_v48 = vor.u32 %v10035_v56, %v8498_v0  ;;  %v10075_v19 = vld [vmem:[#allocation6 + $0x844] sm:$0xf]  ;;  %v8630_v0 = vld [vmem:[#allocation6 + $0x800] sm:$0xf] }
 0x2b7   :  { %4780 = vmatpush.bf16.msrb.mxu1 %v8547_v35  ;;  %4770 = vmatpush.bf16.msrb.mxu0 %v8403_v45  ;;  %v8687_v35 = vor.u32 %v10081_v29, %v8684_v52  ;;  %v8675_v45 = vor.u32 %v10078_v49, %v8672_v53  ;;  %v8994_v49 = vld [vmem:[#allocation2 + $0x7b0] sm:$0xf] }
 0x2b8   :  { %v10161_v53 = vld [vmem:[#allocation2 + $0x7ec] sm:$0xf0] }
 0x2b9   :  { %4756 = vmatpush.bf16.msra.mxu3 %v8687_v35  ;;  %v8642_v35 = vld [vmem:[#allocation6 + $0x818] sm:$0xf] }
 0x2bb   :  { %4781 = vmatpush.bf16.msrb.mxu1 %v8535_v2  ;;  %v3928_v23 = vpop.f32.mrf.mxu2  ;;  %4771 = vmatpush.bf16.msrb.mxu0 %v8391_v25 }
 0x2bc   :  { %v3929_v13 = vadd.f32 %v3928_v23, %v3347_v1  ;;  %v8475_v23 = vor.u32 %v10029_v58, %v8474_v60  ;;  %v8606_v60 = vld [vmem:[#allocation6 + $0x7d0] sm:$0xf] }
 0x2bd   :  { %4757 = vmatpush.bf16.msra.mxu3 %v8675_v45  ;;  %v8995_v45 = vor.u32 %v10161_v53, %v8994_v49  ;;  %v8946_v49 = vld [vmem:[#allocation2 + $0x630] sm:$0xf] }
 0x2be   :  { %v10149_v53 = vld [vmem:[#allocation2 + $0x66c] sm:$0xf0] }
 0x2bf   :  { %v3940_v10 = vpop.f32.mrf.mxu3  ;;  %4782 = vmatpush.bf16.msrb.mxu1 %v8523_v9  ;;  %4772 = vmatpush.bf16.msrb.mxu0 %v8379_v46  ;;  %v10129_v46 = vld [vmem:[#allocation2 + $0x3ec] sm:$0xf0] }
 0x2c0   :  { %v3941_v36 = vadd.f32 %v3940_v10, %v3927_v21  ;;  %v8660_v21 = vld [vmem:[#allocation6 + $0x84c] sm:$0xf0] }
 0x2c1   :  { %v8663_v1 = vor.u32 %v10075_v19, %v8660_v21  ;;  %v8654_v10 = vld [vmem:[#allocation6 + $0x830] sm:$0xf]  ;;  %v10065_v19 = vld [vmem:[#allocation6 + $0x7f0] sm:$0xf0]  ;;  %v8978_v21 = vld [vmem:[#allocation2 + $0x730] sm:$0xf] }
 0x2c2   :  { %4731 = vmatmul.bf16.vlgmr.msra.gmra.mxu1 %v10715_v32  ;;  %v3955_v2 = vadd.f32 %v3954_v38, %v3941_v36  ;;  %4773 = vmatmul.bf16.vlgmr.msrb.gmra.mxu0 %v10712_v39  ;;  %v10074_v38 = vld [vmem:[#allocation6 + $0x838] sm:$0xf0]  ;;  %v10071_v36 = vld [vmem:[#allocation6 + $0x820] sm:$0xf0]  ;;  %v8866_v39 = vld [vmem:[#allocation2 + $0x3b0] sm:$0xf] }
 0x2c3   :  { %4783 = vmatpush.bf16.msrb.mxu1 %v8511_v34  ;;  %4758 = vmatpush.bf16.msra.mxu3 %v8663_v1  ;;  %v8655_v29 = vor.u32 %v10074_v38, %v8654_v10  ;;  %v8643_v34 = vor.u32 %v10071_v36, %v8642_v35  ;;  %v8867_v56 = vor.u32 %v10129_v46, %v8866_v39  ;;  %v10157_v1 = vld [vmem:[#allocation2 + $0x76c] sm:$0xf0] }
 0x2c4   :  { %v4003_v25 = vmax.f32 %v3955_v2, 0.0  ;;  %v3968_v2 = vpop.f32.mrf.mxu1  ;;  %v10121_v10 = vld [vmem:[#allocation2 + $0x2ec] sm:$0xf0]  ;;  %v8619_v38 = vor.u32 %v10065_v19, %v8618_v14 }
 0x2c5   :  { %5413 = vmatpush.bf16.msra.mxu0 %v8867_v56  ;;  %v8818_v39 = vld [vmem:[#allocation2 + $0x230] sm:$0xf] }
 0x2c6   :  { %v10117_v46 = vld [vmem:[#allocation2 + $0x26c] sm:$0xf0] }
 0x2c7   :  { %v3942_v63 = vpop.f32.mrf.mxu3  ;;  %4784 = vmatpush.bf16.msrb.mxu1 %v8499_v48  ;;  %v8850_v48 = vld [vmem:[#allocation2 + $0x330] sm:$0xf] }
 0x2c8   :  { %v3943_v31 = vadd.f32 %v3942_v63, %v3929_v13  ;;  %v10068_v13 = vld [vmem:[#allocation6 + $0x808] sm:$0xf0]  ;;  %v10125_v63 = vld [vmem:[#allocation2 + $0x36c] sm:$0xf0] }
 0x2c9   :  { %v8851_v16 = vor.u32 %v10125_v63, %v8850_v48  ;;  %v8947_v48 = vor.u32 %v10149_v53, %v8946_v49  ;;  %v8582_v19 = vld [vmem:[#allocation6 + $0x7a0] sm:$0xf] }
 0x2ca   :  { %v3957_v9 = vadd.f32 %v3956_v41, %v3943_v31  ;;  %v8631_v41 = vor.u32 %v10068_v13, %v8630_v0  ;;  %v8819_v0 = vor.u32 %v10117_v46, %v8818_v39  ;;  %v10059_v13 = vld [vmem:[#allocation6 + $0x7c0] sm:$0xf0]  ;;  %v10053_v46 = vld [vmem:[#allocation6 + $0x790] sm:$0xf0] }
 0x2cb   :  { %4785 = vmatpush.bf16.msrb.mxu1 %v8487_v24  ;;  %5414 = vmatpush.bf16.msra.mxu0 %v8851_v16  ;;  %v8834_v24 = vld [vmem:[#allocation2 + $0x2b0] sm:$0xf] }
 0x2cc   :  { %v4007_v55 = vmax.f32 %v3957_v9, 0.0  ;;  %v8979_v9 = vor.u32 %v10157_v1, %v8978_v21  ;;  %v8835_v58 = vor.u32 %v10121_v10, %v8834_v24  ;;  %v3970_v56 = vpop.f32.mrf.mxu1  ;;  %v10056_v1 = vld [vmem:[#allocation6 + $0x7a8] sm:$0xf0]  ;;  %v10145_v24 = vld [vmem:[#allocation2 + $0x5ec] sm:$0xf0] }
 0x2ce   :  { %v10722_v52 = vpack.c.bf16 %v4007_v55, %v4003_v25  ;;  %v3348_v25 = vperm.slane %v10704_v12, 3  ;;  %v8962_v55 = vld [vmem:[#allocation2 + $0x6b0] sm:$0xf] }
 0x2cf   :  { %4786 = vmatpush.bf16.msrb.mxu1 %v8475_v23  ;;  %5415 = vmatpush.bf16.msra.mxu0 %v8835_v58  ;;  %v8786_v58 = vld [vmem:[#allocation2 + $0x130] sm:$0xf] }
 0x2d0   :  { %4689 = vmatmul.bf16.vlgmr.msrb.gmra.mxu2 %v10722_v52  ;;  %v3969_v23 = vadd.f32 %v3968_v2, %v3348_v25  ;;  %v8802_v2 = vld [vmem:[#allocation2 + $0x1b0] sm:$0xf]  ;;  %v3971_v14 = vadd.f32 %v3970_v56, %v3348_v25  ;;  %v10098_v25 = vld [vmem:[#allocation6 + $0x8f8] sm:$0xf0] }
 0x2d1   :  { %4793 = vmatpush.bf16.msrb.mxu2 %v8655_v29  ;;  %v10153_v29 = vld [vmem:[#allocation2 + $0x6ec] sm:$0xf0] }
 0x2d2   :  { %4787 = vmatmul.bf16.vlgmr.msrb.gmra.mxu1 %v10715_v32  ;;  %v10062_v32 = vld [vmem:[#allocation6 + $0x7d8] sm:$0xf0]  ;;  %v8963_v35 = vor.u32 %v10153_v29, %v8962_v55  ;;  %v8583_v29 = vor.u32 %v10056_v1, %v8582_v19  ;;  %v10137_v1 = vld [vmem:[#allocation2 + $0x4ec] sm:$0xf0] }
 0x2d3   :  { %v3982_v31 = vpop.f32.mrf.mxu2  ;;  %5427 = vmatpush.bf16.msra.mxu1 %v8995_v45  ;;  %v8607_v12 = vor.u32 %v10062_v32, %v8606_v60  ;;  %5416 = vmatpush.bf16.msra.mxu0 %v8819_v0  ;;  %v10109_v32 = vld [vmem:[#allocation2 + $0x16c] sm:$0xf0] }
 0x2d4   :  { %v3983_v45 = vadd.f32 %v3982_v31, %v3969_v23  ;;  %v8750_v23 = vld [vmem:[#allocation6 + $0x8f0] sm:$0xf]  ;;  %v8787_v39 = vor.u32 %v10109_v32, %v8786_v58  ;;  %v10101_v58 = vld [vmem:[#allocation2 + $0x6c] sm:$0xf0]  ;;  %v10092_v32 = vld [vmem:[#allocation6 + $0x8c8] sm:$0xf0] }
 0x2d5   :  { %4794 = vmatpush.bf16.msrb.mxu2 %v8643_v34  ;;  %v8594_v34 = vld [vmem:[#allocation6 + $0x7b8] sm:$0xf]  ;;  %v8751_v53 = vor.u32 %v10098_v25, %v8750_v23  ;;  %v10133_v23 = vld [vmem:[#allocation2 + $0x46c] sm:$0xf0] }
 0x2d6   :  { %v8595_v16 = vor.u32 %v10059_v13, %v8594_v34  ;;  %v10141_v34 = vld [vmem:[#allocation2 + $0x56c] sm:$0xf0] }
 0x2d7   :  { %5428 = vmatpush.bf16.msra.mxu1 %v8979_v9  ;;  %v8930_v9 = vld [vmem:[#allocation2 + $0x5b0] sm:$0xf] }
 0x2d8   :  { %v8931_v31 = vor.u32 %v10145_v24, %v8930_v9  ;;  %v9122_v13 = vld [vmem:[#allocation2 + $0xbb0] sm:$0xf] }
 0x2d9   :  { %4795 = vmatpush.bf16.msrb.mxu2 %v8631_v41  ;;  %v10113_v41 = vld [vmem:[#allocation2 + $0x1ec] sm:$0xf0] }
 0x2da   :  { %v8803_v21 = vor.u32 %v10113_v41, %v8802_v2  ;;  %v8738_v41 = vld [vmem:[#allocation6 + $0x8d8] sm:$0xf]  ;;  %v9106_v9 = vld [vmem:[#allocation2 + $0xb30] sm:$0xf] }
 0x2db   :  { %5429 = vmatpush.bf16.msra.mxu1 %v8963_v35  ;;  %v3984_v63 = vpop.f32.mrf.mxu2  ;;  %v8570_v35 = vld [vmem:[#allocation6 + $0x788] sm:$0xf]  ;;  %v10189_v24 = vld [vmem:[#allocation2 + $0xb6c] sm:$0xf0] }
 0x2dc   :  { %v3985_v10 = vadd.f32 %v3984_v63, %v3971_v14  ;;  %5417 = vmatpush.bf16.msra.mxu0 %v8803_v21  ;;  %v8571_v2 = vor.u32 %v10053_v46, %v8570_v35  ;;  %v10095_v14 = vld [vmem:[#allocation6 + $0x8e0] sm:$0xf0]  ;;  %v8898_v21 = vld [vmem:[#allocation2 + $0x4b0] sm:$0xf]  ;;  %v9107_v25 = vor.u32 %v10189_v24, %v9106_v9  ;;  %v8702_v9 = vld [vmem:[#allocation6 + $0x890] sm:$0xf] }
 0x2dd   :  { %4796 = vmatpush.bf16.msrb.mxu2 %v8619_v38  ;;  %v8996_v46 = vld [vmem:[#allocation2 + $0x7f0] sm:$0xf0]  ;;  %v10086_v24 = vld [vmem:[#allocation6 + $0x898] sm:$0xf0] }
 0x2df   :  { %v3996_v36 = vpop.f32.mrf.mxu3  ;;  %5430 = vmatpush.bf16.msra.mxu1 %v8947_v48  ;;  %v10105_v48 = vld [vmem:[#allocation2 + $0xec] sm:$0xf0] }
 0x2e0   :  { %4745 = vmatmul.bf16.vlgmr.msra.gmra.mxu2 %v10722_v52  ;;  %v3997_v38 = vadd.f32 %v3996_v36, %v3983_v45  ;;  %v10193_v36 = vld [vmem:[#allocation2 + $0xbec] sm:$0xf0]  ;;  %5418 = vmatpush.bf16.msra.mxu0 %v8787_v39  ;;  %v10159_v39 = vld [vmem:[#allocation2 + $0x7b4] sm:$0xf] }
 0x2e1   :  { %4797 = vmatpush.bf16.msrb.mxu2 %v8607_v12  ;;  %v8914_v12 = vld [vmem:[#allocation2 + $0x530] sm:$0xf]  ;;  %v9123_v19 = vor.u32 %v10193_v36, %v9122_v13  ;;  %v10191_v13 = vld [vmem:[#allocation2 + $0xbb4] sm:$0xf] }
 0x2e2   :  { %v4004_v0 = vmax.f32 %v3997_v38, 0.0  ;;  %v8915_v49 = vor.u32 %v10141_v34, %v8914_v12  ;;  %v8770_v45 = vld [vmem:[#allocation2 + $0xb0] sm:$0xf]  ;;  %v8739_v38 = vor.u32 %v10095_v14, %v8738_v41  ;;  %v9124_v36 = vld [vmem:[#allocation2 + $0xbf0] sm:$0xf0] }
 0x2e3   :  { %5431 = vmatpush.bf16.msra.mxu1 %v8931_v31  ;;  %v8726_v31 = vld [vmem:[#allocation6 + $0x8c0] sm:$0xf]  ;;  %v8980_v41 = vld [vmem:[#allocation2 + $0x770] sm:$0xf0] }
 0x2e4   :  { %v9090_v12 = vld [vmem:[#allocation2 + $0xab0] sm:$0xf] }
 0x2e5   :  { %4798 = vmatpush.bf16.msrb.mxu2 %v8595_v16  ;;  %v8771_v16 = vor.u32 %v10105_v48, %v8770_v45  ;;  %v10185_v34 = vld [vmem:[#allocation2 + $0xaec] sm:$0xf0]  ;;  %v9127_v45 = vor.u32 %v10191_v13, %v9124_v36 }
 0x2e6   :  { %v9091_v48 = vor.u32 %v10185_v34, %v9090_v12  ;;  %v9074_v14 = vld [vmem:[#allocation2 + $0xa30] sm:$0xf]  ;;  %v10147_v34 = vld [vmem:[#allocation2 + $0x634] sm:$0xf] }
 0x2e7   :  { %v3998_v60 = vpop.f32.mrf.mxu3  ;;  %5432 = vmatpush.bf16.msra.mxu1 %v8915_v49  ;;  %5419 = vmatpush.bf16.msra.mxu0 %v8771_v16  ;;  %v8714_v49 = vld [vmem:[#allocation6 + $0x8a8] sm:$0xf]  ;;  %v10181_v16 = vld [vmem:[#allocation2 + $0xa6c] sm:$0xf0] }
 0x2e8   :  { %v3999_v55 = vadd.f32 %v3998_v60, %v3985_v10  ;;  %v8899_v10 = vor.u32 %v10137_v1, %v8898_v21  ;;  %v8754_v60 = vld [vmem:[#allocation2 + $0x30] sm:$0xf]  ;;  %v10187_v21 = vld [vmem:[#allocation2 + $0xb34] sm:$0xf] }
 0x2e9   :  { %4799 = vmatpush.bf16.msrb.mxu2 %v8583_v29  ;;  %v8882_v29 = vld [vmem:[#allocation2 + $0x430] sm:$0xf]  ;;  %v9108_v1 = vld [vmem:[#allocation2 + $0xb70] sm:$0xf0] }
 0x2ea   :  { %v4008_v56 = vmax.f32 %v3999_v55, 0.0  ;;  %v8755_v55 = vor.u32 %v10101_v58, %v8754_v60  ;;  %v8883_v35 = vor.u32 %v10133_v23, %v8882_v29  ;;  %v8964_v60 = vld [vmem:[#allocation2 + $0x6f0] sm:$0xf0]  ;;  %v9058_v58 = vld [vmem:[#allocation2 + $0x9b0] sm:$0xf]  ;;  %v8703_v29 = vor.u32 %v10086_v24, %v8702_v9 }
 0x2eb   :  { %5433 = vmatpush.bf16.msra.mxu1 %v8899_v10  ;;  %v9111_v10 = vor.u32 %v10187_v21, %v9108_v1  ;;  %v10183_v23 = vld [vmem:[#allocation2 + $0xab4] sm:$0xf]  ;;  %v10173_v13 = vld [vmem:[#allocation2 + $0x96c] sm:$0xf0] }
 0x2ec   :  { %v10728_v63 = vpack.c.bf16 %v4008_v56, %v4004_v0  ;;  %5420 = vmatpush.bf16.msra.mxu0 %v8755_v55  ;;  %v8999_v0 = vor.u32 %v10159_v39, %v8996_v46  ;;  %v8727_v56 = vor.u32 %v10092_v32, %v8726_v31  ;;  %v10151_v31 = vld [vmem:[#allocation2 + $0x6b4] sm:$0xf]  ;;  %v10177_v32 = vld [vmem:[#allocation2 + $0x9ec] sm:$0xf0] }
 0x2ed   :  { %4800 = vmatpush.bf16.msrb.mxu2 %v8571_v2  ;;  %v10155_v2 = vld [vmem:[#allocation2 + $0x734] sm:$0xf]  ;;  %v8967_v55 = vor.u32 %v10151_v31, %v8964_v60  ;;  %v9059_v12 = vor.u32 %v10177_v32, %v9058_v58  ;;  %v10169_v21 = vld [vmem:[#allocation2 + $0x8ec] sm:$0xf0]  ;;  %v10077_v31 = vld [vmem:[#allocation6 + $0x850] sm:$0xf0] }
 0x2ee   :  { %4703 = vmatmul.bf16.vlgmr.msrb.gmra.mxu3 %v10728_v63  ;;  %v10083_v39 = vld [vmem:[#allocation6 + $0x880] sm:$0xf0] }
 0x2ef   :  { %4807 = vmatpush.bf16.msrb.mxu3 %v8751_v53  ;;  %v10089_v53 = vld [vmem:[#allocation6 + $0x8b0] sm:$0xf0]  ;;  %5434 = vmatpush.bf16.msra.mxu1 %v8883_v35  ;;  %v8690_v35 = vld [vmem:[#allocation6 + $0x878] sm:$0xf]  ;;  %v10175_v24 = vld [vmem:[#allocation2 + $0x9b4] sm:$0xf] }
 0x2f0   :  { %4801 = vmatmul.bf16.vlgmr.msrb.gmra.mxu2 %v10722_v52  ;;  %5469 = vmatpush.bf16.msrb.mxu0 %v8999_v0  ;;  %v8715_v52 = vor.u32 %v10089_v53, %v8714_v49  ;;  %v8948_v0 = vld [vmem:[#allocation2 + $0x670] sm:$0xf0]  ;;  %v8691_v49 = vor.u32 %v10083_v39, %v8690_v35  ;;  %v10165_v35 = vld [vmem:[#allocation2 + $0x86c] sm:$0xf0]  ;;  %v8874_v39 = vld [vmem:[#allocation2 + $0x3b8] sm:$0xf] }
 0x2f1   :  { %5441 = vmatpush.bf16.msra.mxu2 %v9123_v19  ;;  %5421 = vmatmul.bf16.vlgmr.msra.gmra.mxu0 %v10457_v57  ;;  %v8983_v19 = vor.u32 %v10155_v2, %v8980_v41  ;;  %v8951_v36 = vor.u32 %v10147_v34, %v8948_v0  ;;  %v10179_v53 = vld [vmem:[#allocation2 + $0xa34] sm:$0xf]  ;;  %v10080_v2 = vld [vmem:[#allocation6 + $0x868] sm:$0xf0]  ;;  %v10130_v34 = vld [vmem:[#allocation2 + $0x3f4] sm:$0xf0] }
 0x2f2   :  { %5435 = vmatmul.bf16.vlgmr.msra.gmra.mxu1 %v10466_v5  ;;  %v10127_v60 = vld [vmem:[#allocation2 + $0x3b4] sm:$0xf] }
 0x2f3   :  { %4808 = vmatpush.bf16.msrb.mxu3 %v8739_v38  ;;  %5483 = vmatpush.bf16.msrb.mxu1 %v9127_v45  ;;  %v9075_v38 = vor.u32 %v10181_v16, %v9074_v14  ;;  %v9076_v45 = vld [vmem:[#allocation2 + $0xa70] sm:$0xf0] }
 0x2f4   :  { %5470 = vmatpush.bf16.msrb.mxu0 %v8983_v19  ;;  %v9079_v41 = vor.u32 %v10179_v53, %v9076_v45  ;;  %v10143_v16 = vld [vmem:[#allocation2 + $0x5b4] sm:$0xf] }
 0x2f5   :  { %5442 = vmatpush.bf16.msra.mxu2 %v9107_v25  ;;  %v9092_v25 = vld [vmem:[#allocation2 + $0xaf0] sm:$0xf0] }
 0x2f6   :  { %v9095_v46 = vor.u32 %v10183_v23, %v9092_v25  ;;  %v8932_v19 = vld [vmem:[#allocation2 + $0x5f0] sm:$0xf0]  ;;  %v9010_v25 = vld [vmem:[#allocation2 + $0x830] sm:$0xf] }
 0x2f7   :  { %4809 = vmatpush.bf16.msrb.mxu3 %v8727_v56  ;;  %5484 = vmatpush.bf16.msrb.mxu1 %v9111_v10  ;;  %v9042_v56 = vld [vmem:[#allocation2 + $0x930] sm:$0xf]  ;;  %v8935_v1 = vor.u32 %v10143_v16, %v8932_v19  ;;  %v9060_v10 = vld [vmem:[#allocation2 + $0x9f0] sm:$0xf0]  ;;  %v9011_v53 = vor.u32 %v10165_v35, %v9010_v25  ;;  %v10126_v19 = vld [vmem:[#allocation2 + $0x374] sm:$0xf0] }
 0x2f8   :  { %5471 = vmatpush.bf16.msrb.mxu0 %v8967_v55  ;;  %v9043_v14 = vor.u32 %v10173_v13, %v9042_v56  ;;  %v9063_v58 = vor.u32 %v10175_v24, %v9060_v10  ;;  %v8868_v55 = vld [vmem:[#allocation2 + $0x3f0] sm:$0xf0] }
 0x2f9   :  { %5443 = vmatpush.bf16.msra.mxu2 %v9091_v48  ;;  %v8678_v48 = vld [vmem:[#allocation6 + $0x860] sm:$0xf]  ;;  %v8916_v23 = vld [vmem:[#allocation2 + $0x570] sm:$0xf0]  ;;  %v8871_v13 = vor.u32 %v10127_v60, %v8868_v55  ;;  %v9130_v55 = vld [vmem:[#allocation2 + $0xbb8] sm:$0xf] }
 0x2fa   :  { %v8679_v9 = vor.u32 %v10080_v2, %v8678_v48  ;;  %v10171_v0 = vld [vmem:[#allocation2 + $0x934] sm:$0xf] }
 0x2fb   :  { %4810 = vmatpush.bf16.msrb.mxu3 %v8715_v52  ;;  %5485 = vmatpush.bf16.msrb.mxu1 %v9095_v46  ;;  %v9026_v52 = vld [vmem:[#allocation2 + $0x8b0] sm:$0xf]  ;;  %v9044_v56 = vld [vmem:[#allocation2 + $0x970] sm:$0xf0] }
 0x2fc   :  { %5472 = vmatpush.bf16.msrb.mxu0 %v8951_v36  ;;  %v9027_v32 = vor.u32 %v10169_v21, %v9026_v52  ;;  %v10123_v36 = vld [vmem:[#allocation2 + $0x334] sm:$0xf] }
 0x2fd   :  { %5444 = vmatpush.bf16.msra.mxu2 %v9075_v38  ;;  %v8666_v38 = vld [vmem:[#allocation6 + $0x848] sm:$0xf]  ;;  %v8852_v45 = vld [vmem:[#allocation2 + $0x370] sm:$0xf0] }
 0x2fe   :  { %4759 = vmatmul.bf16.vlgmr.msra.gmra.mxu3 %v10728_v63  ;;  %v10135_v48 = vld [vmem:[#allocation2 + $0x4b4] sm:$0xf] }
 0x2ff   :  { %4811 = vmatpush.bf16.msrb.mxu3 %v8703_v29  ;;  %5486 = vmatpush.bf16.msrb.mxu1 %v9079_v41  ;;  %v10139_v29 = vld [vmem:[#allocation2 + $0x534] sm:$0xf]  ;;  %v8875_v41 = vor.u32 %v10130_v34, %v8874_v39 }
 0x300   :  { %5473 = vmatpush.bf16.msrb.mxu0 %v8935_v1  ;;  %v8919_v46 = vor.u32 %v10139_v29, %v8916_v23  ;;  %v8900_v2 = vld [vmem:[#allocation2 + $0x4f0] sm:$0xf0]  ;;  %v8855_v1 = vor.u32 %v10123_v36, %v8852_v45  ;;  %v10194_v29 = vld [vmem:[#allocation2 + $0xbf4] sm:$0xf0] }
 0x301   :  { %5445 = vmatpush.bf16.msra.mxu2 %v9059_v12  ;;  %v8667_v12 = vor.u32 %v10077_v31, %v8666_v38  ;;  %v8903_v16 = vor.u32 %v10135_v48, %v8900_v2  ;;  %v10167_v52 = vld [vmem:[#allocation2 + $0x8b4] sm:$0xf]  ;;  %v10122_v23 = vld [vmem:[#allocation2 + $0x2f4] sm:$0xf0]  ;;  %v9131_v25 = vor.u32 %v10194_v29, %v9130_v55 }
 0x302   :  { %v9028_v21 = vld [vmem:[#allocation2 + $0x8f0] sm:$0xf0]  ;;  %v8826_v36 = vld [vmem:[#allocation2 + $0x238] sm:$0xf] }
 0x303   :  { %4812 = vmatpush.bf16.msrb.mxu3 %v8691_v49  ;;  %5487 = vmatpush.bf16.msrb.mxu1 %v9063_v58  ;;  %v9047_v49 = vor.u32 %v10171_v0, %v9044_v56  ;;  %v9031_v24 = vor.u32 %v10167_v52, %v9028_v21  ;;  %v8836_v10 = vld [vmem:[#allocation2 + $0x2f0] sm:$0xf0]  ;;  %v8842_v58 = vld [vmem:[#allocation2 + $0x2b8] sm:$0xf] }
 0x304   :  { %5474 = vmatpush.bf16.msrb.mxu0 %v8919_v46  ;;  %v10131_v38 = vld [vmem:[#allocation2 + $0x434] sm:$0xf]  ;;  %v9114_v56 = vld [vmem:[#allocation2 + $0xb38] sm:$0xf] }
 0x305   :  { %5446 = vmatpush.bf16.msra.mxu2 %v9043_v14  ;;  %v8858_v14 = vld [vmem:[#allocation2 + $0x338] sm:$0xf]  ;;  %v8884_v31 = vld [vmem:[#allocation2 + $0x470] sm:$0xf0] }
 0x306   :  { %v8859_v60 = vor.u32 %v10126_v19, %v8858_v14  ;;  %v10163_v35 = vld [vmem:[#allocation2 + $0x834] sm:$0xf]  ;;  %v9098_v14 = vld [vmem:[#allocation2 + $0xab8] sm:$0xf] }
 0x307   :  { %4813 = vmatpush.bf16.msrb.mxu3 %v8679_v9  ;;  %5488 = vmatpush.bf16.msrb.mxu1 %v9047_v49  ;;  %v10119_v9 = vld [vmem:[#allocation2 + $0x2b4] sm:$0xf]  ;;  %v10118_v49 = vld [vmem:[#allocation2 + $0x274] sm:$0xf0] }
 0x308   :  { %5475 = vmatpush.bf16.msrb.mxu0 %v8903_v16  ;;  %v9012_v39 = vld [vmem:[#allocation2 + $0x870] sm:$0xf0]  ;;  %v8839_v46 = vor.u32 %v10119_v9, %v8836_v10  ;;  %v8810_v16 = vld [vmem:[#allocation2 + $0x1b8] sm:$0xf] }
 0x309   :  { %5447 = vmatpush.bf16.msra.mxu2 %v9027_v32  ;;  %v8887_v32 = vor.u32 %v10131_v38, %v8884_v31  ;;  %v10115_v34 = vld [vmem:[#allocation2 + $0x234] sm:$0xf]  ;;  %v10114_v19 = vld [vmem:[#allocation2 + $0x1f4] sm:$0xf0] }
 0x30a   :  { %v8820_v0 = vld [vmem:[#allocation2 + $0x270] sm:$0xf0]  ;;  %v10186_v52 = vld [vmem:[#allocation2 + $0xaf4] sm:$0xf0]  ;;  %v8811_v10 = vor.u32 %v10114_v19, %v8810_v16 }
 0x30b   :  { %4814 = vmatpush.bf16.msrb.mxu3 %v8667_v12  ;;  %5489 = vmatpush.bf16.msrb.mxu1 %v9031_v24  ;;  %v9015_v12 = vor.u32 %v10163_v35, %v9012_v39  ;;  %v8823_v45 = vor.u32 %v10115_v34, %v8820_v0  ;;  %v10111_v48 = vld [vmem:[#allocation2 + $0x1b4] sm:$0xf]  ;;  %v9082_v38 = vld [vmem:[#allocation2 + $0xa38] sm:$0xf]  ;;  %v8876_v35 = vld [vmem:[#allocation2 + $0x3f8] sm:$0xf0] }
 0x30c   :  { %5476 = vmatpush.bf16.msrb.mxu0 %v8887_v32  ;;  %v8804_v2 = vld [vmem:[#allocation2 + $0x1f0] sm:$0xf0]  ;;  %v10182_v31 = vld [vmem:[#allocation2 + $0xa74] sm:$0xf0] }
 0x30d   :  { %5448 = vmatpush.bf16.msra.mxu2 %v9011_v53  ;;  %v8807_v21 = vor.u32 %v10111_v48, %v8804_v2  ;;  %v10107_v9 = vld [vmem:[#allocation2 + $0x134] sm:$0xf]  ;;  %v9083_v32 = vor.u32 %v10182_v31, %v9082_v38  ;;  %v10106_v34 = vld [vmem:[#allocation2 + $0xf4] sm:$0xf0] }
 0x30e   :  { %4815 = vmatmul.bf16.vlgmr.msrb.gmra.mxu3 %v10728_v63  ;;  %v8843_v63 = vor.u32 %v10122_v23, %v8842_v58  ;;  %v8788_v24 = vld [vmem:[#allocation2 + $0x170] sm:$0xf0]  ;;  %v10110_v58 = vld [vmem:[#allocation2 + $0x174] sm:$0xf0] }
 0x30f   :  { %5455 = vmatpush.bf16.msra.mxu3 %v8871_v13  ;;  %v10190_v13 = vld [vmem:[#allocation2 + $0xb74] sm:$0xf0]  ;;  %5490 = vmatpush.bf16.msrb.mxu1 %v9015_v12  ;;  %v8791_v55 = vor.u32 %v10107_v9, %v8788_v24  ;;  %v10103_v29 = vld [vmem:[#allocation2 + $0xb4] sm:$0xf]  ;;  %v10160_v9 = vld [vmem:[#allocation2 + $0x7bc] sm:$0xf] }
 0x310   :  { %5449 = vmatmul.bf16.vlgmr.msra.gmra.mxu2 %v10476_v20  ;;  %5525 = vmatpush.bf16.msra.mxu0 %v9131_v25  ;;  %v9115_v53 = vor.u32 %v10190_v13, %v9114_v56  ;;  %v8772_v23 = vld [vmem:[#allocation2 + $0xf0] sm:$0xf0]  ;;  %v10128_v25 = vld [vmem:[#allocation2 + $0x3bc] sm:$0xf]  ;;  %v9066_v0 = vld [vmem:[#allocation2 + $0x9b8] sm:$0xf] }
 0x311   :  { %5497 = vmatpush.bf16.msrb.mxu2 %v8875_v41  ;;  %5477 = vmatmul.bf16.vlgmr.msrb.gmra.mxu0 %v10466_v5  ;;  %v8827_v41 = vor.u32 %v10118_v49, %v8826_v36  ;;  %v8879_v12 = vor.u32 %v10128_v25, %v8876_v35  ;;  %v8775_v56 = vor.u32 %v10103_v29, %v8772_v23  ;;  %v10099_v13 = vld [vmem:[#allocation2 + $0x34] sm:$0xf]  ;;  %v9002_v48 = vld [vmem:[#allocation2 + $0x7b8] sm:$0xf]  ;;  %v9004_v24 = vld [vmem:[#allocation2 + $0x7f8] sm:$0xf0] }
 0x312   :  { %5491 = vmatmul.bf16.vlgmr.msrb.gmra.mxu1 %v10476_v20  ;;  %v8756_v49 = vld [vmem:[#allocation2 + $0x70] sm:$0xf0]  ;;  %v10162_v2 = vld [vmem:[#allocation2 + $0x7f4] sm:$0xf0]  ;;  %v9007_v35 = vor.u32 %v10160_v9, %v9004_v24 }
 0x313   :  { %5456 = vmatpush.bf16.msra.mxu3 %v8855_v1  ;;  %v9099_v1 = vor.u32 %v10186_v52, %v9098_v14  ;;  %5539 = vmatpush.bf16.msra.mxu1 %v8879_v12  ;;  %v8762_v14 = vld [vmem:[#allocation2 + $0x38] sm:$0xf]  ;;  %v9003_v38 = vor.u32 %v10162_v2, %v9002_v48  ;;  %v10152_v2 = vld [vmem:[#allocation2 + $0x6bc] sm:$0xf] }
 0x314   :  { %5526 = vmatpush.bf16.msra.mxu0 %v9115_v53  ;;  %v10124_v53 = vld [vmem:[#allocation2 + $0x33c] sm:$0xf]  ;;  %v10102_v19 = vld [vmem:[#allocation2 + $0x74] sm:$0xf0] }
 0x315   :  { %5498 = vmatpush.bf16.msrb.mxu2 %v8859_v60  ;;  %v8794_v60 = vld [vmem:[#allocation2 + $0x138] sm:$0xf] }
 0x316   :  { %v8795_v39 = vor.u32 %v10110_v58, %v8794_v60  ;;  %v9050_v52 = vld [vmem:[#allocation2 + $0x938] sm:$0xf]  ;;  %v10120_v60 = vld [vmem:[#allocation2 + $0x2bc] sm:$0xf] }
 0x317   :  { %5457 = vmatpush.bf16.msra.mxu3 %v8839_v46  ;;  %v8778_v46 = vld [vmem:[#allocation2 + $0xb8] sm:$0xf]  ;;  %v8844_v58 = vld [vmem:[#allocation2 + $0x2f8] sm:$0xf0] }
 0x318   :  { %5527 = vmatpush.bf16.msra.mxu0 %v9099_v1  ;;  %v8759_v1 = vor.u32 %v10099_v13, %v8756_v49  ;;  %v8986_v31 = vld [vmem:[#allocation2 + $0x738] sm:$0xf]  ;;  %v8847_v29 = vor.u32 %v10120_v60, %v8844_v58  ;;  %v10108_v60 = vld [vmem:[#allocation2 + $0x13c] sm:$0xf] }
 0x319   :  { %5499 = vmatpush.bf16.msrb.mxu2 %v8843_v63  ;;  %v10178_v63 = vld [vmem:[#allocation2 + $0x9f4] sm:$0xf0]  ;;  %v8796_v58 = vld [vmem:[#allocation2 + $0x178] sm:$0xf0] }
 0x31a   :  { %v9067_v36 = vor.u32 %v10178_v63, %v9066_v0  ;;  %v9034_v23 = vld [vmem:[#allocation2 + $0x8b8] sm:$0xf]  ;;  %v10116_v63 = vld [vmem:[#allocation2 + $0x23c] sm:$0xf] }
 0x31b   :  { %5458 = vmatpush.bf16.msra.mxu3 %v8823_v45  ;;  %v8860_v45 = vld [vmem:[#allocation2 + $0x378] sm:$0xf0]  ;;  %v10170_v25 = vld [vmem:[#allocation2 + $0x8f4] sm:$0xf0] }
 0x31c   :  { %5528 = vmatpush.bf16.msra.mxu0 %v9083_v32  ;;  %v8863_v16 = vor.u32 %v10124_v53, %v8860_v45  ;;  %v10158_v32 = vld [vmem:[#allocation2 + $0x774] sm:$0xf0]  ;;  %v9035_v12 = vor.u32 %v10170_v25, %v9034_v23  ;;  %v10144_v25 = vld [vmem:[#allocation2 + $0x5bc] sm:$0xf] }
 0x31d   :  { %5500 = vmatpush.bf16.msrb.mxu2 %v8827_v41  ;;  %v8779_v41 = vor.u32 %v10106_v34, %v8778_v46  ;;  %v8988_v46 = vld [vmem:[#allocation2 + $0x778] sm:$0xf0]  ;;  %v8987_v34 = vor.u32 %v10158_v32, %v8986_v31  ;;  %v8970_v0 = vld [vmem:[#allocation2 + $0x6b8] sm:$0xf] }
 0x31e   :  { %5540 = vmatpush.bf16.msra.mxu1 %v8863_v16  ;;  %v10154_v13 = vld [vmem:[#allocation2 + $0x6f4] sm:$0xf0] }
 0x31f   :  { %5459 = vmatpush.bf16.msra.mxu3 %v8807_v21  ;;  %v10174_v21 = vld [vmem:[#allocation2 + $0x974] sm:$0xf0]  ;;  %v4662_v45 = vpop.f32.mrf.mxu0  ;;  %v8971_v16 = vor.u32 %v10154_v13, %v8970_v0  ;;  %v8780_v0 = vld [vmem:[#allocation2 + $0xf8] sm:$0xf0] }
 0x320   :  { %5529 = vmatpush.bf16.msra.mxu0 %v9067_v36  ;;  %v9018_v49 = vld [vmem:[#allocation2 + $0x838] sm:$0xf] }
 0x321   :  { %5501 = vmatpush.bf16.msrb.mxu2 %v8811_v10  ;;  %v9051_v10 = vor.u32 %v10174_v21, %v9050_v52  ;;  %v10166_v53 = vld [vmem:[#allocation2 + $0x874] sm:$0xf0]  ;;  %v8812_v52 = vld [vmem:[#allocation2 + $0x1f8] sm:$0xf0] }
 0x322   :  { %5541 = vmatpush.bf16.msra.mxu1 %v8847_v29  ;;  %v8954_v21 = vld [vmem:[#allocation2 + $0x638] sm:$0xf]  ;;  %v8799_v29 = vor.u32 %v10108_v60, %v8796_v58  ;;  %v10192_v58 = vld [vmem:[#allocation2 + $0xbbc] sm:$0xf] }
 0x323   :  { %5460 = vmatpush.bf16.msra.mxu3 %v8791_v55  ;;  %v8763_v55 = vor.u32 %v10102_v19, %v8762_v14  ;;  %v9019_v14 = vor.u32 %v10166_v53, %v9018_v49  ;;  %v10112_v19 = vld [vmem:[#allocation2 + $0x1bc] sm:$0xf]  ;;  %v8938_v32 = vld [vmem:[#allocation2 + $0x5b8] sm:$0xf] }
 0x324   :  { %5530 = vmatpush.bf16.msra.mxu0 %v9051_v10  ;;  %v8815_v9 = vor.u32 %v10112_v19, %v8812_v52  ;;  %v10148_v10 = vld [vmem:[#allocation2 + $0x63c] sm:$0xf]  ;;  %v10142_v13 = vld [vmem:[#allocation2 + $0x574] sm:$0xf0] }
 0x325   :  { %5502 = vmatpush.bf16.msrb.mxu2 %v8795_v39  ;;  %v10156_v39 = vld [vmem:[#allocation2 + $0x73c] sm:$0xf]  ;;  %v10138_v19 = vld [vmem:[#allocation2 + $0x4f4] sm:$0xf0] }
 0x326   :  { %v8991_v48 = vor.u32 %v10156_v39, %v8988_v46  ;;  %v10140_v53 = vld [vmem:[#allocation2 + $0x53c] sm:$0xf] }
 0x327   :  { %5461 = vmatpush.bf16.msra.mxu3 %v8775_v56  ;;  %v8828_v56 = vld [vmem:[#allocation2 + $0x278] sm:$0xf0]  ;;  %v4664_v39 = vpop.f32.mrf.mxu0 }
 0x328   :  { %v8831_v36 = vor.u32 %v10116_v63, %v8828_v56  ;;  %5531 = vmatpush.bf16.msra.mxu0 %v9035_v12  ;;  %v8922_v56 = vld [vmem:[#allocation2 + $0x538] sm:$0xf] }
 0x329   :  { %5503 = vmatpush.bf16.msrb.mxu2 %v8779_v41  ;;  %v8972_v41 = vld [vmem:[#allocation2 + $0x6f8] sm:$0xf0] }
 0x32a   :  { %5542 = vmatpush.bf16.msra.mxu1 %v8831_v36  ;;  %v8975_v24 = vor.u32 %v10152_v2, %v8972_v41  ;;  %v8923_v2 = vor.u32 %v10142_v13, %v8922_v56  ;;  %v10100_v41 = vld [vmem:[#allocation2 + $0x3c] sm:$0xf] }
 0x32b   :  { %5462 = vmatpush.bf16.msra.mxu3 %v8759_v1  ;;  %v10150_v1 = vld [vmem:[#allocation2 + $0x674] sm:$0xf0]  ;;  %v10184_v13 = vld [vmem:[#allocation2 + $0xabc] sm:$0xf] }
 0x32c   :  { %5532 = vmatpush.bf16.msra.mxu0 %v9019_v14  ;;  %v8955_v31 = vor.u32 %v10150_v1, %v8954_v21  ;;  %v8764_v14 = vld [vmem:[#allocation2 + $0x78] sm:$0xf0] }
 0x32d   :  { %5504 = vmatpush.bf16.msrb.mxu2 %v8763_v55  ;;  %v10146_v55 = vld [vmem:[#allocation2 + $0x5f4] sm:$0xf0]  ;;  %v8767_v52 = vor.u32 %v10100_v41, %v8764_v14  ;;  %v10136_v1 = vld [vmem:[#allocation2 + $0x4bc] sm:$0xf] }
 0x32e   :  { %5463 = vmatmul.bf16.vlgmr.msra.gmra.mxu3 %v10457_v57  ;;  %5543 = vmatpush.bf16.msra.mxu1 %v8815_v9  ;;  %v8939_v12 = vor.u32 %v10146_v55, %v8938_v32  ;;  %v9132_v32 = vld [vmem:[#allocation2 + $0xbf8] sm:$0xf0] }
 0x32f   :  { %5511 = vmatpush.bf16.msrb.mxu3 %v9003_v38  ;;  %v8956_v38 = vld [vmem:[#allocation2 + $0x678] sm:$0xf0]  ;;  %5533 = vmatmul.bf16.vlgmr.msra.gmra.mxu0 %v10476_v20  ;;  %v4676_v46 = vpop.f32.mrf.mxu1  ;;  %v4718_v60 = vpop.f32.mrf.mxu0 }
 0x330   :  { %5505 = vmatmul.bf16.vlgmr.msrb.gmra.mxu2 %v10457_v57  ;;  %v8959_v23 = vor.u32 %v10148_v10, %v8956_v38  ;;  %v10742_v63 = vadd.f32 %v4676_v46, %v4662_v45  ;;  %v8908_v45 = vld [vmem:[#allocation2 + $0x4f8] sm:$0xf0]  ;;  %v8890_v38 = vld [vmem:[#allocation2 + $0x438] sm:$0xf] }
 0x331   :  { %5553 = vmatpush.bf16.msra.mxu2 %v9007_v35  ;;  %v8940_v35 = vld [vmem:[#allocation2 + $0x5f8] sm:$0xf0]  ;;  %v8911_v55 = vor.u32 %v10136_v1, %v8908_v45 }
 0x332   :  { %5544 = vmatpush.bf16.msra.mxu1 %v8799_v29  ;;  %v8943_v49 = vor.u32 %v10144_v25, %v8940_v35  ;;  %v10132_v29 = vld [vmem:[#allocation2 + $0x43c] sm:$0xf]  ;;  %v9135_v35 = vor.u32 %v10192_v58, %v9132_v32 }
 0x333   :  { %5512 = vmatpush.bf16.msrb.mxu3 %v8987_v34  ;;  %v10104_v34 = vld [vmem:[#allocation2 + $0xbc] sm:$0xf] }
 0x334   :  { %v8783_v36 = vor.u32 %v10104_v34, %v8780_v0  ;;  %v10188_v46 = vld [vmem:[#allocation2 + $0xb3c] sm:$0xf] }
 0x335   :  { %5554 = vmatpush.bf16.msra.mxu2 %v8991_v48  ;;  %v8924_v48 = vld [vmem:[#allocation2 + $0x578] sm:$0xf0] }
 0x336   :  { %5545 = vmatpush.bf16.msra.mxu1 %v8783_v36  ;;  %v8927_v21 = vor.u32 %v10140_v53, %v8924_v48  ;;  %v9100_v36 = vld [vmem:[#allocation2 + $0xaf8] sm:$0xf0] }
 0x337   :  { %5513 = vmatpush.bf16.msrb.mxu3 %v8971_v16  ;;  %v8906_v16 = vld [vmem:[#allocation2 + $0x4b8] sm:$0xf]  ;;  %v4678_v9 = vpop.f32.mrf.mxu1  ;;  %v4720_v48 = vpop.f32.mrf.mxu0  ;;  %v10180_v41 = vld [vmem:[#allocation2 + $0xa3c] sm:$0xf] }
 0x338   :  { %v10744_v10 = vadd.f32 %v4678_v9, %v4664_v39  ;;  %v9084_v14 = vld [vmem:[#allocation2 + $0xa78] sm:$0xf0] }
 0x339   :  { %5555 = vmatpush.bf16.msra.mxu2 %v8975_v24  ;;  %v8907_v24 = vor.u32 %v10138_v19, %v8906_v16  ;;  %v9210_v19 = vld [vmem:[#allocation6 + $0x990] sm:$0xf]  ;;  %v9087_v1 = vor.u32 %v10180_v41, %v9084_v14  ;;  %v10176_v9 = vld [vmem:[#allocation2 + $0x9bc] sm:$0xf] }
 0x33a   :  { %5546 = vmatpush.bf16.msra.mxu1 %v8767_v52  ;;  %v10214_v52 = vld [vmem:[#allocation6 + $0x998] sm:$0xf0]  ;;  %v10172_v32 = vld [vmem:[#allocation2 + $0x93c] sm:$0xf] }
 0x33b   :  { %5514 = vmatpush.bf16.msrb.mxu3 %v8955_v31  ;;  %v10134_v31 = vld [vmem:[#allocation2 + $0x474] sm:$0xf0]  ;;  %v9211_v45 = vor.u32 %v10214_v52, %v9210_v19  ;;  %v10202_v19 = vld [vmem:[#allocation6 + $0x938] sm:$0xf0] }
 0x33c   :  { %v8891_v25 = vor.u32 %v10134_v31, %v8890_v38  ;;  %v9198_v38 = vld [vmem:[#allocation6 + $0x978] sm:$0xf]  ;;  %v10211_v31 = vld [vmem:[#allocation6 + $0x980] sm:$0xf0] }
 0x33d   :  { %5556 = vmatpush.bf16.msra.mxu2 %v8959_v23  ;;  %5547 = vmatmul.bf16.vlgmr.msra.gmra.mxu1 %v10457_v57  ;;  %v8892_v23 = vld [vmem:[#allocation2 + $0x478] sm:$0xf0]  ;;  %v10217_v57 = vld [vmem:[#allocation6 + $0x9b0] sm:$0xf0]  ;;  %v9199_v58 = vor.u32 %v10211_v31, %v9198_v38  ;;  %v10199_v38 = vld [vmem:[#allocation6 + $0x920] sm:$0xf0] }
 0x33e   :  { %v8895_v34 = vor.u32 %v10132_v29, %v8892_v23  ;;  %v9186_v23 = vld [vmem:[#allocation6 + $0x960] sm:$0xf] }
 0x33f   :  { %5515 = vmatpush.bf16.msrb.mxu3 %v8939_v12  ;;  %v9116_v12 = vld [vmem:[#allocation2 + $0xb78] sm:$0xf0]  ;;  %v4732_v39 = vpop.f32.mrf.mxu1 }
 0x340   :  { %v10747_v0 = vadd.f32 %v4732_v39, %v4718_v60  ;;  %v9119_v56 = vor.u32 %v10188_v46, %v9116_v12 }
 0x341   :  { %5557 = vmatpush.bf16.msra.mxu2 %v8943_v49  ;;  %v9222_v49 = vld [vmem:[#allocation6 + $0x9a8] sm:$0xf] }
 0x342   :  { %v9223_v53 = vor.u32 %v10217_v57, %v9222_v49  ;;  %v10205_v49 = vld [vmem:[#allocation6 + $0x950] sm:$0xf0] }
 0x343   :  { %5516 = vmatpush.bf16.msrb.mxu3 %v8923_v2  ;;  %v9103_v2 = vor.u32 %v10184_v13, %v9100_v36  ;;  %v9036_v13 = vld [vmem:[#allocation2 + $0x8f8] sm:$0xf0]  ;;  %v9174_v36 = vld [vmem:[#allocation6 + $0x948] sm:$0xf] }
 0x344   :  { %6233 = vmatpush.bf16.msrb.mxu0 %v9223_v53  ;;  %v9175_v53 = vor.u32 %v10205_v49, %v9174_v36  ;;  %v10213_v36 = vld [vmem:[#allocation6 + $0x994] sm:$0xf]  ;;  %v9212_v49 = vld [vmem:[#allocation6 + $0x99c] sm:$0xf0] }
 0x345   :  { %5558 = vmatpush.bf16.msra.mxu2 %v8927_v21 }
 0x347   :  { %5517 = vmatpush.bf16.msrb.mxu3 %v8907_v24  ;;  %v4734_v16 = vpop.f32.mrf.mxu1  ;;  %v9068_v24 = vld [vmem:[#allocation2 + $0x9f8] sm:$0xf0] }
 0x348   :  { %v10751_v21 = vadd.f32 %v4734_v16, %v4720_v48  ;;  %6234 = vmatpush.bf16.msrb.mxu0 %v9211_v45  ;;  %v9071_v60 = vor.u32 %v10176_v9, %v9068_v24  ;;  %v10164_v48 = vld [vmem:[#allocation2 + $0x83c] sm:$0xf]  ;;  %v9162_v16 = vld [vmem:[#allocation6 + $0x930] sm:$0xf]  ;;  %v9150_v24 = vld [vmem:[#allocation6 + $0x918] sm:$0xf] }
 0x349   :  { %5559 = vmatpush.bf16.msra.mxu2 %v8911_v55  ;;  %v9052_v55 = vld [vmem:[#allocation2 + $0x978] sm:$0xf0]  ;;  %v9163_v45 = vor.u32 %v10202_v19, %v9162_v16  ;;  %v9151_v31 = vor.u32 %v10199_v38, %v9150_v24  ;;  %v10207_v38 = vld [vmem:[#allocation6 + $0x964] sm:$0xf] }
 0x34a   :  { %v9055_v12 = vor.u32 %v10172_v32, %v9052_v55  ;;  %v10241_v55 = vld [vmem:[#allocation6 + $0xa70] sm:$0xf0] }
 0x34b   :  { %5518 = vmatpush.bf16.msrb.mxu3 %v8891_v25  ;;  %v10208_v25 = vld [vmem:[#allocation6 + $0x968] sm:$0xf0] }
 0x34c   :  { %6235 = vmatpush.bf16.msrb.mxu0 %v9199_v58  ;;  %v10196_v58 = vld [vmem:[#allocation6 + $0x908] sm:$0xf0] }
 0x34d   :  { %5560 = vmatpush.bf16.msra.mxu2 %v8895_v34  ;;  %v9187_v34 = vor.u32 %v10208_v25, %v9186_v23  ;;  %v9224_v23 = vld [vmem:[#allocation6 + $0x9b4] sm:$0xf0] }
 0x34e   :  { %5519 = vmatmul.bf16.vlgmr.msrb.gmra.mxu3 %v10466_v5 }
 0x34f   :  { %5567 = vmatpush.bf16.msra.mxu3 %v9135_v35  ;;  %v4788_v29 = vpop.f32.mrf.mxu1 }
 0x350   :  { %5561 = vmatmul.bf16.vlgmr.msra.gmra.mxu2 %v10466_v5  ;;  %v4774_v5 = vpop.f32.mrf.mxu0  ;;  %6236 = vmatpush.bf16.msrb.mxu0 %v9187_v34  ;;  %v9306_v34 = vld [vmem:[#allocation6 + $0xa50] sm:$0xf] }
 0x351   :  { %v10753_v35 = vadd.f32 %v4788_v29, %v4774_v5  ;;  %v9318_v5 = vld [vmem:[#allocation6 + $0xa68] sm:$0xf]  ;;  %v10216_v29 = vld [vmem:[#allocation6 + $0x9ac] sm:$0xf] }
 0x353   :  { %5568 = vmatpush.bf16.msra.mxu3 %v9119_v56  ;;  %v4690_v46 = vpop.f32.mrf.mxu2  ;;  %v10168_v56 = vld [vmem:[#allocation2 + $0x8bc] sm:$0xf] }
 0x354   :  { %v10756_v39 = vadd.f32 %v4690_v46, %v10742_v63  ;;  %v9039_v57 = vor.u32 %v10168_v56, %v9036_v13  ;;  %6237 = vmatpush.bf16.msrb.mxu0 %v9175_v53  ;;  %v9319_v46 = vor.u32 %v10241_v55, %v9318_v5  ;;  %v10238_v56 = vld [vmem:[#allocation6 + $0xa58] sm:$0xf0]  ;;  %v10235_v53 = vld [vmem:[#allocation6 + $0xa40] sm:$0xf0]  ;;  %v9270_v5 = vld [vmem:[#allocation6 + $0xa08] sm:$0xf] }
 0x355   :  { %v9307_v13 = vor.u32 %v10238_v56, %v9306_v34  ;;  %v10226_v34 = vld [vmem:[#allocation6 + $0x9f8] sm:$0xf0] }
 0x356   :  { %6247 = vmatpush.bf16.msrb.mxu1 %v9319_v46 }
 0x357   :  { %5569 = vmatpush.bf16.msra.mxu3 %v9103_v2  ;;  %v9020_v2 = vld [vmem:[#allocation2 + $0x878] sm:$0xf0]  ;;  %v4790_v14 = vpop.f32.mrf.mxu1 }
 0x358   :  { %v4776_v41 = vpop.f32.mrf.mxu0  ;;  %6238 = vmatpush.bf16.msrb.mxu0 %v9163_v45 }
 0x359   :  { %v10758_v52 = vadd.f32 %v4790_v14, %v4776_v41  ;;  %v9200_v41 = vld [vmem:[#allocation6 + $0x984] sm:$0xf0] }
 0x35a   :  { %6248 = vmatpush.bf16.msrb.mxu1 %v9307_v13  ;;  %v10201_v13 = vld [vmem:[#allocation6 + $0x934] sm:$0xf] }
 0x35b   :  { %5570 = vmatpush.bf16.msra.mxu3 %v9087_v1  ;;  %v4692_v63 = vpop.f32.mrf.mxu2  ;;  %v9023_v1 = vor.u32 %v10164_v48, %v9020_v2  ;;  %v10210_v48 = vld [vmem:[#allocation6 + $0x97c] sm:$0xf] }
 0x35c   :  { %v10761_v9 = vadd.f32 %v4692_v63, %v10744_v10  ;;  %6239 = vmatpush.bf16.msrb.mxu0 %v9151_v31  ;;  %v9203_v16 = vor.u32 %v10210_v48, %v9200_v41  ;;  %v9282_v63 = vld [vmem:[#allocation6 + $0xa20] sm:$0xf]  ;;  %v9188_v31 = vld [vmem:[#allocation6 + $0x96c] sm:$0xf0]  ;;  %v10198_v48 = vld [vmem:[#allocation6 + $0x91c] sm:$0xf] }
 0x35f   :  { %5571 = vmatpush.bf16.msra.mxu3 %v9071_v60  ;;  %v9138_v60 = vld [vmem:[#allocation6 + $0x900] sm:$0xf] }
 0x360   :  { %v9139_v32 = vor.u32 %v10196_v58, %v9138_v60  ;;  %v9191_v60 = vor.u32 %v10207_v38, %v9188_v31  ;;  %v10195_v31 = vld [vmem:[#allocation6 + $0x904] sm:$0xf] }
 0x362   :  { %6240 = vmatpush.bf16.msrb.mxu0 %v9139_v32  ;;  %v10229_v32 = vld [vmem:[#allocation6 + $0xa10] sm:$0xf0] }
 0x363   :  { %5572 = vmatpush.bf16.msra.mxu3 %v9055_v12  ;;  %v4746_v25 = vpop.f32.mrf.mxu2  ;;  %v9227_v12 = vor.u32 %v10216_v29, %v9224_v23  ;;  %v9271_v55 = vor.u32 %v10229_v32, %v9270_v5  ;;  %v10204_v29 = vld [vmem:[#allocation6 + $0x94c] sm:$0xf]  ;;  %v9176_v23 = vld [vmem:[#allocation6 + $0x954] sm:$0xf0] }
 0x364   :  { %v10765_v10 = vadd.f32 %v4746_v25, %v10747_v0  ;;  %v9179_v46 = vor.u32 %v10204_v29, %v9176_v23  ;;  %v10240_v5 = vld [vmem:[#allocation6 + $0xa6c] sm:$0xf]  ;;  %v9402_v29 = vld [vmem:[#allocation6 + $0xb10] sm:$0xf]  ;;  %v10262_v23 = vld [vmem:[#allocation6 + $0xb18] sm:$0xf0] }
 0x366   :  { %6289 = vmatpush.bf16.msra.mxu0 %v9227_v12  ;;  %v9258_v12 = vld [vmem:[#allocation6 + $0x9f0] sm:$0xf] }
 0x367   :  { %5573 = vmatpush.bf16.msra.mxu3 %v9039_v57  ;;  %v9215_v57 = vor.u32 %v10213_v36, %v9212_v49  ;;  %v9259_v56 = vor.u32 %v10226_v34, %v9258_v12  ;;  %v9164_v36 = vld [vmem:[#allocation6 + $0x93c] sm:$0xf0] }
 0x368   :  { %v9167_v49 = vor.u32 %v10201_v13, %v9164_v36  ;;  %v9308_v12 = vld [vmem:[#allocation6 + $0xa5c] sm:$0xf0]  ;;  %v10259_v13 = vld [vmem:[#allocation6 + $0xb00] sm:$0xf0]  ;;  %v10234_v36 = vld [vmem:[#allocation6 + $0xa3c] sm:$0xf] }
 0x36a   :  { %6290 = vmatpush.bf16.msra.mxu0 %v9215_v57  ;;  %v9246_v57 = vld [vmem:[#allocation6 + $0x9d8] sm:$0xf] }
 0x36b   :  { %5574 = vmatpush.bf16.msra.mxu3 %v9023_v1  ;;  %v4748_v14 = vpop.f32.mrf.mxu2  ;;  %v10232_v1 = vld [vmem:[#allocation6 + $0xa28] sm:$0xf0] }
 0x36c   :  { %v10768_v0 = vadd.f32 %v4748_v14, %v10751_v21  ;;  %v9283_v24 = vor.u32 %v10232_v1, %v9282_v63 }
 0x36e   :  { %5575 = vmatmul.bf16.vlgmr.msra.gmra.mxu3 %v10476_v20  ;;  %v9294_v20 = vld [vmem:[#allocation6 + $0xa38] sm:$0xf]  ;;  %6291 = vmatpush.bf16.msra.mxu0 %v9203_v16  ;;  %v9414_v16 = vld [vmem:[#allocation6 + $0xb28] sm:$0xf]  ;;  %v5422_v34 = vpop.f32.mrf.mxu0 }
 0x36f   :  { %v9295_v2 = vor.u32 %v10235_v53, %v9294_v20  ;;  %v10223_v20 = vld [vmem:[#allocation6 + $0x9e0] sm:$0xf0] }
 0x371   :  { %6249 = vmatpush.bf16.msrb.mxu1 %v9295_v2  ;;  %v4704_v19 = vpop.f32.mrf.mxu3  ;;  %v9152_v2 = vld [vmem:[#allocation6 + $0x924] sm:$0xf0] }
 0x372   :  { %v4705_v45 = vadd.f32 %v4704_v19, %v10756_v39  ;;  %6292 = vmatpush.bf16.msra.mxu0 %v9191_v60  ;;  %v9155_v14 = vor.u32 %v10198_v48, %v9152_v2  ;;  %v9234_v19 = vld [vmem:[#allocation6 + $0x9c0] sm:$0xf]  ;;  %v9140_v60 = vld [vmem:[#allocation6 + $0x90c] sm:$0xf0]  ;;  %v5436_v48 = vpop.f32.mrf.mxu1 }
 0x373   :  { %v4802_v21 = vpop.f32.mrf.mxu2  ;;  %v9143_v32 = vor.u32 %v10195_v31, %v9140_v60 }
 0x374   :  { %v10772_v58 = vadd.f32 %v4705_v45, %v10678_v42  ;;  %v10775_v25 = vadd.f32 %v4802_v21, %v10753_v35  ;;  %v9247_v35 = vor.u32 %v10223_v20, %v9246_v57  ;;  %v10220_v45 = vld [vmem:[#allocation6 + $0x9c8] sm:$0xf0]  ;;  %v9320_v21 = vld [vmem:[#allocation6 + $0xa74] sm:$0xf0]  ;;  %v9296_v57 = vld [vmem:[#allocation6 + $0xa44] sm:$0xf0] }
 0x375   :  { %6250 = vmatpush.bf16.msrb.mxu1 %v9283_v24  ;;  %v9235_v38 = vor.u32 %v10220_v45, %v9234_v19  ;;  %v10231_v19 = vld [vmem:[#allocation6 + $0xa24] sm:$0xf] }
 0x376   :  { %6293 = vmatpush.bf16.msra.mxu0 %v9179_v46  ;;  %v10237_v46 = vld [vmem:[#allocation6 + $0xa54] sm:$0xf] }
 0x379   :  { %6251 = vmatpush.bf16.msrb.mxu1 %v9271_v55  ;;  %v4706_v39 = vpop.f32.mrf.mxu3  ;;  %v9323_v55 = vor.u32 %v10240_v5, %v9320_v21  ;;  %v9272_v21 = vld [vmem:[#allocation6 + $0xa14] sm:$0xf0] }
 0x37a   :  { %v10778_v42 = vadd.f32 %v4706_v39, %v10761_v9  ;;  %6294 = vmatpush.bf16.msra.mxu0 %v9167_v49  ;;  %v10265_v9 = vld [vmem:[#allocation6 + $0xb30] sm:$0xf0]  ;;  %v9403_v39 = vor.u32 %v10262_v23, %v9402_v29 }
 0x37b   :  { %v4804_v53 = vpop.f32.mrf.mxu2  ;;  %v9415_v1 = vor.u32 %v10265_v9, %v9414_v16  ;;  %v10256_v16 = vld [vmem:[#allocation6 + $0xae8] sm:$0xf0] }
 0x37c   :  { %v10781_v41 = vadd.f32 %v4804_v53, %v10758_v52 }
 0x37d   :  { %6252 = vmatpush.bf16.msrb.mxu1 %v9259_v56  ;;  %6261 = vmatpush.bf16.msrb.mxu2 %v9415_v1  ;;  %v9390_v56 = vld [vmem:[#allocation6 + $0xaf8] sm:$0xf] }
 0x37e   :  { %6295 = vmatpush.bf16.msra.mxu0 %v9155_v14  ;;  %v9391_v49 = vor.u32 %v10259_v13, %v9390_v56  ;;  %v9378_v14 = vld [vmem:[#allocation6 + $0xae0] sm:$0xf]  ;;  %v10225_v13 = vld [vmem:[#allocation6 + $0x9f4] sm:$0xf] }
 0x37f   :  { %v9379_v9 = vor.u32 %v10256_v16, %v9378_v14 }
 0x381   :  { %6253 = vmatpush.bf16.msrb.mxu1 %v9247_v35  ;;  %v4760_v63 = vpop.f32.mrf.mxu3  ;;  %6262 = vmatpush.bf16.msrb.mxu2 %v9403_v39  ;;  %v9299_v35 = vor.u32 %v10234_v36, %v9296_v57  ;;  %v9260_v36 = vld [vmem:[#allocation6 + $0x9fc] sm:$0xf0] }
 0x382   :  { %v4761_v24 = vadd.f32 %v4760_v63, %v10765_v10  ;;  %6296 = vmatpush.bf16.msra.mxu0 %v9143_v32  ;;  %v9311_v10 = vor.u32 %v10237_v46, %v9308_v12  ;;  %v9284_v63 = vld [vmem:[#allocation6 + $0xa2c] sm:$0xf0]  ;;  %v10228_v32 = vld [vmem:[#allocation6 + $0xa0c] sm:$0xf] }
 0x383   :  { %v9287_v1 = vor.u32 %v10231_v19, %v9284_v63  ;;  %v9275_v29 = vor.u32 %v10228_v32, %v9272_v21  ;;  %v9354_v12 = vld [vmem:[#allocation6 + $0xab0] sm:$0xf]  ;;  %v10218_v63 = vld [vmem:[#allocation6 + $0x9b8] sm:$0xf0]  ;;  %v10264_v21 = vld [vmem:[#allocation6 + $0xb2c] sm:$0xf] }
 0x384   :  { %v10785_v52 = vadd.f32 %v4761_v24, %v10691_v61  ;;  %v10787_v61 = vld [vmem:[#allocation4 + $0xc] sm:$0xf]  ;;  %v9366_v24 = vld [vmem:[#allocation6 + $0xac8] sm:$0xf] }
 0x385   :  { %6254 = vmatpush.bf16.msrb.mxu1 %v9235_v38  ;;  %6263 = vmatpush.bf16.msrb.mxu2 %v9391_v49  ;;  %v4925_v2 = vperm.slane %v10787_v61, 0  ;;  %v10253_v38 = vld [vmem:[#allocation6 + $0xad0] sm:$0xf0] }
 0x386   :  { %v9367_v60 = vor.u32 %v10253_v38, %v9366_v24  ;;  %v10289_v24 = vld [vmem:[#allocation6 + $0xbf0] sm:$0xf0] }
 0x387   :  { %v5423_v45 = vadd.f32 %v5422_v34, %v4925_v2  ;;  %v5438_v34 = vpop.f32.mrf.mxu1 }
 0x389   :  { %6303 = vmatpush.bf16.msra.mxu1 %v9323_v55  ;;  %v4762_v20 = vpop.f32.mrf.mxu3  ;;  %6264 = vmatpush.bf16.msrb.mxu2 %v9379_v9  ;;  %v5437_v46 = vadd.f32 %v5436_v48, %v5423_v45  ;;  %v9230_v48 = vld [vmem:[#allocation6 + $0x9b0] sm:$0xf]  ;;  %v9248_v9 = vld [vmem:[#allocation6 + $0x9e4] sm:$0xf0] }
 0x38a   :  { %v10790_v53 = vadd.f32 %v4762_v20, %v10768_v0  ;;  %v5424_v0 = vpop.f32.mrf.mxu0  ;;  %v9342_v20 = vld [vmem:[#allocation6 + $0xa98] sm:$0xf]  ;;  %v9510_v45 = vld [vmem:[#allocation6 + $0xbe8] sm:$0xf] }
 0x38b   :  { %v5425_v39 = vadd.f32 %v5424_v0, %v4925_v2  ;;  %v10222_v2 = vld [vmem:[#allocation6 + $0x9dc] sm:$0xf]  ;;  %v9511_v0 = vor.u32 %v10289_v24, %v9510_v45  ;;  %v9474_v24 = vld [vmem:[#allocation6 + $0xba0] sm:$0xf] }
 0x38d   :  { %6304 = vmatpush.bf16.msra.mxu1 %v9311_v10  ;;  %6265 = vmatpush.bf16.msrb.mxu2 %v9367_v60  ;;  %v10250_v10 = vld [vmem:[#allocation6 + $0xab8] sm:$0xf0]  ;;  %v5439_v57 = vadd.f32 %v5438_v34, %v5425_v39  ;;  %v9330_v60 = vld [vmem:[#allocation6 + $0xa80] sm:$0xf]  ;;  %v9236_v39 = vld [vmem:[#allocation6 + $0x9cc] sm:$0xf0] }
 0x38e   :  { %v9355_v56 = vor.u32 %v10250_v10, %v9354_v12  ;;  %6275 = vmatpush.bf16.msrb.mxu3 %v9511_v0  ;;  %v9231_v12 = vor.u32 %v10218_v63, %v9230_v48  ;;  %v9498_v34 = vld [vmem:[#allocation6 + $0xbd0] sm:$0xf]  ;;  %v10258_v63 = vld [vmem:[#allocation6 + $0xafc] sm:$0xf] }
 0x391   :  { %6305 = vmatpush.bf16.msra.mxu1 %v9299_v35  ;;  %v4816_v31 = vpop.f32.mrf.mxu3  ;;  %6266 = vmatpush.bf16.msrb.mxu2 %v9355_v56  ;;  %v10247_v35 = vld [vmem:[#allocation6 + $0xaa0] sm:$0xf0]  ;;  %v10286_v56 = vld [vmem:[#allocation6 + $0xbd8] sm:$0xf0] }
 0x392   :  { %v4817_v5 = vadd.f32 %v4816_v31, %v10775_v25  ;;  %v9263_v25 = vor.u32 %v10225_v13, %v9260_v36  ;;  %v9343_v16 = vor.u32 %v10247_v35, %v9342_v20  ;;  %v9218_v36 = vld [vmem:[#allocation6 + $0x998] sm:$0xf]  ;;  %v9404_v20 = vld [vmem:[#allocation6 + $0xb1c] sm:$0xf0] }
 0x393   :  { %v5450_v55 = vpop.f32.mrf.mxu2 }
 0x394   :  { %v10795_v23 = vadd.f32 %v4817_v5, %v10702_v8  ;;  %v5451_v49 = vadd.f32 %v5450_v55, %v5437_v46  ;;  %v10244_v5 = vld [vmem:[#allocation6 + $0xa88] sm:$0xf0]  ;;  %v9416_v55 = vld [vmem:[#allocation6 + $0xb34] sm:$0xf0]  ;;  %v10219_v46 = vld [vmem:[#allocation6 + $0x9c4] sm:$0xf] }
 0x395   :  { %6306 = vmatpush.bf16.msra.mxu1 %v9287_v1  ;;  %6267 = vmatpush.bf16.msrb.mxu2 %v9343_v16  ;;  %v9251_v1 = vor.u32 %v10222_v2, %v9248_v9  ;;  %v9331_v32 = vor.u32 %v10244_v5, %v9330_v60  ;;  %v9239_v10 = vor.u32 %v10219_v46, %v9236_v39  ;;  %v10283_v16 = vld [vmem:[#allocation6 + $0xbc0] sm:$0xf0]  ;;  %v9206_v9 = vld [vmem:[#allocation6 + $0x980] sm:$0xf]  ;;  %v9194_v60 = vld [vmem:[#allocation6 + $0x968] sm:$0xf] }
 0x396   :  { %v5581_v38 = vmax.f32 %v5451_v49, 0.0  ;;  %v9499_v49 = vor.u32 %v10286_v56, %v9498_v34  ;;  %v10209_v5 = vld [vmem:[#allocation6 + $0x970] sm:$0xf0]  ;;  %v9462_v46 = vld [vmem:[#allocation6 + $0xb88] sm:$0xf] }
 0x397   :  { %v10277_v39 = vld [vmem:[#allocation6 + $0xb90] sm:$0xf0]  ;;  %v10206_v34 = vld [vmem:[#allocation6 + $0x958] sm:$0xf0] }
 0x398   :  { %6276 = vmatpush.bf16.msrb.mxu3 %v9499_v49  ;;  %v9463_v56 = vor.u32 %v10277_v39, %v9462_v46 }
 0x399   :  { %6307 = vmatpush.bf16.msra.mxu1 %v9275_v29  ;;  %v4818_v14 = vpop.f32.mrf.mxu3  ;;  %v9419_v29 = vor.u32 %v10264_v21, %v9416_v55  ;;  %6268 = vmatpush.bf16.msrb.mxu2 %v9331_v32  ;;  %v10255_v32 = vld [vmem:[#allocation6 + $0xae4] sm:$0xf]  ;;  %v9380_v21 = vld [vmem:[#allocation6 + $0xaec] sm:$0xf0] }
 0x39a   :  { %v10798_v8 = vadd.f32 %v4818_v14, %v10781_v41  ;;  %v9486_v14 = vld [vmem:[#allocation6 + $0xbb8] sm:$0xf]  ;;  %v9383_v55 = vor.u32 %v10255_v32, %v9380_v21  ;;  %v10246_v21 = vld [vmem:[#allocation6 + $0xa9c] sm:$0xf] }
 0x39b   :  { %v5452_v19 = vpop.f32.mrf.mxu2  ;;  %v9487_v2 = vor.u32 %v10283_v16, %v9486_v14  ;;  %v9450_v16 = vld [vmem:[#allocation6 + $0xb70] sm:$0xf] }
 0x39c   :  { %v5453_v31 = vadd.f32 %v5452_v19, %v5439_v57  ;;  %v10261_v57 = vld [vmem:[#allocation6 + $0xb14] sm:$0xf]  ;;  %v10212_v19 = vld [vmem:[#allocation6 + $0x988] sm:$0xf0] }
 0x39d   :  { %6308 = vmatpush.bf16.msra.mxu1 %v9263_v25  ;;  %v10215_v25 = vld [vmem:[#allocation6 + $0x9a0] sm:$0xf0]  ;;  %6317 = vmatpush.bf16.msra.mxu2 %v9419_v29  ;;  %v9407_v35 = vor.u32 %v10261_v57, %v9404_v20  ;;  %v9195_v29 = vor.u32 %v10209_v5, %v9194_v60  ;;  %v5492_v57 = vpop.f32.mrf.mxu1  ;;  %v9158_v60 = vld [vmem:[#allocation6 + $0x920] sm:$0xf]  ;;  %v10200_v5 = vld [vmem:[#allocation6 + $0x928] sm:$0xf0] }
 0x39e   :  { %v5585_v41 = vmax.f32 %v5453_v31, 0.0  ;;  %v9219_v48 = vor.u32 %v10215_v25, %v9218_v36  ;;  %v9207_v31 = vor.u32 %v10212_v19, %v9206_v9  ;;  %6277 = vmatpush.bf16.msrb.mxu3 %v9487_v2  ;;  %v10252_v36 = vld [vmem:[#allocation6 + $0xacc] sm:$0xf]  ;;  %v9368_v25 = vld [vmem:[#allocation6 + $0xad4] sm:$0xf0] }
 0x39f   :  { %v9371_v20 = vor.u32 %v10252_v36, %v9368_v25  ;;  %v9170_v2 = vld [vmem:[#allocation6 + $0x938] sm:$0xf]  ;;  %v10203_v9 = vld [vmem:[#allocation6 + $0x940] sm:$0xf0]  ;;  %v9146_v36 = vld [vmem:[#allocation6 + $0x908] sm:$0xf] }
 0x3a0   :  { %v10800_v13 = vpack.c.bf16 %v5585_v41, %v5581_v38  ;;  %v10280_v38 = vld [vmem:[#allocation6 + $0xba8] sm:$0xf0]  ;;  %v4926_v41 = vperm.slane %v10787_v61, 1 }
 0x3a1   :  { %6309 = vmatpush.bf16.msra.mxu1 %v9251_v1  ;;  %6318 = vmatpush.bf16.msra.mxu2 %v9407_v35  ;;  %v9392_v1 = vld [vmem:[#allocation6 + $0xb04] sm:$0xf0]  ;;  %v9475_v0 = vor.u32 %v10280_v38, %v9474_v24  ;;  %v9171_v38 = vor.u32 %v10203_v9, %v9170_v2  ;;  %v10268_v25 = vld [vmem:[#allocation6 + $0xb48] sm:$0xf0]  ;;  %v10243_v9 = vld [vmem:[#allocation6 + $0xa84] sm:$0xf] }
 0x3a2   :  { %6241 = vmatmul.bf16.vlgmr.msrb.gmra.mxu0 %v10800_v13  ;;  %v9395_v45 = vor.u32 %v10258_v63, %v9392_v1  ;;  %v10249_v63 = vld [vmem:[#allocation6 + $0xab4] sm:$0xf]  ;;  %v9356_v1 = vld [vmem:[#allocation6 + $0xabc] sm:$0xf0] }
 0x3a3   :  { %6345 = vmatpush.bf16.msrb.mxu0 %v9231_v12  ;;  %6278 = vmatpush.bf16.msrb.mxu3 %v9475_v0  ;;  %v5478_v12 = vpop.f32.mrf.mxu0  ;;  %v10271_v0 = vld [vmem:[#allocation6 + $0xb60] sm:$0xf0] }
 0x3a5   :  { %6310 = vmatpush.bf16.msra.mxu1 %v9239_v10  ;;  %6319 = vmatpush.bf16.msra.mxu2 %v9395_v45  ;;  %v9182_v10 = vld [vmem:[#allocation6 + $0x950] sm:$0xf]  ;;  %v9359_v45 = vor.u32 %v10249_v63, %v9356_v1 }
 0x3a6   :  { %v9183_v14 = vor.u32 %v10206_v34, %v9182_v10 }
 0x3a7   :  { %6346 = vmatpush.bf16.msrb.mxu0 %v9219_v48  ;;  %6279 = vmatpush.bf16.msrb.mxu3 %v9463_v56  ;;  %v10274_v48 = vld [vmem:[#allocation6 + $0xb78] sm:$0xf0]  ;;  %v9159_v56 = vor.u32 %v10200_v5, %v9158_v60 }
 0x3a8   :  { %v9451_v19 = vor.u32 %v10274_v48, %v9450_v16  ;;  %v9512_v16 = vld [vmem:[#allocation6 + $0xbf4] sm:$0xf0] }
 0x3a9   :  { %6320 = vmatpush.bf16.msra.mxu2 %v9383_v55  ;;  %v9344_v55 = vld [vmem:[#allocation6 + $0xaa4] sm:$0xf0] }
 0x3aa   :  { %v9347_v39 = vor.u32 %v10246_v21, %v9344_v55  ;;  %v9314_v21 = vld [vmem:[#allocation6 + $0xa58] sm:$0xf]  ;;  %v10239_v55 = vld [vmem:[#allocation6 + $0xa60] sm:$0xf0] }
 0x3ab   :  { %6347 = vmatpush.bf16.msrb.mxu0 %v9207_v31  ;;  %6280 = vmatpush.bf16.msrb.mxu3 %v9451_v19  ;;  %v9438_v31 = vld [vmem:[#allocation6 + $0xb58] sm:$0xf]  ;;  %v5480_v46 = vpop.f32.mrf.mxu0  ;;  %v9332_v19 = vld [vmem:[#allocation6 + $0xa8c] sm:$0xf0] }
 0x3ac   :  { %v9439_v32 = vor.u32 %v10271_v0, %v9438_v31  ;;  %v9335_v63 = vor.u32 %v10243_v9, %v9332_v19  ;;  %v9500_v31 = vld [vmem:[#allocation6 + $0xbdc] sm:$0xf0] }
 0x3ad   :  { %6321 = vmatpush.bf16.msra.mxu2 %v9371_v20  ;;  %v10197_v20 = vld [vmem:[#allocation6 + $0x910] sm:$0xf0] }
 0x3af   :  { %6348 = vmatpush.bf16.msrb.mxu0 %v9195_v29  ;;  %6281 = vmatpush.bf16.msrb.mxu3 %v9439_v32 }
 0x3b1   :  { %v5464_v49 = vpop.f32.mrf.mxu3  ;;  %6322 = vmatpush.bf16.msra.mxu2 %v9359_v45  ;;  %v9326_v45 = vld [vmem:[#allocation6 + $0xa70] sm:$0xf] }
 0x3b2   :  { %v5465_v35 = vadd.f32 %v5464_v49, %v4926_v41  ;;  %6297 = vmatmul.bf16.vlgmr.msra.gmra.mxu0 %v10800_v13  ;;  %v5494_v49 = vpop.f32.mrf.mxu1 }
 0x3b3   :  { %6349 = vmatpush.bf16.msrb.mxu0 %v9183_v14  ;;  %v10288_v14 = vld [vmem:[#allocation6 + $0xbec] sm:$0xf]  ;;  %v5534_v9 = vpop.f32.mrf.mxu0 }
 0x3b4   :  { %v5479_v24 = vadd.f32 %v5478_v12, %v5465_v35  ;;  %v9426_v12 = vld [vmem:[#allocation6 + $0xb40] sm:$0xf]  ;;  %v9515_v2 = vor.u32 %v10288_v14, %v9512_v16  ;;  %v9290_v14 = vld [vmem:[#allocation6 + $0xa28] sm:$0xf]  ;;  %v10233_v16 = vld [vmem:[#allocation6 + $0xa30] sm:$0xf0] }
 0x3b5   :  { %6323 = vmatpush.bf16.msra.mxu2 %v9347_v39  ;;  %v9427_v35 = vor.u32 %v10268_v25, %v9426_v12  ;;  %v10279_v12 = vld [vmem:[#allocation6 + $0xba4] sm:$0xf]  ;;  %v9476_v25 = vld [vmem:[#allocation6 + $0xbac] sm:$0xf0] }
 0x3b6   :  { %v5493_v10 = vadd.f32 %v5492_v57, %v5479_v24  ;;  %v10242_v24 = vld [vmem:[#allocation6 + $0xa78] sm:$0xf0] }
 0x3b7   :  { %6350 = vmatpush.bf16.msrb.mxu0 %v9171_v38  ;;  %6282 = vmatpush.bf16.msrb.mxu3 %v9427_v35  ;;  %v10285_v38 = vld [vmem:[#allocation6 + $0xbd4] sm:$0xf]  ;;  %v9327_v5 = vor.u32 %v10242_v24, %v9326_v45  ;;  %v9452_v24 = vld [vmem:[#allocation6 + $0xb7c] sm:$0xf0] }
 0x3b8   :  { %v5582_v1 = vmax.f32 %v5493_v10, 0.0  ;;  %v9503_v60 = vor.u32 %v10285_v38, %v9500_v31  ;;  %v9315_v10 = vor.u32 %v10239_v55, %v9314_v21  ;;  %v10273_v45 = vld [vmem:[#allocation6 + $0xb74] sm:$0xf]  ;;  %v10227_v21 = vld [vmem:[#allocation6 + $0xa00] sm:$0xf0] }
 0x3b9   :  { %v5466_v29 = vpop.f32.mrf.mxu3  ;;  %6324 = vmatpush.bf16.msra.mxu2 %v9335_v63  ;;  %v9291_v63 = vor.u32 %v10233_v16, %v9290_v14  ;;  %v9455_v31 = vor.u32 %v10273_v45, %v9452_v24  ;;  %v9428_v14 = vld [vmem:[#allocation6 + $0xb4c] sm:$0xf0]  ;;  %v9410_v24 = vld [vmem:[#allocation6 + $0xb18] sm:$0xf] }
 0x3ba   :  { %v5467_v34 = vadd.f32 %v5466_v29, %v4926_v41  ;;  %v9147_v41 = vor.u32 %v10197_v20, %v9146_v36  ;;  %v10282_v29 = vld [vmem:[#allocation6 + $0xbbc] sm:$0xf]  ;;  %v10236_v36 = vld [vmem:[#allocation6 + $0xa48] sm:$0xf0]  ;;  %v4927_v20 = vperm.slane %v10787_v61, 2 }
 0x3bb   :  { %6351 = vmatpush.bf16.msrb.mxu0 %v9159_v56  ;;  %6331 = vmatpush.bf16.msra.mxu3 %v9515_v2  ;;  %v9302_v56 = vld [vmem:[#allocation6 + $0xa40] sm:$0xf]  ;;  %v9464_v2 = vld [vmem:[#allocation6 + $0xb94] sm:$0xf0] }
 0x3bc   :  { %v5481_v48 = vadd.f32 %v5480_v46, %v5467_v34  ;;  %v9488_v46 = vld [vmem:[#allocation6 + $0xbc4] sm:$0xf0]  ;;  %v5506_v34 = vpop.f32.mrf.mxu2  ;;  %v9303_v35 = vor.u32 %v10236_v36, %v9302_v56  ;;  %v5536_v36 = vpop.f32.mrf.mxu0 }
 0x3bd   :  { %v9491_v39 = vor.u32 %v10282_v29, %v9488_v46  ;;  %v10270_v29 = vld [vmem:[#allocation6 + $0xb5c] sm:$0xf]  ;;  %v9440_v46 = vld [vmem:[#allocation6 + $0xb64] sm:$0xf0] }
 0x3be   :  { %v5495_v57 = vadd.f32 %v5494_v49, %v5481_v48  ;;  %v9479_v49 = vor.u32 %v10279_v12, %v9476_v25  ;;  %v10276_v48 = vld [vmem:[#allocation6 + $0xb8c] sm:$0xf]  ;;  %v9254_v12 = vld [vmem:[#allocation6 + $0x9e0] sm:$0xf] }
 0x3bf   :  { %6352 = vmatpush.bf16.msrb.mxu0 %v9147_v41  ;;  %6332 = vmatpush.bf16.msra.mxu3 %v9503_v60  ;;  %v9467_v19 = vor.u32 %v10276_v48, %v9464_v2  ;;  %v10230_v41 = vld [vmem:[#allocation6 + $0xa18] sm:$0xf0]  ;;  %v10224_v25 = vld [vmem:[#allocation6 + $0x9e8] sm:$0xf0] }
 0x3c0   :  { %v5586_v0 = vmax.f32 %v5495_v57, 0.0  ;;  %v9278_v57 = vld [vmem:[#allocation6 + $0xa10] sm:$0xf]  ;;  %v9255_v2 = vor.u32 %v10224_v25, %v9254_v12 }
 0x3c1   :  { %v9279_v60 = vor.u32 %v10230_v41, %v9278_v57 }
 0x3c2   :  { %v10805_v32 = vpack.c.bf16 %v5586_v0, %v5582_v1  ;;  %6353 = vmatmul.bf16.vlgmr.msrb.gmra.mxu0 %v10800_v13  ;;  %v5507_v13 = vadd.f32 %v5506_v34, %v4927_v20 }
 0x3c3   :  { %6333 = vmatpush.bf16.msra.mxu3 %v9491_v39  ;;  %v9443_v39 = vor.u32 %v10270_v29, %v9440_v46  ;;  %v9386_v29 = vld [vmem:[#allocation6 + $0xae8] sm:$0xf]  ;;  %v10257_v46 = vld [vmem:[#allocation6 + $0xaf0] sm:$0xf0] }
 0x3c4   :  { %6255 = vmatmul.bf16.vlgmr.msrb.gmra.mxu1 %v10805_v32  ;;  %v5508_v38 = vpop.f32.mrf.mxu2 }
 0x3c5   :  { %6359 = vmatpush.bf16.msrb.mxu1 %v9327_v5  ;;  %v9266_v5 = vld [vmem:[#allocation6 + $0x9f8] sm:$0xf]  ;;  %v5509_v55 = vadd.f32 %v5508_v38, %v4927_v20  ;;  %v10263_v38 = vld [vmem:[#allocation6 + $0xb20] sm:$0xf0] }
 0x3c6   :  { %v9267_v34 = vor.u32 %v10227_v21, %v9266_v5  ;;  %v10260_v5 = vld [vmem:[#allocation6 + $0xb08] sm:$0xf0] }
 0x3c7   :  { %6334 = vmatpush.bf16.msra.mxu3 %v9479_v49 }
 0x3c9   :  { %6360 = vmatpush.bf16.msrb.mxu1 %v9315_v10 }
 0x3cb   :  { %6335 = vmatpush.bf16.msra.mxu3 %v9467_v19  ;;  %v9422_v19 = vld [vmem:[#allocation6 + $0xb30] sm:$0xf] }
 0x3cd   :  { %6361 = vmatpush.bf16.msrb.mxu1 %v9303_v35  ;;  %v10267_v35 = vld [vmem:[#allocation6 + $0xb44] sm:$0xf] }
 0x3ce   :  { %v9431_v16 = vor.u32 %v10267_v35, %v9428_v14  ;;  %v9362_v35 = vld [vmem:[#allocation6 + $0xab8] sm:$0xf]  ;;  %v10251_v14 = vld [vmem:[#allocation6 + $0xac0] sm:$0xf0] }
 0x3cf   :  { %6336 = vmatpush.bf16.msra.mxu3 %v9455_v31  ;;  %v9411_v31 = vor.u32 %v10263_v38, %v9410_v24  ;;  %v9338_v24 = vld [vmem:[#allocation6 + $0xa88] sm:$0xf]  ;;  %v10245_v38 = vld [vmem:[#allocation6 + $0xa90] sm:$0xf0] }
 0x3d1   :  { %v5520_v1 = vpop.f32.mrf.mxu3  ;;  %6362 = vmatpush.bf16.msrb.mxu1 %v9291_v63  ;;  %v9242_v63 = vld [vmem:[#allocation6 + $0x9c8] sm:$0xf] }
 0x3d2   :  { %v5521_v0 = vadd.f32 %v5520_v1, %v5507_v13  ;;  %v10266_v13 = vld [vmem:[#allocation6 + $0xb38] sm:$0xf0]  ;;  %v10221_v1 = vld [vmem:[#allocation6 + $0x9d0] sm:$0xf0] }
 0x3d3   :  { %6337 = vmatpush.bf16.msra.mxu3 %v9443_v39  ;;  %v9423_v57 = vor.u32 %v10266_v13, %v9422_v19  ;;  %v9243_v45 = vor.u32 %v10221_v1, %v9242_v63  ;;  %v4928_v39 = vperm.slane %v10787_v61, 3  ;;  %v10248_v19 = vld [vmem:[#allocation6 + $0xaa8] sm:$0xf0] }
 0x3d4   :  { %6311 = vmatmul.bf16.vlgmr.msra.gmra.mxu1 %v10805_v32  ;;  %v5535_v10 = vadd.f32 %v5534_v9, %v5521_v0  ;;  %v5548_v0 = vpop.f32.mrf.mxu1 }
 0x3d5   :  { %6363 = vmatpush.bf16.msrb.mxu1 %v9279_v60  ;;  %v9398_v60 = vld [vmem:[#allocation6 + $0xb00] sm:$0xf] }
 0x3d6   :  { %v5583_v48 = vmax.f32 %v5535_v10, 0.0  ;;  %v9399_v21 = vor.u32 %v10260_v5, %v9398_v60  ;;  %v9387_v10 = vor.u32 %v10257_v46, %v9386_v29  ;;  %v10287_v29 = vld [vmem:[#allocation6 + $0xbe0] sm:$0xf0] }
 0x3d7   :  { %6338 = vmatpush.bf16.msra.mxu3 %v9431_v16 }
 0x3d9   :  { %v5522_v56 = vpop.f32.mrf.mxu3  ;;  %6364 = vmatpush.bf16.msrb.mxu1 %v9267_v34  ;;  %v9374_v34 = vld [vmem:[#allocation6 + $0xad0] sm:$0xf] }
 0x3da   :  { %v5523_v49 = vadd.f32 %v5522_v56, %v5509_v55  ;;  %v5562_v55 = vpop.f32.mrf.mxu2  ;;  %v10254_v56 = vld [vmem:[#allocation6 + $0xad8] sm:$0xf0] }
 0x3dc   :  { %v5537_v20 = vadd.f32 %v5536_v36, %v5523_v49  ;;  %v5549_v36 = vadd.f32 %v5548_v0, %v4928_v39  ;;  %v5550_v12 = vpop.f32.mrf.mxu1  ;;  %v9375_v49 = vor.u32 %v10254_v56, %v9374_v34  ;;  %v9482_v56 = vld [vmem:[#allocation6 + $0xba8] sm:$0xf] }
 0x3dd   :  { %6365 = vmatpush.bf16.msrb.mxu1 %v9255_v2  ;;  %v9350_v2 = vld [vmem:[#allocation6 + $0xaa0] sm:$0xf] }
 0x3de   :  { %v5587_v9 = vmax.f32 %v5537_v20, 0.0  ;;  %v5563_v16 = vadd.f32 %v5562_v55, %v5549_v36  ;;  %v9363_v20 = vor.u32 %v10251_v14, %v9362_v35  ;;  %v9506_v55 = vld [vmem:[#allocation6 + $0xbd8] sm:$0xf]  ;;  %v10281_v36 = vld [vmem:[#allocation6 + $0xbb0] sm:$0xf0] }
 0x3df   :  { %v9507_v46 = vor.u32 %v10287_v29, %v9506_v55  ;;  %v9458_v14 = vld [vmem:[#allocation6 + $0xb78] sm:$0xf] }
 0x3e0   :  { %v5591_v41 = vpack.c.bf16 %v5587_v9, %v5583_v48  ;;  %v9351_v9 = vor.u32 %v10248_v19, %v9350_v2  ;;  %v10269_v19 = vld [vmem:[#allocation6 + $0xb50] sm:$0xf0] }
 0x3e1   :  { %6366 = vmatpush.bf16.msrb.mxu1 %v9243_v45  ;;  %v10290_v45 = vld [vmem:[#allocation6 + $0xbf8] sm:$0xf0] }
 0x3e2   :  { %6269 = vmatmul.bf16.vlgmr.msrb.gmra.mxu2 %v5591_v41  ;;  %v5564_v48 = vpop.f32.mrf.mxu2 }
 0x3e3   :  { %6373 = vmatpush.bf16.msrb.mxu2 %v9423_v57  ;;  %v9518_v57 = vld [vmem:[#allocation6 + $0xbf0] sm:$0xf] }
 0x3e4   :  { %6367 = vmatmul.bf16.vlgmr.msrb.gmra.mxu1 %v10805_v32  ;;  %v5551_v32 = vadd.f32 %v5550_v12, %v4928_v39  ;;  %v9519_v60 = vor.u32 %v10290_v45, %v9518_v57  ;;  %v9494_v39 = vld [vmem:[#allocation6 + $0xbc0] sm:$0xf]  ;;  %v9483_v12 = vor.u32 %v10281_v36, %v9482_v56 }
 0x3e6   :  { %v5565_v61 = vadd.f32 %v5564_v48, %v5551_v32  ;;  %v9446_v48 = vld [vmem:[#allocation6 + $0xb60] sm:$0xf] }
 0x3e7   :  { %6374 = vmatpush.bf16.msrb.mxu2 %v9411_v31 }
 0x3eb   :  { %6375 = vmatpush.bf16.msrb.mxu2 %v9399_v21  ;;  %v9339_v21 = vor.u32 %v10245_v38, %v9338_v24 }
 0x3ef   :  { %6376 = vmatpush.bf16.msrb.mxu2 %v9387_v10  ;;  %v10284_v10 = vld [vmem:[#allocation6 + $0xbc8] sm:$0xf0] }
 0x3f0   :  { %v9495_v34 = vor.u32 %v10284_v10, %v9494_v39 }
 0x3f1   :  { %v5576_v25 = vpop.f32.mrf.mxu3 }
 0x3f2   :  { %6325 = vmatmul.bf16.vlgmr.msra.gmra.mxu2 %v5591_v41  ;;  %v5577_v13 = vadd.f32 %v5576_v25, %v5563_v16  ;;  %v9470_v25 = vld [vmem:[#allocation6 + $0xb90] sm:$0xf]  ;;  %v10275_v16 = vld [vmem:[#allocation6 + $0xb80] sm:$0xf0] }
 0x3f3   :  { %6377 = vmatpush.bf16.msrb.mxu2 %v9375_v49  ;;  %v10278_v49 = vld [vmem:[#allocation6 + $0xb98] sm:$0xf0]  ;;  %v9459_v32 = vor.u32 %v10275_v16, %v9458_v14 }
 0x3f4   :  { %v5584_v31 = vmax.f32 %v5577_v13, 0.0  ;;  %v9471_v35 = vor.u32 %v10278_v49, %v9470_v25 }
 0x3f7   :  { %6378 = vmatpush.bf16.msrb.mxu2 %v9363_v20  ;;  %v10272_v20 = vld [vmem:[#allocation6 + $0xb68] sm:$0xf0] }
 0x3f8   :  { %v9447_v2 = vor.u32 %v10272_v20, %v9446_v48 }
 0x3f9   :  { %v5578_v63 = vpop.f32.mrf.mxu3 }
 0x3fa   :  { %v5579_v1 = vadd.f32 %v5578_v63, %v5565_v61 }
 0x3fb   :  { %6379 = vmatpush.bf16.msrb.mxu2 %v9351_v9 }
 0x3fc   :  { %v5588_v0 = vmax.f32 %v5579_v1, 0.0 }
 0x3fe   :  { %v5592_v5 = vpack.c.bf16 %v5588_v0, %v5584_v31  ;;  %v2425_v0 = vadd.f32 %v10620_v3, %v10614_v17  ;;  %v10822_v3 = vld [vmem:[#allocation7] sm:$0x7] }
 0x3ff   :  { %6380 = vmatpush.bf16.msrb.mxu2 %v9339_v21  ;;  %v6409_v14 = vperm.slane %v10822_v3, 0 }
 0x400   :  { %6283 = vmatmul.bf16.vlgmr.msrb.gmra.mxu3 %v5592_v5  ;;  %v2439_v21 = vadd.f32 %v10638_v22, %v2425_v0 }
 0x401   :  { %6387 = vmatpush.bf16.msrb.mxu3 %v9519_v60 }
 0x402   :  { %6381 = vmatmul.bf16.vlgmr.msrb.gmra.mxu2 %v5591_v41  ;;  %v9434_v41 = vld [vmem:[#allocation6 + $0xb48] sm:$0xf] }
 0x403   :  { %v9435_v61 = vor.u32 %v10269_v19, %v9434_v41 }
 0x405   :  { %6388 = vmatpush.bf16.msrb.mxu3 %v9507_v46  ;;  %v2453_v46 = vadd.f32 %v10642_v47, %v2439_v21 }
 0x409   :  { %6389 = vmatpush.bf16.msrb.mxu3 %v9495_v34 }
 0x40d   :  { %6390 = vmatpush.bf16.msrb.mxu3 %v9483_v12  ;;  %v3091_v12 = vadd.f32 %v10649_v27, %v2453_v46 }
 0x40f   :  { %v3105_v49 = vadd.f32 %v10665_v4, %v3091_v12 }
 0x410   :  { %6339 = vmatmul.bf16.vlgmr.msra.gmra.mxu3 %v5592_v5 }
 0x411   :  { %6391 = vmatpush.bf16.msrb.mxu3 %v9471_v35 }
 0x415   :  { %6392 = vmatpush.bf16.msrb.mxu3 %v9459_v32  ;;  %v3119_v32 = vadd.f32 %v10683_v51, %v3105_v49 }
 0x417   :  { %v3133_v4 = vadd.f32 %v10688_v33, %v3119_v32 }
 0x419   :  { %6393 = vmatpush.bf16.msrb.mxu3 %v9447_v2 }
 0x41d   :  { %6394 = vmatpush.bf16.msrb.mxu3 %v9435_v61 }
 0x41f   :  { %v6242_v63 = vpop.f32.mrf.mxu0 }
 0x420   :  { %6395 = vmatmul.bf16.vlgmr.msrb.gmra.mxu3 %v5592_v5  ;;  %v2481_v5 = vadd.f32 %v10629_v18, %v10623_v43 }
 0x422   :  { %v2495_v10 = vadd.f32 %v10651_v28, %v2481_v5 }
 0x424   :  { %v2509_v36 = vadd.f32 %v10659_v11, %v2495_v10  ;;  %v6410_v11 = vperm.slane %v10822_v3, 1 }
 0x426   :  { %v3147_v43 = vadd.f32 %v10669_v44, %v2509_v36 }
 0x427   :  { %v6244_v57 = vpop.f32.mrf.mxu0 }
 0x428   :  { %v3161_v27 = vadd.f32 %v10681_v6, %v3147_v43 }
 0x42a   :  { %v3175_v44 = vadd.f32 %v10693_v37, %v3161_v27 }
 0x42c   :  { %v3189_v61 = vadd.f32 %v10695_v54, %v3175_v44 }
 0x42e   :  { %v4825_v51 = vadd.f32 %v10790_v53, %v3189_v61 }
 0x42f   :  { %v6298_v31 = vpop.f32.mrf.mxu0 }
 0x437   :  { %v6300_v22 = vpop.f32.mrf.mxu0 }
 0x43f   :  { %v6354_v37 = vpop.f32.mrf.mxu0 }
 0x441   :  { %v6256_v13 = vpop.f32.mrf.mxu1 }
 0x442   :  { %v6257_v29 = vadd.f32 %v6256_v13, %v6242_v63  ;;  %v4824_v13 = vadd.f32 %v10778_v42, %v3133_v4 }
 0x447   :  { %v6356_v46 = vpop.f32.mrf.mxu0 }
 0x449   :  { %v6258_v9 = vpop.f32.mrf.mxu1 }
 0x44a   :  { %v6259_v18 = vadd.f32 %v6258_v9, %v6244_v57 }
 0x451   :  { %v6312_v38 = vpop.f32.mrf.mxu1 }
 0x452   :  { %v6313_v34 = vadd.f32 %v6312_v38, %v6298_v31 }
 0x459   :  { %v6314_v17 = vpop.f32.mrf.mxu1 }
 0x45a   :  { %v6315_v2 = vadd.f32 %v6314_v17, %v6300_v22 }
 0x461   :  { %v6368_v6 = vpop.f32.mrf.mxu1 }
 0x465   :  { %v6270_v1 = vpop.f32.mrf.mxu2 }
 0x466   :  { %v6271_v39 = vadd.f32 %v6270_v1, %v6257_v29 }
 0x46d   :  { %v6272_v45 = vpop.f32.mrf.mxu2 }
 0x46e   :  { %v6273_v48 = vadd.f32 %v6272_v45, %v6259_v18  ;;  %v2537_v45 = vadd.f32 %v10647_v15, %v10635_v62  ;;  %v6411_v62 = vperm.slane %v10822_v3, 2  ;;  %v6370_v15 = vpop.f32.mrf.mxu1 }
 0x46f   :  { %v6371_v10 = vadd.f32 %v6370_v15, %v6356_v46 }
 0x470   :  { %v2551_v42 = vadd.f32 %v10667_v7, %v2537_v45 }
 0x472   :  { %v2565_v0 = vadd.f32 %v10675_v26, %v2551_v42 }
 0x475   :  { %v6326_v60 = vpop.f32.mrf.mxu2 }
 0x476   :  { %v6327_v25 = vadd.f32 %v6326_v60, %v6313_v34 }
 0x47d   :  { %v6328_v47 = vpop.f32.mrf.mxu2 }
 0x47e   :  { %v6329_v63 = vadd.f32 %v6328_v47, %v6315_v2 }
 0x483   :  { %v6284_v24 = vpop.f32.mrf.mxu3 }
 0x484   :  { %v6285_v56 = vadd.f32 %v6284_v24, %v6271_v39  ;;  %v6369_v24 = vadd.f32 %v6368_v6, %v6354_v37 }
 0x486   :  { %v6401_v28 = vadd.f32 %v6285_v56, %v10772_v58 }
 0x488   :  { %v6415_v41 = vadd.f32 %v6409_v14, %v6401_v28 }
 0x48b   :  { %v6286_v55 = vpop.f32.mrf.mxu3 }
 0x48c   :  { %v6287_v19 = vadd.f32 %v6286_v55, %v6273_v48  ;;  %v3203_v55 = vadd.f32 %v10698_v40, %v2565_v0 }
 0x48e   :  { %v6404_v57 = vadd.f32 %v6287_v19, %v4824_v13  ;;  %v3217_v7 = vadd.f32 %v10700_v30, %v3203_v55 }
 0x490   :  { %v6418_v38 = vadd.f32 %v6409_v14, %v6404_v57  ;;  %v3231_v26 = vadd.f32 %v10706_v50, %v3217_v7 }
 0x492   :  { %v3245_v40 = vadd.f32 %v10709_v59, %v3231_v26 }
 0x493   :  { %v6340_v35 = vpop.f32.mrf.mxu3 }
 0x494   :  { %v6341_v16 = vadd.f32 %v6340_v35, %v6327_v25  ;;  %v4826_v17 = vadd.f32 %v10798_v8, %v3245_v40 }
 0x496   :  { %v6402_v20 = vadd.f32 %v6341_v16, %v10785_v52  ;;  %v6382_v52 = vpop.f32.mrf.mxu2 }
 0x497   :  { %v6383_v53 = vadd.f32 %v6382_v52, %v6369_v24 }
 0x498   :  { %v6416_v58 = vadd.f32 %v6410_v11, %v6402_v20 }
 0x49a   :  { %v6421_v1 = vpack.c.bf16 %v6416_v58, %v6415_v41 }
 0x49b   :  { %v6342_v9 = vpop.f32.mrf.mxu3 }
 0x49c   :  { %6425 = vst [vmem:[%s10865_s5] sm:$0xff] %v6421_v1  ;;  %v6343_v33 = vadd.f32 %v6342_v9, %v6329_v63 }
 0x49e   :  { %v6405_v54 = vadd.f32 %v6343_v33, %v4825_v51  ;;  %v6384_v39 = vpop.f32.mrf.mxu2 }
 0x49f   :  { %v6385_v56 = vadd.f32 %v6384_v39, %v6371_v10 }
 0x4a0   :  { %v6419_v31 = vadd.f32 %v6410_v11, %v6405_v54 }
 0x4a2   :  { %v6423_v60 = vpack.c.bf16 %v6419_v31, %v6418_v38 }
 0x4a3   :  { %v6396_v21 = vpop.f32.mrf.mxu3 }
 0x4a4   :  { %6427 = vst [vmem:[%s10865_s5 + $0xc] sm:$0xff] %v6423_v60  ;;  %v6397_v29 = vadd.f32 %v6396_v21, %v6383_v53 }
 0x4a6   :  { %v6403_v5 = vadd.f32 %v6397_v29, %v10795_v23 }
 0x4a8   :  { %v6417_v34 = vadd.f32 %v6411_v62, %v6403_v5 }
 0x4aa   :  { %v6422_v36 = vpack.c.bf16 %v6417_v34, %v6417_v34 }
 0x4ab   :  { %v6398_v12 = vpop.f32.mrf.mxu3 }
 0x4ac   :  { %6426 = vst [vmem:[%s10865_s5 + $0x8] sm:$0xf] %v6422_v36  ;;  %v6399_v30 = vadd.f32 %v6398_v12, %v6385_v56 }
 0x4ae   :  { %v6406_v3 = vadd.f32 %v6399_v30, %v4826_v17 }
 0x4b0   :  { %v6420_v23 = vadd.f32 %v6411_v62, %v6406_v3 }
 0x4b2   :  { %v6424_v22 = vpack.c.bf16 %v6420_v23, %v6420_v23 }
 0x4b4   :  { %6428 = vst [vmem:[%s10865_s5 + $0x14] sm:$0xf] %v6424_v22 }
 0x4b5   :  { %6433 = vsyncpa [#allocation3], 1 }
 0x4b6   :  { %6434 = vsyncpa [#allocation5], 1 }
 0x4b7   :  { %6435 = vsyncpa [#allocation8], 1 }

</bundles_post_ra>
